<compile_context>
chip_gen: v5e
topology: v5e:2x2
jax: 0.10.0
libtpu: 0.0.40
codegen_flags: <defaults>
</compile_context>

<pallas_src>
import numpy as np

import jax
import jax.numpy as jnp
from jax.experimental import pallas as pl
from jax.experimental.pallas import tpu as pltpu

# ----------------------------------------------------------------------------
# Geometry implied by the module: input 30x45 -> conv stack -> (16, 2, 6) = 192.
# ----------------------------------------------------------------------------
H_IN, W_IN = 30, 45
OH1, OW1 = (H_IN - 3) // 2 + 1, (W_IN - 3) // 2 + 1        # 14, 22  (stride 2)
OH2, OW2 = (OH1 - 3) // 2 + 1, (OW1 - 3) // 2 + 1          # 6, 10   (stride 2)
OH3, OW3 = OH2 - 2, OW2 - 2                                # 4, 8    (stride 1)
OH4, OW4 = OH3 - 2, OW3 - 2                                # 2, 6    (stride 1)
R2, R3, R4 = OH2 * OW2, OH3 * OW3, OH4 * OW4               # 60, 32, 12
assert 16 * R4 == 192


# ----------------------------------------------------------------------------
# Fused Pallas kernel: whole forward in one call.
# ----------------------------------------------------------------------------
def duelqnet_fused_kernel(
    p1g_ref,                      # (9, B*60, 9)  conv1 patches pre-gathered per conv2 tap
    w1_ref, s1_ref,               # (9, 8), (1, 8)        BN-folded conv1 weight / shift
    w2_ref, s2_ref,               # (9, 8, 8), (1, 8)
    sel3_ref, w3_ref, s3_ref,     # (9, B*32, B*60), (9, 8, 8), (1, 8)
    sel4_ref, w4_ref, s4_ref,     # (9, B*12, B*32), (9, 8, 16), (1, 16)
    rsel_ref, w1h_ref, b1h_ref,   # (12, B, B*12), (12, 16, 128), (1, 128)
    w2s_ref, b2s_ref,             # (128, 1), (1, 1)
    w2a_ref, b2a_ref,             # (128, A), (1, A)
    o_ref,                        # (B, A)
):
    f32 = jnp.float32

    # ---- conv1 + conv2 fused over the 9 conv2 taps (BN folded into weights).
    z2 = None
    for k in range(9):
        p = p1g_ref[k]                                                   # (B*60, 9)
        a1 = jnp.maximum(
            jnp.dot(p, w1_ref[...], preferred_element_type=f32) + s1_ref[...], 0.0)
        t = jnp.dot(a1, w2_ref[k], preferred_element_type=f32)
        z2 = t if z2 is None else z2 + t
    a2 = jnp.maximum(z2 + s2_ref[...], 0.0)                              # (B*60, 8)

    # ---- conv3: in-kernel patch gather via constant 0/1 selection matmuls.
    z3 = None
    for k in range(9):
        g = jnp.dot(sel3_ref[k], a2, preferred_element_type=f32)         # (B*32, 8)
        t = jnp.dot(g, w3_ref[k], preferred_element_type=f32)
        z3 = t if z3 is None else z3 + t
    a3 = jnp.maximum(z3 + s3_ref[...], 0.0)                              # (B*32, 8)

    # ---- conv4.
    z4 = None
    for k in range(9):
        g = jnp.dot(sel4_ref[k], a3, preferred_element_type=f32)         # (B*12, 8)
        t = jnp.dot(g, w4_ref[k], preferred_element_type=f32)
        z4 = t if z4 is None else z4 + t
    a4 = jnp.maximum(z4 + s4_ref[...], 0.0)                              # (B*12, 16)

    # ---- dueling head, layer 1: lane-dense 128-wide (state ⊕ advantage) hidden.
    # H[b] = sum_r a4[b*12 + r, :] @ W1h[r]; W1h rows were permuted at init so
    # this consumes the (row=(b,h,w), lane=c) conv4 layout exactly like
    # PyTorch's NCHW x.view(-1, 192) split into x1/x2.
    hpre = None
    for r in range(R4):
        rows = jnp.dot(rsel_ref[r], a4, preferred_element_type=f32)      # (B, 16)
        t = jnp.dot(rows, w1h_ref[r], preferred_element_type=f32)        # (B, 128)
        hpre = t if hpre is None else hpre + t
    h = jnp.maximum(hpre + b1h_ref[...], 0.0)                            # (B, 128)

    # ---- layer 2: V and A through zero-padded weights (no in-kernel slicing).
    state_value = jnp.dot(h, w2s_ref[...], preferred_element_type=f32) + b2s_ref[...]  # (B, 1)
    adv = jnp.dot(h, w2a_ref[...], preferred_element_type=f32) + b2a_ref[...]          # (B, A)
    adv_mean = jnp.mean(adv, axis=1, keepdims=True)
    o_ref[...] = state_value + (adv - adv_mean)


# ----------------------------------------------------------------------------
# pallas_call wrapper (single launch, full-array blocks -- everything is tiny).
# ----------------------------------------------------------------------------
def _full_spec(shape):
    return pl.BlockSpec(shape, lambda i: (0,) * len(shape))


def duel_qnet_forward(x_nchw, kp):
    """x_nchw: (B, 1, 30, 45). kp: kernel-ready params from prepare_params()."""
    B = x_nchw.shape[0]
    x = x_nchw[:, 0].astype(jnp.float32)                                 # (B, 30, 45)

    # conv1 im2col (stride 2) on the raw input, then pre-gather the rows each
    # conv2 tap (stride 2) needs so all remaining patch extraction is in-kernel.
    p1 = jnp.stack(
        [x[:, kh:kh + 2 * (OH1 - 1) + 1:2, kw:kw + 2 * (OW1 - 1) + 1:2]
         for kh in range(3) for kw in range(3)], axis=-1)                # (B, 14, 22, 9)
    p1g = jnp.stack(
        [p1[:, kh:kh + 2 * (OH2 - 1) + 1:2, kw:kw + 2 * (OW2 - 1) + 1:2, :]
            .reshape(B * R2, 9)
         for kh in range(3) for kw in range(3)], axis=0)                 # (9, B*60, 9)

    args = (p1g,
            kp["w1"], kp["s1"], kp["w2"], kp["s2"],
            kp["sel3"], kp["w3"], kp["s3"],
            kp["sel4"], kp["w4"], kp["s4"],
            kp["rsel"], kp["w1h"], kp["b1h"],
            kp["w2s"], kp["b2s"], kp["w2a"], kp["b2a"])
    A = kp["w2a"].shape[1]
    return pl.pallas_call(
        duelqnet_fused_kernel,
        out_shape=jax.ShapeDtypeStruct((B, A), jnp.float32),
        grid=(1,),
        in_specs=[_full_spec(a.shape) for a in args],
        out_specs=_full_spec((B, A)),
        compiler_params=pltpu.CompilerParams(dimension_semantics=("arbitrary",)),
    )(*args)


# ----------------------------------------------------------------------------
# Parameters: raw (PyTorch-like) init + one-time kernel-ready preparation.
# ----------------------------------------------------------------------------
def init_params(key, n_actions):
    def conv(k, cin, cout):
        k1, k2, k3, k4, k5 = jax.random.split(k, 5)
        return dict(
            w=0.1 * jax.random.normal(k1, (3, 3, cin, cout), jnp.float32),
            gamma=1.0 + 0.1 * jax.random.normal(k2, (cout,), jnp.float32),
            beta=0.1 * jax.random.normal(k3, (cout,), jnp.float32),
            mean=0.1 * jax.random.normal(k4, (cout,), jnp.float32),
            var=jax.random.uniform(k5, (cout,), jnp.float32, 0.5, 1.5))

    def linear(k, din, dout):
        k1, k2 = jax.random.split(k)
        bound = 1.0 / float(din) ** 0.5
        return (jax.random.uniform(k1, (din, dout), jnp.float32, -bound, bound),
                jax.random.uniform(k2, (1, dout), jnp.float32, -bound, bound))

    keys = jax.random.split(key, 8)
    p = {"conv1": conv(keys[0], 1, 8), "conv2": conv(keys[1], 8, 8),
         "conv3": conv(keys[2], 8, 8), "conv4": conv(keys[3], 8, 16)}
    p["w1s"], p["b1s"] = linear(keys[4], 96, 64)
    p["w2s"], p["b2s"] = linear(keys[5], 64, 1)
    p["w1a"], p["b1a"] = linear(keys[6], 96, 64)
    p["w2a"], p["b2a"] = linear(keys[7], 64, n_actions)
    return p


def _fold_bn(cp, eps=1e-5):
    scale = cp["gamma"] / jnp.sqrt(cp["var"] + eps)
    shift = cp["beta"] - cp["mean"] * scale
    return cp["w"] * scale[None, None, None, :], shift


def _conv_selectors(batch, ih, iw, oh, ow, stride):
    """0/1 matrices: (S[k] @ act)[b*oh*ow + r] = act row at the k-th 3x3 tap for r."""
    sel = np.zeros((9, batch * oh * ow, batch * ih * iw), np.float32)
    for kh in range(3):
        for kw in range(3):
            k = kh * 3 + kw
            for b in range(batch):
                for oy in range(oh):
                    for ox in range(ow):
                        row = b * oh * ow + oy * ow + ox
                        col = b * ih * iw + (oy * stride + kh) * iw + (ox * stride + kw)
                        sel[k, row, col] = 1.0
    return jnp.asarray(sel)


def _head_row_selectors(batch, rows):
    rsel = np.zeros((rows, batch, batch * rows), np.float32)
    for r in range(rows):
        for b in range(batch):
            rsel[r, b, b * rows + r] = 1.0
    return jnp.asarray(rsel)


def prepare_params(p, n_actions, batch):
    """Fold BN, stack conv taps, build gather selectors and the lane-dense head."""
    kp = {}
    w1, sh1 = _fold_bn(p["conv1"]); kp["w1"] = w1.reshape(9, 8);      kp["s1"] = sh1.reshape(1, 8)
    w2, sh2 = _fold_bn(p["conv2"]); kp["w2"] = w2.reshape(9, 8, 8);   kp["s2"] = sh2.reshape(1, 8)
    w3, sh3 = _fold_bn(p["conv3"]); kp["w3"] = w3.reshape(9, 8, 8);   kp["s3"] = sh3.reshape(1, 8)
    w4, sh4 = _fold_bn(p["conv4"]); kp["w4"] = w4.reshape(9, 8, 16);  kp["s4"] = sh4.reshape(1, 16)

    kp["sel3"] = _conv_selectors(batch, OH2, OW2, OH3, OW3, 1)        # (9, B*32, B*60)
    kp["sel4"] = _conv_selectors(batch, OH3, OW3, OH4, OW4, 1)        # (9, B*12, B*32)
    kp["rsel"] = _head_row_selectors(batch, R4)                       # (12, B, B*12)

    # FC layer 1: rows permuted to consume the (row=(b,h,w), lane=c) conv4
    # layout directly (== PyTorch NCHW flatten: feature m = c*12 + h*6 + w),
    # packed block-diagonally so state(64) ⊕ advantage(64) = one 128-wide matmul.
    w1s_rc = p["w1s"].reshape(8, R4, 64).transpose(1, 0, 2)           # (12, 8, 64)
    w1a_rc = p["w1a"].reshape(8, R4, 64).transpose(1, 0, 2)           # (12, 8, 64)
    z = jnp.zeros((R4, 8, 64), jnp.float32)
    kp["w1h"] = jnp.concatenate(
        [jnp.concatenate([w1s_rc, z], axis=2),
         jnp.concatenate([z, w1a_rc], axis=2)], axis=1)               # (12, 16, 128)
    kp["b1h"] = jnp.concatenate([p["b1s"], p["b1a"]], axis=1)         # (1, 128)

    # FC layer 2: zero-padded so V/A read their own half of the 128-wide hidden.
    kp["w2s"] = jnp.concatenate([p["w2s"], jnp.zeros((64, 1), jnp.float32)], axis=0)
    kp["w2a"] = jnp.concatenate([jnp.zeros((64, n_actions), jnp.float32), p["w2a"]], axis=0)
    kp["b2s"] = p["b2s"]
    kp["b2a"] = p["b2a"]
    return kp


# ----------------------------------------------------------------------------
# Pure-JAX reference (inference-mode BN), for a tolerance check.
# ----------------------------------------------------------------------------
def reference_forward(x, p, eps=1e-5):
    def conv_bn_relu(h, cp, stride):
        y = jax.lax.conv_general_dilated(
            h, cp["w"], window_strides=(stride, stride), padding="VALID",
            dimension_numbers=("NCHW", "HWIO", "NCHW"))
        scale = cp["gamma"] / jnp.sqrt(cp["var"] + eps)
        shift = cp["beta"] - cp["mean"] * scale
        return jnp.maximum(y * scale[None, :, None, None] + shift[None, :, None, None], 0.0)

    h = conv_bn_relu(x, p["conv1"], 2)
    h = conv_bn_relu(h, p["conv2"], 2)
    h = conv_bn_relu(h, p["conv3"], 1)
    h = conv_bn_relu(h, p["conv4"], 1)
    feat = h.reshape(h.shape[0], -1)                                   # (B, 192), NCHW flatten
    x1, x2 = feat[:, :96], feat[:, 96:]
    hs = jnp.maximum(x1 @ p["w1s"] + p["b1s"], 0.0)
    sv = hs @ p["w2s"] + p["b2s"]
    ha = jnp.maximum(x2 @ p["w1a"] + p["b1a"], 0.0)
    adv = ha @ p["w2a"] + p["b2a"]
    return sv + (adv - adv.mean(axis=1, keepdims=True))


if __name__ == "__main__":
    n_actions = 8
    batch = 2
    key = jax.random.PRNGKey(0)
    kx, kparam = jax.random.split(key)

    # 30x45 input is what the module implies: the conv stack gives (16, 2, 6)
    # -> exactly 192 features for x.view(-1, 192).
    x = jax.random.normal(kx, (batch, 1, H_IN, W_IN), jnp.float32)
    raw = init_params(kparam, n_actions)
    kp = prepare_params(raw, n_actions, batch)

    out = jax.jit(duel_qnet_forward)(x, kp)
    ref = jax.jit(reference_forward)(x, raw)
    jax.block_until_ready((out, ref))

    assert out.shape == (batch, n_actions) and out.dtype == jnp.float32
    # Loose tolerance: MXU f32 emulation / op-reordering noise, far below any
    # structural (permutation / gather) error.
    np.testing.assert_allclose(np.asarray(out), np.asarray(ref), rtol=5e-2, atol=5e-2)
    print("KERNEL_OK")
</pallas_src>

<mosaic_0001>
module attributes {stable_mosaic.version = 11 : i64} {
  func.func @duelqnet_fused_kernel(%arg0: i32, %arg1: memref<9x120x9xf32, #tpu.memory_space<vmem>>, %arg2: memref<9x8xf32, #tpu.memory_space<vmem>>, %arg3: memref<1x8xf32, #tpu.memory_space<vmem>>, %arg4: memref<9x8x8xf32, #tpu.memory_space<vmem>>, %arg5: memref<1x8xf32, #tpu.memory_space<vmem>>, %arg6: memref<9x64x120xf32, #tpu.memory_space<vmem>>, %arg7: memref<9x8x8xf32, #tpu.memory_space<vmem>>, %arg8: memref<1x8xf32, #tpu.memory_space<vmem>>, %arg9: memref<9x24x64xf32, #tpu.memory_space<vmem>>, %arg10: memref<9x8x16xf32, #tpu.memory_space<vmem>>, %arg11: memref<1x16xf32, #tpu.memory_space<vmem>>, %arg12: memref<12x2x24xf32, #tpu.memory_space<vmem>>, %arg13: memref<12x16x128xf32, #tpu.memory_space<vmem>>, %arg14: memref<1x128xf32, #tpu.memory_space<vmem>>, %arg15: memref<128x1xf32, #tpu.memory_space<vmem>>, %arg16: memref<1x1xf32, #tpu.memory_space<vmem>>, %arg17: memref<128x8xf32, #tpu.memory_space<vmem>>, %arg18: memref<1x8xf32, #tpu.memory_space<vmem>>, %arg19: memref<2x8xf32, #tpu.memory_space<vmem>>) attributes {dimension_semantics = [#tpu.dimension_semantics<arbitrary>], iteration_bounds = array<i64: 1>, scalar_prefetch = 0 : i64, scratch_operands = 0 : i64, tpu.core_type = #tpu.core_type<tc>, window_params = [{pipeline_mode = #tpu.pipeline_mode<synchronous>, transform_indices = @transform_0, window_bounds = array<i64: 9, 120, 9>}, {pipeline_mode = #tpu.pipeline_mode<synchronous>, transform_indices = @transform_1, window_bounds = array<i64: 9, 8>}, {pipeline_mode = #tpu.pipeline_mode<synchronous>, transform_indices = @transform_2, window_bounds = array<i64: 1, 8>}, {pipeline_mode = #tpu.pipeline_mode<synchronous>, transform_indices = @transform_3, window_bounds = array<i64: 9, 8, 8>}, {pipeline_mode = #tpu.pipeline_mode<synchronous>, transform_indices = @transform_4, window_bounds = array<i64: 1, 8>}, {pipeline_mode = #tpu.pipeline_mode<synchronous>, transform_indices = @transform_5, window_bounds = array<i64: 9, 64, 120>}, {pipeline_mode = #tpu.pipeline_mode<synchronous>, transform_indices = @transform_6, window_bounds = array<i64: 9, 8, 8>}, {pipeline_mode = #tpu.pipeline_mode<synchronous>, transform_indices = @transform_7, window_bounds = array<i64: 1, 8>}, {pipeline_mode = #tpu.pipeline_mode<synchronous>, transform_indices = @transform_8, window_bounds = array<i64: 9, 24, 64>}, {pipeline_mode = #tpu.pipeline_mode<synchronous>, transform_indices = @transform_9, window_bounds = array<i64: 9, 8, 16>}, {pipeline_mode = #tpu.pipeline_mode<synchronous>, transform_indices = @transform_10, window_bounds = array<i64: 1, 16>}, {pipeline_mode = #tpu.pipeline_mode<synchronous>, transform_indices = @transform_11, window_bounds = array<i64: 12, 2, 24>}, {pipeline_mode = #tpu.pipeline_mode<synchronous>, transform_indices = @transform_12, window_bounds = array<i64: 12, 16, 128>}, {pipeline_mode = #tpu.pipeline_mode<synchronous>, transform_indices = @transform_13, window_bounds = array<i64: 1, 128>}, {pipeline_mode = #tpu.pipeline_mode<synchronous>, transform_indices = @transform_14, window_bounds = array<i64: 128, 1>}, {pipeline_mode = #tpu.pipeline_mode<synchronous>, transform_indices = @transform_15, window_bounds = array<i64: 1, 1>}, {pipeline_mode = #tpu.pipeline_mode<synchronous>, transform_indices = @transform_16, window_bounds = array<i64: 128, 8>}, {pipeline_mode = #tpu.pipeline_mode<synchronous>, transform_indices = @transform_17, window_bounds = array<i64: 1, 8>}, {pipeline_mode = #tpu.pipeline_mode<synchronous>, transform_indices = @transform_18, window_bounds = array<i64: 2, 8>}]} {
    %c0 = arith.constant 0 : index
    %c0_0 = arith.constant 0 : index
    %c0_1 = arith.constant 0 : index
    %0 = vector.load %arg1[%c0, %c0_0, %c0_1] : memref<9x120x9xf32, #tpu.memory_space<vmem>>, vector<1x120x9xf32>
    %1 = vector.shape_cast %0 : vector<1x120x9xf32> to vector<120x9xf32>
    %c0_2 = arith.constant 0 : index
    %c0_3 = arith.constant 0 : index
    %2 = vector.load %arg2[%c0_2, %c0_3] : memref<9x8xf32, #tpu.memory_space<vmem>>, vector<9x8xf32>
    %cst = arith.constant dense<0.000000e+00> : vector<120x8xf32>
    %3 = tpu.matmul %1, %2, %cst {dimension_numbers = #tpu.dot_dimension_numbers<[1], [0], [0], [1], [0, 0, 1, 1], [], []>} : vector<120x9xf32>, vector<9x8xf32>, vector<120x8xf32> -> vector<120x8xf32>
    %c0_4 = arith.constant 0 : index
    %c0_5 = arith.constant 0 : index
    %4 = vector.load %arg3[%c0_4, %c0_5] : memref<1x8xf32, #tpu.memory_space<vmem>>, vector<1x8xf32>
    %5 = vector.broadcast %4 : vector<1x8xf32> to vector<120x8xf32>
    %6 = arith.addf %3, %5 : vector<120x8xf32>
    %cst_6 = arith.constant 0.000000e+00 : f32
    %7 = vector.broadcast %cst_6 : f32 to vector<120x8xf32>
    %8 = arith.maximumf %6, %7 : vector<120x8xf32>
    %c0_7 = arith.constant 0 : index
    %c0_8 = arith.constant 0 : index
    %c0_9 = arith.constant 0 : index
    %9 = vector.load %arg4[%c0_7, %c0_8, %c0_9] : memref<9x8x8xf32, #tpu.memory_space<vmem>>, vector<1x8x8xf32>
    %10 = vector.shape_cast %9 : vector<1x8x8xf32> to vector<8x8xf32>
    %cst_10 = arith.constant dense<0.000000e+00> : vector<120x8xf32>
    %11 = tpu.matmul %8, %10, %cst_10 {dimension_numbers = #tpu.dot_dimension_numbers<[1], [0], [0], [1], [0, 0, 1, 1], [], []>} : vector<120x8xf32>, vector<8x8xf32>, vector<120x8xf32> -> vector<120x8xf32>
    %c1 = arith.constant 1 : index
    %c0_11 = arith.constant 0 : index
    %c0_12 = arith.constant 0 : index
    %12 = vector.load %arg1[%c1, %c0_11, %c0_12] : memref<9x120x9xf32, #tpu.memory_space<vmem>>, vector<1x120x9xf32>
    %13 = vector.shape_cast %12 : vector<1x120x9xf32> to vector<120x9xf32>
    %c0_13 = arith.constant 0 : index
    %c0_14 = arith.constant 0 : index
    %14 = vector.load %arg2[%c0_13, %c0_14] : memref<9x8xf32, #tpu.memory_space<vmem>>, vector<9x8xf32>
    %cst_15 = arith.constant dense<0.000000e+00> : vector<120x8xf32>
    %15 = tpu.matmul %13, %14, %cst_15 {dimension_numbers = #tpu.dot_dimension_numbers<[1], [0], [0], [1], [0, 0, 1, 1], [], []>} : vector<120x9xf32>, vector<9x8xf32>, vector<120x8xf32> -> vector<120x8xf32>
    %c0_16 = arith.constant 0 : index
    %c0_17 = arith.constant 0 : index
    %16 = vector.load %arg3[%c0_16, %c0_17] : memref<1x8xf32, #tpu.memory_space<vmem>>, vector<1x8xf32>
    %17 = vector.broadcast %16 : vector<1x8xf32> to vector<120x8xf32>
    %18 = arith.addf %15, %17 : vector<120x8xf32>
    %cst_18 = arith.constant 0.000000e+00 : f32
    %19 = vector.broadcast %cst_18 : f32 to vector<120x8xf32>
    %20 = arith.maximumf %18, %19 : vector<120x8xf32>
    %c1_19 = arith.constant 1 : index
    %c0_20 = arith.constant 0 : index
    %c0_21 = arith.constant 0 : index
    %21 = vector.load %arg4[%c1_19, %c0_20, %c0_21] : memref<9x8x8xf32, #tpu.memory_space<vmem>>, vector<1x8x8xf32>
    %22 = vector.shape_cast %21 : vector<1x8x8xf32> to vector<8x8xf32>
    %cst_22 = arith.constant dense<0.000000e+00> : vector<120x8xf32>
    %23 = tpu.matmul %20, %22, %cst_22 {dimension_numbers = #tpu.dot_dimension_numbers<[1], [0], [0], [1], [0, 0, 1, 1], [], []>} : vector<120x8xf32>, vector<8x8xf32>, vector<120x8xf32> -> vector<120x8xf32>
    %24 = arith.addf %11, %23 : vector<120x8xf32>
    %c2 = arith.constant 2 : index
    %c0_23 = arith.constant 0 : index
    %c0_24 = arith.constant 0 : index
    %25 = vector.load %arg1[%c2, %c0_23, %c0_24] : memref<9x120x9xf32, #tpu.memory_space<vmem>>, vector<1x120x9xf32>
    %26 = vector.shape_cast %25 : vector<1x120x9xf32> to vector<120x9xf32>
    %c0_25 = arith.constant 0 : index
    %c0_26 = arith.constant 0 : index
    %27 = vector.load %arg2[%c0_25, %c0_26] : memref<9x8xf32, #tpu.memory_space<vmem>>, vector<9x8xf32>
    %cst_27 = arith.constant dense<0.000000e+00> : vector<120x8xf32>
    %28 = tpu.matmul %26, %27, %cst_27 {dimension_numbers = #tpu.dot_dimension_numbers<[1], [0], [0], [1], [0, 0, 1, 1], [], []>} : vector<120x9xf32>, vector<9x8xf32>, vector<120x8xf32> -> vector<120x8xf32>
    %c0_28 = arith.constant 0 : index
    %c0_29 = arith.constant 0 : index
    %29 = vector.load %arg3[%c0_28, %c0_29] : memref<1x8xf32, #tpu.memory_space<vmem>>, vector<1x8xf32>
    %30 = vector.broadcast %29 : vector<1x8xf32> to vector<120x8xf32>
    %31 = arith.addf %28, %30 : vector<120x8xf32>
    %cst_30 = arith.constant 0.000000e+00 : f32
    %32 = vector.broadcast %cst_30 : f32 to vector<120x8xf32>
    %33 = arith.maximumf %31, %32 : vector<120x8xf32>
    %c2_31 = arith.constant 2 : index
    %c0_32 = arith.constant 0 : index
    %c0_33 = arith.constant 0 : index
    %34 = vector.load %arg4[%c2_31, %c0_32, %c0_33] : memref<9x8x8xf32, #tpu.memory_space<vmem>>, vector<1x8x8xf32>
    %35 = vector.shape_cast %34 : vector<1x8x8xf32> to vector<8x8xf32>
    %cst_34 = arith.constant dense<0.000000e+00> : vector<120x8xf32>
    %36 = tpu.matmul %33, %35, %cst_34 {dimension_numbers = #tpu.dot_dimension_numbers<[1], [0], [0], [1], [0, 0, 1, 1], [], []>} : vector<120x8xf32>, vector<8x8xf32>, vector<120x8xf32> -> vector<120x8xf32>
    %37 = arith.addf %24, %36 : vector<120x8xf32>
    %c3 = arith.constant 3 : index
    %c0_35 = arith.constant 0 : index
    %c0_36 = arith.constant 0 : index
    %38 = vector.load %arg1[%c3, %c0_35, %c0_36] : memref<9x120x9xf32, #tpu.memory_space<vmem>>, vector<1x120x9xf32>
    %39 = vector.shape_cast %38 : vector<1x120x9xf32> to vector<120x9xf32>
    %c0_37 = arith.constant 0 : index
    %c0_38 = arith.constant 0 : index
    %40 = vector.load %arg2[%c0_37, %c0_38] : memref<9x8xf32, #tpu.memory_space<vmem>>, vector<9x8xf32>
    %cst_39 = arith.constant dense<0.000000e+00> : vector<120x8xf32>
    %41 = tpu.matmul %39, %40, %cst_39 {dimension_numbers = #tpu.dot_dimension_numbers<[1], [0], [0], [1], [0, 0, 1, 1], [], []>} : vector<120x9xf32>, vector<9x8xf32>, vector<120x8xf32> -> vector<120x8xf32>
    %c0_40 = arith.constant 0 : index
    %c0_41 = arith.constant 0 : index
    %42 = vector.load %arg3[%c0_40, %c0_41] : memref<1x8xf32, #tpu.memory_space<vmem>>, vector<1x8xf32>
    %43 = vector.broadcast %42 : vector<1x8xf32> to vector<120x8xf32>
    %44 = arith.addf %41, %43 : vector<120x8xf32>
    %cst_42 = arith.constant 0.000000e+00 : f32
    %45 = vector.broadcast %cst_42 : f32 to vector<120x8xf32>
    %46 = arith.maximumf %44, %45 : vector<120x8xf32>
    %c3_43 = arith.constant 3 : index
    %c0_44 = arith.constant 0 : index
    %c0_45 = arith.constant 0 : index
    %47 = vector.load %arg4[%c3_43, %c0_44, %c0_45] : memref<9x8x8xf32, #tpu.memory_space<vmem>>, vector<1x8x8xf32>
    %48 = vector.shape_cast %47 : vector<1x8x8xf32> to vector<8x8xf32>
    %cst_46 = arith.constant dense<0.000000e+00> : vector<120x8xf32>
    %49 = tpu.matmul %46, %48, %cst_46 {dimension_numbers = #tpu.dot_dimension_numbers<[1], [0], [0], [1], [0, 0, 1, 1], [], []>} : vector<120x8xf32>, vector<8x8xf32>, vector<120x8xf32> -> vector<120x8xf32>
    %50 = arith.addf %37, %49 : vector<120x8xf32>
    %c4 = arith.constant 4 : index
    %c0_47 = arith.constant 0 : index
    %c0_48 = arith.constant 0 : index
    %51 = vector.load %arg1[%c4, %c0_47, %c0_48] : memref<9x120x9xf32, #tpu.memory_space<vmem>>, vector<1x120x9xf32>
    %52 = vector.shape_cast %51 : vector<1x120x9xf32> to vector<120x9xf32>
    %c0_49 = arith.constant 0 : index
    %c0_50 = arith.constant 0 : index
    %53 = vector.load %arg2[%c0_49, %c0_50] : memref<9x8xf32, #tpu.memory_space<vmem>>, vector<9x8xf32>
    %cst_51 = arith.constant dense<0.000000e+00> : vector<120x8xf32>
    %54 = tpu.matmul %52, %53, %cst_51 {dimension_numbers = #tpu.dot_dimension_numbers<[1], [0], [0], [1], [0, 0, 1, 1], [], []>} : vector<120x9xf32>, vector<9x8xf32>, vector<120x8xf32> -> vector<120x8xf32>
    %c0_52 = arith.constant 0 : index
    %c0_53 = arith.constant 0 : index
    %55 = vector.load %arg3[%c0_52, %c0_53] : memref<1x8xf32, #tpu.memory_space<vmem>>, vector<1x8xf32>
    %56 = vector.broadcast %55 : vector<1x8xf32> to vector<120x8xf32>
    %57 = arith.addf %54, %56 : vector<120x8xf32>
    %cst_54 = arith.constant 0.000000e+00 : f32
    %58 = vector.broadcast %cst_54 : f32 to vector<120x8xf32>
    %59 = arith.maximumf %57, %58 : vector<120x8xf32>
    %c4_55 = arith.constant 4 : index
    %c0_56 = arith.constant 0 : index
    %c0_57 = arith.constant 0 : index
    %60 = vector.load %arg4[%c4_55, %c0_56, %c0_57] : memref<9x8x8xf32, #tpu.memory_space<vmem>>, vector<1x8x8xf32>
    %61 = vector.shape_cast %60 : vector<1x8x8xf32> to vector<8x8xf32>
    %cst_58 = arith.constant dense<0.000000e+00> : vector<120x8xf32>
    %62 = tpu.matmul %59, %61, %cst_58 {dimension_numbers = #tpu.dot_dimension_numbers<[1], [0], [0], [1], [0, 0, 1, 1], [], []>} : vector<120x8xf32>, vector<8x8xf32>, vector<120x8xf32> -> vector<120x8xf32>
    %63 = arith.addf %50, %62 : vector<120x8xf32>
    %c5 = arith.constant 5 : index
    %c0_59 = arith.constant 0 : index
    %c0_60 = arith.constant 0 : index
    %64 = vector.load %arg1[%c5, %c0_59, %c0_60] : memref<9x120x9xf32, #tpu.memory_space<vmem>>, vector<1x120x9xf32>
    %65 = vector.shape_cast %64 : vector<1x120x9xf32> to vector<120x9xf32>
    %c0_61 = arith.constant 0 : index
    %c0_62 = arith.constant 0 : index
    %66 = vector.load %arg2[%c0_61, %c0_62] : memref<9x8xf32, #tpu.memory_space<vmem>>, vector<9x8xf32>
    %cst_63 = arith.constant dense<0.000000e+00> : vector<120x8xf32>
    %67 = tpu.matmul %65, %66, %cst_63 {dimension_numbers = #tpu.dot_dimension_numbers<[1], [0], [0], [1], [0, 0, 1, 1], [], []>} : vector<120x9xf32>, vector<9x8xf32>, vector<120x8xf32> -> vector<120x8xf32>
    %c0_64 = arith.constant 0 : index
    %c0_65 = arith.constant 0 : index
    %68 = vector.load %arg3[%c0_64, %c0_65] : memref<1x8xf32, #tpu.memory_space<vmem>>, vector<1x8xf32>
    %69 = vector.broadcast %68 : vector<1x8xf32> to vector<120x8xf32>
    %70 = arith.addf %67, %69 : vector<120x8xf32>
    %cst_66 = arith.constant 0.000000e+00 : f32
    %71 = vector.broadcast %cst_66 : f32 to vector<120x8xf32>
    %72 = arith.maximumf %70, %71 : vector<120x8xf32>
    %c5_67 = arith.constant 5 : index
    %c0_68 = arith.constant 0 : index
    %c0_69 = arith.constant 0 : index
    %73 = vector.load %arg4[%c5_67, %c0_68, %c0_69] : memref<9x8x8xf32, #tpu.memory_space<vmem>>, vector<1x8x8xf32>
    %74 = vector.shape_cast %73 : vector<1x8x8xf32> to vector<8x8xf32>
    %cst_70 = arith.constant dense<0.000000e+00> : vector<120x8xf32>
    %75 = tpu.matmul %72, %74, %cst_70 {dimension_numbers = #tpu.dot_dimension_numbers<[1], [0], [0], [1], [0, 0, 1, 1], [], []>} : vector<120x8xf32>, vector<8x8xf32>, vector<120x8xf32> -> vector<120x8xf32>
    %76 = arith.addf %63, %75 : vector<120x8xf32>
    %c6 = arith.constant 6 : index
    %c0_71 = arith.constant 0 : index
    %c0_72 = arith.constant 0 : index
    %77 = vector.load %arg1[%c6, %c0_71, %c0_72] : memref<9x120x9xf32, #tpu.memory_space<vmem>>, vector<1x120x9xf32>
    %78 = vector.shape_cast %77 : vector<1x120x9xf32> to vector<120x9xf32>
    %c0_73 = arith.constant 0 : index
    %c0_74 = arith.constant 0 : index
    %79 = vector.load %arg2[%c0_73, %c0_74] : memref<9x8xf32, #tpu.memory_space<vmem>>, vector<9x8xf32>
    %cst_75 = arith.constant dense<0.000000e+00> : vector<120x8xf32>
    %80 = tpu.matmul %78, %79, %cst_75 {dimension_numbers = #tpu.dot_dimension_numbers<[1], [0], [0], [1], [0, 0, 1, 1], [], []>} : vector<120x9xf32>, vector<9x8xf32>, vector<120x8xf32> -> vector<120x8xf32>
    %c0_76 = arith.constant 0 : index
    %c0_77 = arith.constant 0 : index
    %81 = vector.load %arg3[%c0_76, %c0_77] : memref<1x8xf32, #tpu.memory_space<vmem>>, vector<1x8xf32>
    %82 = vector.broadcast %81 : vector<1x8xf32> to vector<120x8xf32>
    %83 = arith.addf %80, %82 : vector<120x8xf32>
    %cst_78 = arith.constant 0.000000e+00 : f32
    %84 = vector.broadcast %cst_78 : f32 to vector<120x8xf32>
    %85 = arith.maximumf %83, %84 : vector<120x8xf32>
    %c6_79 = arith.constant 6 : index
    %c0_80 = arith.constant 0 : index
    %c0_81 = arith.constant 0 : index
    %86 = vector.load %arg4[%c6_79, %c0_80, %c0_81] : memref<9x8x8xf32, #tpu.memory_space<vmem>>, vector<1x8x8xf32>
    %87 = vector.shape_cast %86 : vector<1x8x8xf32> to vector<8x8xf32>
    %cst_82 = arith.constant dense<0.000000e+00> : vector<120x8xf32>
    %88 = tpu.matmul %85, %87, %cst_82 {dimension_numbers = #tpu.dot_dimension_numbers<[1], [0], [0], [1], [0, 0, 1, 1], [], []>} : vector<120x8xf32>, vector<8x8xf32>, vector<120x8xf32> -> vector<120x8xf32>
    %89 = arith.addf %76, %88 : vector<120x8xf32>
    %c7 = arith.constant 7 : index
    %c0_83 = arith.constant 0 : index
    %c0_84 = arith.constant 0 : index
    %90 = vector.load %arg1[%c7, %c0_83, %c0_84] : memref<9x120x9xf32, #tpu.memory_space<vmem>>, vector<1x120x9xf32>
    %91 = vector.shape_cast %90 : vector<1x120x9xf32> to vector<120x9xf32>
    %c0_85 = arith.constant 0 : index
    %c0_86 = arith.constant 0 : index
    %92 = vector.load %arg2[%c0_85, %c0_86] : memref<9x8xf32, #tpu.memory_space<vmem>>, vector<9x8xf32>
    %cst_87 = arith.constant dense<0.000000e+00> : vector<120x8xf32>
    %93 = tpu.matmul %91, %92, %cst_87 {dimension_numbers = #tpu.dot_dimension_numbers<[1], [0], [0], [1], [0, 0, 1, 1], [], []>} : vector<120x9xf32>, vector<9x8xf32>, vector<120x8xf32> -> vector<120x8xf32>
    %c0_88 = arith.constant 0 : index
    %c0_89 = arith.constant 0 : index
    %94 = vector.load %arg3[%c0_88, %c0_89] : memref<1x8xf32, #tpu.memory_space<vmem>>, vector<1x8xf32>
    %95 = vector.broadcast %94 : vector<1x8xf32> to vector<120x8xf32>
    %96 = arith.addf %93, %95 : vector<120x8xf32>
    %cst_90 = arith.constant 0.000000e+00 : f32
    %97 = vector.broadcast %cst_90 : f32 to vector<120x8xf32>
    %98 = arith.maximumf %96, %97 : vector<120x8xf32>
    %c7_91 = arith.constant 7 : index
    %c0_92 = arith.constant 0 : index
    %c0_93 = arith.constant 0 : index
    %99 = vector.load %arg4[%c7_91, %c0_92, %c0_93] : memref<9x8x8xf32, #tpu.memory_space<vmem>>, vector<1x8x8xf32>
    %100 = vector.shape_cast %99 : vector<1x8x8xf32> to vector<8x8xf32>
    %cst_94 = arith.constant dense<0.000000e+00> : vector<120x8xf32>
    %101 = tpu.matmul %98, %100, %cst_94 {dimension_numbers = #tpu.dot_dimension_numbers<[1], [0], [0], [1], [0, 0, 1, 1], [], []>} : vector<120x8xf32>, vector<8x8xf32>, vector<120x8xf32> -> vector<120x8xf32>
    %102 = arith.addf %89, %101 : vector<120x8xf32>
    %c8 = arith.constant 8 : index
    %c0_95 = arith.constant 0 : index
    %c0_96 = arith.constant 0 : index
    %103 = vector.load %arg1[%c8, %c0_95, %c0_96] : memref<9x120x9xf32, #tpu.memory_space<vmem>>, vector<1x120x9xf32>
    %104 = vector.shape_cast %103 : vector<1x120x9xf32> to vector<120x9xf32>
    %c0_97 = arith.constant 0 : index
    %c0_98 = arith.constant 0 : index
    %105 = vector.load %arg2[%c0_97, %c0_98] : memref<9x8xf32, #tpu.memory_space<vmem>>, vector<9x8xf32>
    %cst_99 = arith.constant dense<0.000000e+00> : vector<120x8xf32>
    %106 = tpu.matmul %104, %105, %cst_99 {dimension_numbers = #tpu.dot_dimension_numbers<[1], [0], [0], [1], [0, 0, 1, 1], [], []>} : vector<120x9xf32>, vector<9x8xf32>, vector<120x8xf32> -> vector<120x8xf32>
    %c0_100 = arith.constant 0 : index
    %c0_101 = arith.constant 0 : index
    %107 = vector.load %arg3[%c0_100, %c0_101] : memref<1x8xf32, #tpu.memory_space<vmem>>, vector<1x8xf32>
    %108 = vector.broadcast %107 : vector<1x8xf32> to vector<120x8xf32>
    %109 = arith.addf %106, %108 : vector<120x8xf32>
    %cst_102 = arith.constant 0.000000e+00 : f32
    %110 = vector.broadcast %cst_102 : f32 to vector<120x8xf32>
    %111 = arith.maximumf %109, %110 : vector<120x8xf32>
    %c8_103 = arith.constant 8 : index
    %c0_104 = arith.constant 0 : index
    %c0_105 = arith.constant 0 : index
    %112 = vector.load %arg4[%c8_103, %c0_104, %c0_105] : memref<9x8x8xf32, #tpu.memory_space<vmem>>, vector<1x8x8xf32>
    %113 = vector.shape_cast %112 : vector<1x8x8xf32> to vector<8x8xf32>
    %cst_106 = arith.constant dense<0.000000e+00> : vector<120x8xf32>
    %114 = tpu.matmul %111, %113, %cst_106 {dimension_numbers = #tpu.dot_dimension_numbers<[1], [0], [0], [1], [0, 0, 1, 1], [], []>} : vector<120x8xf32>, vector<8x8xf32>, vector<120x8xf32> -> vector<120x8xf32>
    %115 = arith.addf %102, %114 : vector<120x8xf32>
    %c0_107 = arith.constant 0 : index
    %c0_108 = arith.constant 0 : index
    %116 = vector.load %arg5[%c0_107, %c0_108] : memref<1x8xf32, #tpu.memory_space<vmem>>, vector<1x8xf32>
    %117 = vector.broadcast %116 : vector<1x8xf32> to vector<120x8xf32>
    %118 = arith.addf %115, %117 : vector<120x8xf32>
    %cst_109 = arith.constant 0.000000e+00 : f32
    %119 = vector.broadcast %cst_109 : f32 to vector<120x8xf32>
    %120 = arith.maximumf %118, %119 : vector<120x8xf32>
    %c0_110 = arith.constant 0 : index
    %c0_111 = arith.constant 0 : index
    %c0_112 = arith.constant 0 : index
    %121 = vector.load %arg6[%c0_110, %c0_111, %c0_112] : memref<9x64x120xf32, #tpu.memory_space<vmem>>, vector<1x64x120xf32>
    %122 = vector.shape_cast %121 : vector<1x64x120xf32> to vector<64x120xf32>
    %cst_113 = arith.constant dense<0.000000e+00> : vector<64x8xf32>
    %123 = tpu.matmul %122, %120, %cst_113 {dimension_numbers = #tpu.dot_dimension_numbers<[1], [0], [0], [1], [0, 0, 1, 1], [], []>} : vector<64x120xf32>, vector<120x8xf32>, vector<64x8xf32> -> vector<64x8xf32>
    %c0_114 = arith.constant 0 : index
    %c0_115 = arith.constant 0 : index
    %c0_116 = arith.constant 0 : index
    %124 = vector.load %arg7[%c0_114, %c0_115, %c0_116] : memref<9x8x8xf32, #tpu.memory_space<vmem>>, vector<1x8x8xf32>
    %125 = vector.shape_cast %124 : vector<1x8x8xf32> to vector<8x8xf32>
    %cst_117 = arith.constant dense<0.000000e+00> : vector<64x8xf32>
    %126 = tpu.matmul %123, %125, %cst_117 {dimension_numbers = #tpu.dot_dimension_numbers<[1], [0], [0], [1], [0, 0, 1, 1], [], []>} : vector<64x8xf32>, vector<8x8xf32>, vector<64x8xf32> -> vector<64x8xf32>
    %c1_118 = arith.constant 1 : index
    %c0_119 = arith.constant 0 : index
    %c0_120 = arith.constant 0 : index
    %127 = vector.load %arg6[%c1_118, %c0_119, %c0_120] : memref<9x64x120xf32, #tpu.memory_space<vmem>>, vector<1x64x120xf32>
    %128 = vector.shape_cast %127 : vector<1x64x120xf32> to vector<64x120xf32>
    %cst_121 = arith.constant dense<0.000000e+00> : vector<64x8xf32>
    %129 = tpu.matmul %128, %120, %cst_121 {dimension_numbers = #tpu.dot_dimension_numbers<[1], [0], [0], [1], [0, 0, 1, 1], [], []>} : vector<64x120xf32>, vector<120x8xf32>, vector<64x8xf32> -> vector<64x8xf32>
    %c1_122 = arith.constant 1 : index
    %c0_123 = arith.constant 0 : index
    %c0_124 = arith.constant 0 : index
    %130 = vector.load %arg7[%c1_122, %c0_123, %c0_124] : memref<9x8x8xf32, #tpu.memory_space<vmem>>, vector<1x8x8xf32>
    %131 = vector.shape_cast %130 : vector<1x8x8xf32> to vector<8x8xf32>
    %cst_125 = arith.constant dense<0.000000e+00> : vector<64x8xf32>
    %132 = tpu.matmul %129, %131, %cst_125 {dimension_numbers = #tpu.dot_dimension_numbers<[1], [0], [0], [1], [0, 0, 1, 1], [], []>} : vector<64x8xf32>, vector<8x8xf32>, vector<64x8xf32> -> vector<64x8xf32>
    %133 = arith.addf %126, %132 : vector<64x8xf32>
    %c2_126 = arith.constant 2 : index
    %c0_127 = arith.constant 0 : index
    %c0_128 = arith.constant 0 : index
    %134 = vector.load %arg6[%c2_126, %c0_127, %c0_128] : memref<9x64x120xf32, #tpu.memory_space<vmem>>, vector<1x64x120xf32>
    %135 = vector.shape_cast %134 : vector<1x64x120xf32> to vector<64x120xf32>
    %cst_129 = arith.constant dense<0.000000e+00> : vector<64x8xf32>
    %136 = tpu.matmul %135, %120, %cst_129 {dimension_numbers = #tpu.dot_dimension_numbers<[1], [0], [0], [1], [0, 0, 1, 1], [], []>} : vector<64x120xf32>, vector<120x8xf32>, vector<64x8xf32> -> vector<64x8xf32>
    %c2_130 = arith.constant 2 : index
    %c0_131 = arith.constant 0 : index
    %c0_132 = arith.constant 0 : index
    %137 = vector.load %arg7[%c2_130, %c0_131, %c0_132] : memref<9x8x8xf32, #tpu.memory_space<vmem>>, vector<1x8x8xf32>
    %138 = vector.shape_cast %137 : vector<1x8x8xf32> to vector<8x8xf32>
    %cst_133 = arith.constant dense<0.000000e+00> : vector<64x8xf32>
    %139 = tpu.matmul %136, %138, %cst_133 {dimension_numbers = #tpu.dot_dimension_numbers<[1], [0], [0], [1], [0, 0, 1, 1], [], []>} : vector<64x8xf32>, vector<8x8xf32>, vector<64x8xf32> -> vector<64x8xf32>
    %140 = arith.addf %133, %139 : vector<64x8xf32>
    %c3_134 = arith.constant 3 : index
    %c0_135 = arith.constant 0 : index
    %c0_136 = arith.constant 0 : index
    %141 = vector.load %arg6[%c3_134, %c0_135, %c0_136] : memref<9x64x120xf32, #tpu.memory_space<vmem>>, vector<1x64x120xf32>
    %142 = vector.shape_cast %141 : vector<1x64x120xf32> to vector<64x120xf32>
    %cst_137 = arith.constant dense<0.000000e+00> : vector<64x8xf32>
    %143 = tpu.matmul %142, %120, %cst_137 {dimension_numbers = #tpu.dot_dimension_numbers<[1], [0], [0], [1], [0, 0, 1, 1], [], []>} : vector<64x120xf32>, vector<120x8xf32>, vector<64x8xf32> -> vector<64x8xf32>
    %c3_138 = arith.constant 3 : index
    %c0_139 = arith.constant 0 : index
    %c0_140 = arith.constant 0 : index
    %144 = vector.load %arg7[%c3_138, %c0_139, %c0_140] : memref<9x8x8xf32, #tpu.memory_space<vmem>>, vector<1x8x8xf32>
    %145 = vector.shape_cast %144 : vector<1x8x8xf32> to vector<8x8xf32>
    %cst_141 = arith.constant dense<0.000000e+00> : vector<64x8xf32>
    %146 = tpu.matmul %143, %145, %cst_141 {dimension_numbers = #tpu.dot_dimension_numbers<[1], [0], [0], [1], [0, 0, 1, 1], [], []>} : vector<64x8xf32>, vector<8x8xf32>, vector<64x8xf32> -> vector<64x8xf32>
    %147 = arith.addf %140, %146 : vector<64x8xf32>
    %c4_142 = arith.constant 4 : index
    %c0_143 = arith.constant 0 : index
    %c0_144 = arith.constant 0 : index
    %148 = vector.load %arg6[%c4_142, %c0_143, %c0_144] : memref<9x64x120xf32, #tpu.memory_space<vmem>>, vector<1x64x120xf32>
    %149 = vector.shape_cast %148 : vector<1x64x120xf32> to vector<64x120xf32>
    %cst_145 = arith.constant dense<0.000000e+00> : vector<64x8xf32>
    %150 = tpu.matmul %149, %120, %cst_145 {dimension_numbers = #tpu.dot_dimension_numbers<[1], [0], [0], [1], [0, 0, 1, 1], [], []>} : vector<64x120xf32>, vector<120x8xf32>, vector<64x8xf32> -> vector<64x8xf32>
    %c4_146 = arith.constant 4 : index
    %c0_147 = arith.constant 0 : index
    %c0_148 = arith.constant 0 : index
    %151 = vector.load %arg7[%c4_146, %c0_147, %c0_148] : memref<9x8x8xf32, #tpu.memory_space<vmem>>, vector<1x8x8xf32>
    %152 = vector.shape_cast %151 : vector<1x8x8xf32> to vector<8x8xf32>
    %cst_149 = arith.constant dense<0.000000e+00> : vector<64x8xf32>
    %153 = tpu.matmul %150, %152, %cst_149 {dimension_numbers = #tpu.dot_dimension_numbers<[1], [0], [0], [1], [0, 0, 1, 1], [], []>} : vector<64x8xf32>, vector<8x8xf32>, vector<64x8xf32> -> vector<64x8xf32>
    %154 = arith.addf %147, %153 : vector<64x8xf32>
    %c5_150 = arith.constant 5 : index
    %c0_151 = arith.constant 0 : index
    %c0_152 = arith.constant 0 : index
    %155 = vector.load %arg6[%c5_150, %c0_151, %c0_152] : memref<9x64x120xf32, #tpu.memory_space<vmem>>, vector<1x64x120xf32>
    %156 = vector.shape_cast %155 : vector<1x64x120xf32> to vector<64x120xf32>
    %cst_153 = arith.constant dense<0.000000e+00> : vector<64x8xf32>
    %157 = tpu.matmul %156, %120, %cst_153 {dimension_numbers = #tpu.dot_dimension_numbers<[1], [0], [0], [1], [0, 0, 1, 1], [], []>} : vector<64x120xf32>, vector<120x8xf32>, vector<64x8xf32> -> vector<64x8xf32>
    %c5_154 = arith.constant 5 : index
    %c0_155 = arith.constant 0 : index
    %c0_156 = arith.constant 0 : index
    %158 = vector.load %arg7[%c5_154, %c0_155, %c0_156] : memref<9x8x8xf32, #tpu.memory_space<vmem>>, vector<1x8x8xf32>
    %159 = vector.shape_cast %158 : vector<1x8x8xf32> to vector<8x8xf32>
    %cst_157 = arith.constant dense<0.000000e+00> : vector<64x8xf32>
    %160 = tpu.matmul %157, %159, %cst_157 {dimension_numbers = #tpu.dot_dimension_numbers<[1], [0], [0], [1], [0, 0, 1, 1], [], []>} : vector<64x8xf32>, vector<8x8xf32>, vector<64x8xf32> -> vector<64x8xf32>
    %161 = arith.addf %154, %160 : vector<64x8xf32>
    %c6_158 = arith.constant 6 : index
    %c0_159 = arith.constant 0 : index
    %c0_160 = arith.constant 0 : index
    %162 = vector.load %arg6[%c6_158, %c0_159, %c0_160] : memref<9x64x120xf32, #tpu.memory_space<vmem>>, vector<1x64x120xf32>
    %163 = vector.shape_cast %162 : vector<1x64x120xf32> to vector<64x120xf32>
    %cst_161 = arith.constant dense<0.000000e+00> : vector<64x8xf32>
    %164 = tpu.matmul %163, %120, %cst_161 {dimension_numbers = #tpu.dot_dimension_numbers<[1], [0], [0], [1], [0, 0, 1, 1], [], []>} : vector<64x120xf32>, vector<120x8xf32>, vector<64x8xf32> -> vector<64x8xf32>
    %c6_162 = arith.constant 6 : index
    %c0_163 = arith.constant 0 : index
    %c0_164 = arith.constant 0 : index
    %165 = vector.load %arg7[%c6_162, %c0_163, %c0_164] : memref<9x8x8xf32, #tpu.memory_space<vmem>>, vector<1x8x8xf32>
    %166 = vector.shape_cast %165 : vector<1x8x8xf32> to vector<8x8xf32>
    %cst_165 = arith.constant dense<0.000000e+00> : vector<64x8xf32>
    %167 = tpu.matmul %164, %166, %cst_165 {dimension_numbers = #tpu.dot_dimension_numbers<[1], [0], [0], [1], [0, 0, 1, 1], [], []>} : vector<64x8xf32>, vector<8x8xf32>, vector<64x8xf32> -> vector<64x8xf32>
    %168 = arith.addf %161, %167 : vector<64x8xf32>
    %c7_166 = arith.constant 7 : index
    %c0_167 = arith.constant 0 : index
    %c0_168 = arith.constant 0 : index
    %169 = vector.load %arg6[%c7_166, %c0_167, %c0_168] : memref<9x64x120xf32, #tpu.memory_space<vmem>>, vector<1x64x120xf32>
    %170 = vector.shape_cast %169 : vector<1x64x120xf32> to vector<64x120xf32>
    %cst_169 = arith.constant dense<0.000000e+00> : vector<64x8xf32>
    %171 = tpu.matmul %170, %120, %cst_169 {dimension_numbers = #tpu.dot_dimension_numbers<[1], [0], [0], [1], [0, 0, 1, 1], [], []>} : vector<64x120xf32>, vector<120x8xf32>, vector<64x8xf32> -> vector<64x8xf32>
    %c7_170 = arith.constant 7 : index
    %c0_171 = arith.constant 0 : index
    %c0_172 = arith.constant 0 : index
    %172 = vector.load %arg7[%c7_170, %c0_171, %c0_172] : memref<9x8x8xf32, #tpu.memory_space<vmem>>, vector<1x8x8xf32>
    %173 = vector.shape_cast %172 : vector<1x8x8xf32> to vector<8x8xf32>
    %cst_173 = arith.constant dense<0.000000e+00> : vector<64x8xf32>
    %174 = tpu.matmul %171, %173, %cst_173 {dimension_numbers = #tpu.dot_dimension_numbers<[1], [0], [0], [1], [0, 0, 1, 1], [], []>} : vector<64x8xf32>, vector<8x8xf32>, vector<64x8xf32> -> vector<64x8xf32>
    %175 = arith.addf %168, %174 : vector<64x8xf32>
    %c8_174 = arith.constant 8 : index
    %c0_175 = arith.constant 0 : index
    %c0_176 = arith.constant 0 : index
    %176 = vector.load %arg6[%c8_174, %c0_175, %c0_176] : memref<9x64x120xf32, #tpu.memory_space<vmem>>, vector<1x64x120xf32>
    %177 = vector.shape_cast %176 : vector<1x64x120xf32> to vector<64x120xf32>
    %cst_177 = arith.constant dense<0.000000e+00> : vector<64x8xf32>
    %178 = tpu.matmul %177, %120, %cst_177 {dimension_numbers = #tpu.dot_dimension_numbers<[1], [0], [0], [1], [0, 0, 1, 1], [], []>} : vector<64x120xf32>, vector<120x8xf32>, vector<64x8xf32> -> vector<64x8xf32>
    %c8_178 = arith.constant 8 : index
    %c0_179 = arith.constant 0 : index
    %c0_180 = arith.constant 0 : index
    %179 = vector.load %arg7[%c8_178, %c0_179, %c0_180] : memref<9x8x8xf32, #tpu.memory_space<vmem>>, vector<1x8x8xf32>
    %180 = vector.shape_cast %179 : vector<1x8x8xf32> to vector<8x8xf32>
    %cst_181 = arith.constant dense<0.000000e+00> : vector<64x8xf32>
    %181 = tpu.matmul %178, %180, %cst_181 {dimension_numbers = #tpu.dot_dimension_numbers<[1], [0], [0], [1], [0, 0, 1, 1], [], []>} : vector<64x8xf32>, vector<8x8xf32>, vector<64x8xf32> -> vector<64x8xf32>
    %182 = arith.addf %175, %181 : vector<64x8xf32>
    %c0_182 = arith.constant 0 : index
    %c0_183 = arith.constant 0 : index
    %183 = vector.load %arg8[%c0_182, %c0_183] : memref<1x8xf32, #tpu.memory_space<vmem>>, vector<1x8xf32>
    %184 = vector.broadcast %183 : vector<1x8xf32> to vector<64x8xf32>
    %185 = arith.addf %182, %184 : vector<64x8xf32>
    %cst_184 = arith.constant 0.000000e+00 : f32
    %186 = vector.broadcast %cst_184 : f32 to vector<64x8xf32>
    %187 = arith.maximumf %185, %186 : vector<64x8xf32>
    %c0_185 = arith.constant 0 : index
    %c0_186 = arith.constant 0 : index
    %c0_187 = arith.constant 0 : index
    %188 = vector.load %arg9[%c0_185, %c0_186, %c0_187] : memref<9x24x64xf32, #tpu.memory_space<vmem>>, vector<1x24x64xf32>
    %189 = vector.shape_cast %188 : vector<1x24x64xf32> to vector<24x64xf32>
    %cst_188 = arith.constant dense<0.000000e+00> : vector<24x8xf32>
    %190 = tpu.matmul %189, %187, %cst_188 {dimension_numbers = #tpu.dot_dimension_numbers<[1], [0], [0], [1], [0, 0, 1, 1], [], []>} : vector<24x64xf32>, vector<64x8xf32>, vector<24x8xf32> -> vector<24x8xf32>
    %c0_189 = arith.constant 0 : index
    %c0_190 = arith.constant 0 : index
    %c0_191 = arith.constant 0 : index
    %191 = vector.load %arg10[%c0_189, %c0_190, %c0_191] : memref<9x8x16xf32, #tpu.memory_space<vmem>>, vector<1x8x16xf32>
    %192 = vector.shape_cast %191 : vector<1x8x16xf32> to vector<8x16xf32>
    %cst_192 = arith.constant dense<0.000000e+00> : vector<24x16xf32>
    %193 = tpu.matmul %190, %192, %cst_192 {dimension_numbers = #tpu.dot_dimension_numbers<[1], [0], [0], [1], [0, 0, 1, 1], [], []>} : vector<24x8xf32>, vector<8x16xf32>, vector<24x16xf32> -> vector<24x16xf32>
    %c1_193 = arith.constant 1 : index
    %c0_194 = arith.constant 0 : index
    %c0_195 = arith.constant 0 : index
    %194 = vector.load %arg9[%c1_193, %c0_194, %c0_195] : memref<9x24x64xf32, #tpu.memory_space<vmem>>, vector<1x24x64xf32>
    %195 = vector.shape_cast %194 : vector<1x24x64xf32> to vector<24x64xf32>
    %cst_196 = arith.constant dense<0.000000e+00> : vector<24x8xf32>
    %196 = tpu.matmul %195, %187, %cst_196 {dimension_numbers = #tpu.dot_dimension_numbers<[1], [0], [0], [1], [0, 0, 1, 1], [], []>} : vector<24x64xf32>, vector<64x8xf32>, vector<24x8xf32> -> vector<24x8xf32>
    %c1_197 = arith.constant 1 : index
    %c0_198 = arith.constant 0 : index
    %c0_199 = arith.constant 0 : index
    %197 = vector.load %arg10[%c1_197, %c0_198, %c0_199] : memref<9x8x16xf32, #tpu.memory_space<vmem>>, vector<1x8x16xf32>
    %198 = vector.shape_cast %197 : vector<1x8x16xf32> to vector<8x16xf32>
    %cst_200 = arith.constant dense<0.000000e+00> : vector<24x16xf32>
    %199 = tpu.matmul %196, %198, %cst_200 {dimension_numbers = #tpu.dot_dimension_numbers<[1], [0], [0], [1], [0, 0, 1, 1], [], []>} : vector<24x8xf32>, vector<8x16xf32>, vector<24x16xf32> -> vector<24x16xf32>
    %200 = arith.addf %193, %199 : vector<24x16xf32>
    %c2_201 = arith.constant 2 : index
    %c0_202 = arith.constant 0 : index
    %c0_203 = arith.constant 0 : index
    %201 = vector.load %arg9[%c2_201, %c0_202, %c0_203] : memref<9x24x64xf32, #tpu.memory_space<vmem>>, vector<1x24x64xf32>
    %202 = vector.shape_cast %201 : vector<1x24x64xf32> to vector<24x64xf32>
    %cst_204 = arith.constant dense<0.000000e+00> : vector<24x8xf32>
    %203 = tpu.matmul %202, %187, %cst_204 {dimension_numbers = #tpu.dot_dimension_numbers<[1], [0], [0], [1], [0, 0, 1, 1], [], []>} : vector<24x64xf32>, vector<64x8xf32>, vector<24x8xf32> -> vector<24x8xf32>
    %c2_205 = arith.constant 2 : index
    %c0_206 = arith.constant 0 : index
    %c0_207 = arith.constant 0 : index
    %204 = vector.load %arg10[%c2_205, %c0_206, %c0_207] : memref<9x8x16xf32, #tpu.memory_space<vmem>>, vector<1x8x16xf32>
    %205 = vector.shape_cast %204 : vector<1x8x16xf32> to vector<8x16xf32>
    %cst_208 = arith.constant dense<0.000000e+00> : vector<24x16xf32>
    %206 = tpu.matmul %203, %205, %cst_208 {dimension_numbers = #tpu.dot_dimension_numbers<[1], [0], [0], [1], [0, 0, 1, 1], [], []>} : vector<24x8xf32>, vector<8x16xf32>, vector<24x16xf32> -> vector<24x16xf32>
    %207 = arith.addf %200, %206 : vector<24x16xf32>
    %c3_209 = arith.constant 3 : index
    %c0_210 = arith.constant 0 : index
    %c0_211 = arith.constant 0 : index
    %208 = vector.load %arg9[%c3_209, %c0_210, %c0_211] : memref<9x24x64xf32, #tpu.memory_space<vmem>>, vector<1x24x64xf32>
    %209 = vector.shape_cast %208 : vector<1x24x64xf32> to vector<24x64xf32>
    %cst_212 = arith.constant dense<0.000000e+00> : vector<24x8xf32>
    %210 = tpu.matmul %209, %187, %cst_212 {dimension_numbers = #tpu.dot_dimension_numbers<[1], [0], [0], [1], [0, 0, 1, 1], [], []>} : vector<24x64xf32>, vector<64x8xf32>, vector<24x8xf32> -> vector<24x8xf32>
    %c3_213 = arith.constant 3 : index
    %c0_214 = arith.constant 0 : index
    %c0_215 = arith.constant 0 : index
    %211 = vector.load %arg10[%c3_213, %c0_214, %c0_215] : memref<9x8x16xf32, #tpu.memory_space<vmem>>, vector<1x8x16xf32>
    %212 = vector.shape_cast %211 : vector<1x8x16xf32> to vector<8x16xf32>
    %cst_216 = arith.constant dense<0.000000e+00> : vector<24x16xf32>
    %213 = tpu.matmul %210, %212, %cst_216 {dimension_numbers = #tpu.dot_dimension_numbers<[1], [0], [0], [1], [0, 0, 1, 1], [], []>} : vector<24x8xf32>, vector<8x16xf32>, vector<24x16xf32> -> vector<24x16xf32>
    %214 = arith.addf %207, %213 : vector<24x16xf32>
    %c4_217 = arith.constant 4 : index
    %c0_218 = arith.constant 0 : index
    %c0_219 = arith.constant 0 : index
    %215 = vector.load %arg9[%c4_217, %c0_218, %c0_219] : memref<9x24x64xf32, #tpu.memory_space<vmem>>, vector<1x24x64xf32>
    %216 = vector.shape_cast %215 : vector<1x24x64xf32> to vector<24x64xf32>
    %cst_220 = arith.constant dense<0.000000e+00> : vector<24x8xf32>
    %217 = tpu.matmul %216, %187, %cst_220 {dimension_numbers = #tpu.dot_dimension_numbers<[1], [0], [0], [1], [0, 0, 1, 1], [], []>} : vector<24x64xf32>, vector<64x8xf32>, vector<24x8xf32> -> vector<24x8xf32>
    %c4_221 = arith.constant 4 : index
    %c0_222 = arith.constant 0 : index
    %c0_223 = arith.constant 0 : index
    %218 = vector.load %arg10[%c4_221, %c0_222, %c0_223] : memref<9x8x16xf32, #tpu.memory_space<vmem>>, vector<1x8x16xf32>
    %219 = vector.shape_cast %218 : vector<1x8x16xf32> to vector<8x16xf32>
    %cst_224 = arith.constant dense<0.000000e+00> : vector<24x16xf32>
    %220 = tpu.matmul %217, %219, %cst_224 {dimension_numbers = #tpu.dot_dimension_numbers<[1], [0], [0], [1], [0, 0, 1, 1], [], []>} : vector<24x8xf32>, vector<8x16xf32>, vector<24x16xf32> -> vector<24x16xf32>
    %221 = arith.addf %214, %220 : vector<24x16xf32>
    %c5_225 = arith.constant 5 : index
    %c0_226 = arith.constant 0 : index
    %c0_227 = arith.constant 0 : index
    %222 = vector.load %arg9[%c5_225, %c0_226, %c0_227] : memref<9x24x64xf32, #tpu.memory_space<vmem>>, vector<1x24x64xf32>
    %223 = vector.shape_cast %222 : vector<1x24x64xf32> to vector<24x64xf32>
    %cst_228 = arith.constant dense<0.000000e+00> : vector<24x8xf32>
    %224 = tpu.matmul %223, %187, %cst_228 {dimension_numbers = #tpu.dot_dimension_numbers<[1], [0], [0], [1], [0, 0, 1, 1], [], []>} : vector<24x64xf32>, vector<64x8xf32>, vector<24x8xf32> -> vector<24x8xf32>
    %c5_229 = arith.constant 5 : index
    %c0_230 = arith.constant 0 : index
    %c0_231 = arith.constant 0 : index
    %225 = vector.load %arg10[%c5_229, %c0_230, %c0_231] : memref<9x8x16xf32, #tpu.memory_space<vmem>>, vector<1x8x16xf32>
    %226 = vector.shape_cast %225 : vector<1x8x16xf32> to vector<8x16xf32>
    %cst_232 = arith.constant dense<0.000000e+00> : vector<24x16xf32>
    %227 = tpu.matmul %224, %226, %cst_232 {dimension_numbers = #tpu.dot_dimension_numbers<[1], [0], [0], [1], [0, 0, 1, 1], [], []>} : vector<24x8xf32>, vector<8x16xf32>, vector<24x16xf32> -> vector<24x16xf32>
    %228 = arith.addf %221, %227 : vector<24x16xf32>
    %c6_233 = arith.constant 6 : index
    %c0_234 = arith.constant 0 : index
    %c0_235 = arith.constant 0 : index
    %229 = vector.load %arg9[%c6_233, %c0_234, %c0_235] : memref<9x24x64xf32, #tpu.memory_space<vmem>>, vector<1x24x64xf32>
    %230 = vector.shape_cast %229 : vector<1x24x64xf32> to vector<24x64xf32>
    %cst_236 = arith.constant dense<0.000000e+00> : vector<24x8xf32>
    %231 = tpu.matmul %230, %187, %cst_236 {dimension_numbers = #tpu.dot_dimension_numbers<[1], [0], [0], [1], [0, 0, 1, 1], [], []>} : vector<24x64xf32>, vector<64x8xf32>, vector<24x8xf32> -> vector<24x8xf32>
    %c6_237 = arith.constant 6 : index
    %c0_238 = arith.constant 0 : index
    %c0_239 = arith.constant 0 : index
    %232 = vector.load %arg10[%c6_237, %c0_238, %c0_239] : memref<9x8x16xf32, #tpu.memory_space<vmem>>, vector<1x8x16xf32>
    %233 = vector.shape_cast %232 : vector<1x8x16xf32> to vector<8x16xf32>
    %cst_240 = arith.constant dense<0.000000e+00> : vector<24x16xf32>
    %234 = tpu.matmul %231, %233, %cst_240 {dimension_numbers = #tpu.dot_dimension_numbers<[1], [0], [0], [1], [0, 0, 1, 1], [], []>} : vector<24x8xf32>, vector<8x16xf32>, vector<24x16xf32> -> vector<24x16xf32>
    %235 = arith.addf %228, %234 : vector<24x16xf32>
    %c7_241 = arith.constant 7 : index
    %c0_242 = arith.constant 0 : index
    %c0_243 = arith.constant 0 : index
    %236 = vector.load %arg9[%c7_241, %c0_242, %c0_243] : memref<9x24x64xf32, #tpu.memory_space<vmem>>, vector<1x24x64xf32>
    %237 = vector.shape_cast %236 : vector<1x24x64xf32> to vector<24x64xf32>
    %cst_244 = arith.constant dense<0.000000e+00> : vector<24x8xf32>
    %238 = tpu.matmul %237, %187, %cst_244 {dimension_numbers = #tpu.dot_dimension_numbers<[1], [0], [0], [1], [0, 0, 1, 1], [], []>} : vector<24x64xf32>, vector<64x8xf32>, vector<24x8xf32> -> vector<24x8xf32>
    %c7_245 = arith.constant 7 : index
    %c0_246 = arith.constant 0 : index
    %c0_247 = arith.constant 0 : index
    %239 = vector.load %arg10[%c7_245, %c0_246, %c0_247] : memref<9x8x16xf32, #tpu.memory_space<vmem>>, vector<1x8x16xf32>
    %240 = vector.shape_cast %239 : vector<1x8x16xf32> to vector<8x16xf32>
    %cst_248 = arith.constant dense<0.000000e+00> : vector<24x16xf32>
    %241 = tpu.matmul %238, %240, %cst_248 {dimension_numbers = #tpu.dot_dimension_numbers<[1], [0], [0], [1], [0, 0, 1, 1], [], []>} : vector<24x8xf32>, vector<8x16xf32>, vector<24x16xf32> -> vector<24x16xf32>
    %242 = arith.addf %235, %241 : vector<24x16xf32>
    %c8_249 = arith.constant 8 : index
    %c0_250 = arith.constant 0 : index
    %c0_251 = arith.constant 0 : index
    %243 = vector.load %arg9[%c8_249, %c0_250, %c0_251] : memref<9x24x64xf32, #tpu.memory_space<vmem>>, vector<1x24x64xf32>
    %244 = vector.shape_cast %243 : vector<1x24x64xf32> to vector<24x64xf32>
    %cst_252 = arith.constant dense<0.000000e+00> : vector<24x8xf32>
    %245 = tpu.matmul %244, %187, %cst_252 {dimension_numbers = #tpu.dot_dimension_numbers<[1], [0], [0], [1], [0, 0, 1, 1], [], []>} : vector<24x64xf32>, vector<64x8xf32>, vector<24x8xf32> -> vector<24x8xf32>
    %c8_253 = arith.constant 8 : index
    %c0_254 = arith.constant 0 : index
    %c0_255 = arith.constant 0 : index
    %246 = vector.load %arg10[%c8_253, %c0_254, %c0_255] : memref<9x8x16xf32, #tpu.memory_space<vmem>>, vector<1x8x16xf32>
    %247 = vector.shape_cast %246 : vector<1x8x16xf32> to vector<8x16xf32>
    %cst_256 = arith.constant dense<0.000000e+00> : vector<24x16xf32>
    %248 = tpu.matmul %245, %247, %cst_256 {dimension_numbers = #tpu.dot_dimension_numbers<[1], [0], [0], [1], [0, 0, 1, 1], [], []>} : vector<24x8xf32>, vector<8x16xf32>, vector<24x16xf32> -> vector<24x16xf32>
    %249 = arith.addf %242, %248 : vector<24x16xf32>
    %c0_257 = arith.constant 0 : index
    %c0_258 = arith.constant 0 : index
    %250 = vector.load %arg11[%c0_257, %c0_258] : memref<1x16xf32, #tpu.memory_space<vmem>>, vector<1x16xf32>
    %251 = vector.broadcast %250 : vector<1x16xf32> to vector<24x16xf32>
    %252 = arith.addf %249, %251 : vector<24x16xf32>
    %cst_259 = arith.constant 0.000000e+00 : f32
    %253 = vector.broadcast %cst_259 : f32 to vector<24x16xf32>
    %254 = arith.maximumf %252, %253 : vector<24x16xf32>
    %c0_260 = arith.constant 0 : index
    %c0_261 = arith.constant 0 : index
    %c0_262 = arith.constant 0 : index
    %255 = vector.load %arg12[%c0_260, %c0_261, %c0_262] : memref<12x2x24xf32, #tpu.memory_space<vmem>>, vector<1x2x24xf32>
    %256 = vector.shape_cast %255 : vector<1x2x24xf32> to vector<2x24xf32>
    %cst_263 = arith.constant dense<0.000000e+00> : vector<2x16xf32>
    %257 = tpu.matmul %256, %254, %cst_263 {dimension_numbers = #tpu.dot_dimension_numbers<[1], [0], [0], [1], [0, 0, 1, 1], [], []>} : vector<2x24xf32>, vector<24x16xf32>, vector<2x16xf32> -> vector<2x16xf32>
    %c0_264 = arith.constant 0 : index
    %c0_265 = arith.constant 0 : index
    %c0_266 = arith.constant 0 : index
    %258 = vector.load %arg13[%c0_264, %c0_265, %c0_266] : memref<12x16x128xf32, #tpu.memory_space<vmem>>, vector<1x16x128xf32>
    %259 = vector.shape_cast %258 : vector<1x16x128xf32> to vector<16x128xf32>
    %cst_267 = arith.constant dense<0.000000e+00> : vector<2x128xf32>
    %260 = tpu.matmul %257, %259, %cst_267 {dimension_numbers = #tpu.dot_dimension_numbers<[1], [0], [0], [1], [0, 0, 1, 1], [], []>} : vector<2x16xf32>, vector<16x128xf32>, vector<2x128xf32> -> vector<2x128xf32>
    %c1_268 = arith.constant 1 : index
    %c0_269 = arith.constant 0 : index
    %c0_270 = arith.constant 0 : index
    %261 = vector.load %arg12[%c1_268, %c0_269, %c0_270] : memref<12x2x24xf32, #tpu.memory_space<vmem>>, vector<1x2x24xf32>
    %262 = vector.shape_cast %261 : vector<1x2x24xf32> to vector<2x24xf32>
    %cst_271 = arith.constant dense<0.000000e+00> : vector<2x16xf32>
    %263 = tpu.matmul %262, %254, %cst_271 {dimension_numbers = #tpu.dot_dimension_numbers<[1], [0], [0], [1], [0, 0, 1, 1], [], []>} : vector<2x24xf32>, vector<24x16xf32>, vector<2x16xf32> -> vector<2x16xf32>
    %c1_272 = arith.constant 1 : index
    %c0_273 = arith.constant 0 : index
    %c0_274 = arith.constant 0 : index
    %264 = vector.load %arg13[%c1_272, %c0_273, %c0_274] : memref<12x16x128xf32, #tpu.memory_space<vmem>>, vector<1x16x128xf32>
    %265 = vector.shape_cast %264 : vector<1x16x128xf32> to vector<16x128xf32>
    %cst_275 = arith.constant dense<0.000000e+00> : vector<2x128xf32>
    %266 = tpu.matmul %263, %265, %cst_275 {dimension_numbers = #tpu.dot_dimension_numbers<[1], [0], [0], [1], [0, 0, 1, 1], [], []>} : vector<2x16xf32>, vector<16x128xf32>, vector<2x128xf32> -> vector<2x128xf32>
    %267 = arith.addf %260, %266 : vector<2x128xf32>
    %c2_276 = arith.constant 2 : index
    %c0_277 = arith.constant 0 : index
    %c0_278 = arith.constant 0 : index
    %268 = vector.load %arg12[%c2_276, %c0_277, %c0_278] : memref<12x2x24xf32, #tpu.memory_space<vmem>>, vector<1x2x24xf32>
    %269 = vector.shape_cast %268 : vector<1x2x24xf32> to vector<2x24xf32>
    %cst_279 = arith.constant dense<0.000000e+00> : vector<2x16xf32>
    %270 = tpu.matmul %269, %254, %cst_279 {dimension_numbers = #tpu.dot_dimension_numbers<[1], [0], [0], [1], [0, 0, 1, 1], [], []>} : vector<2x24xf32>, vector<24x16xf32>, vector<2x16xf32> -> vector<2x16xf32>
    %c2_280 = arith.constant 2 : index
    %c0_281 = arith.constant 0 : index
    %c0_282 = arith.constant 0 : index
    %271 = vector.load %arg13[%c2_280, %c0_281, %c0_282] : memref<12x16x128xf32, #tpu.memory_space<vmem>>, vector<1x16x128xf32>
    %272 = vector.shape_cast %271 : vector<1x16x128xf32> to vector<16x128xf32>
    %cst_283 = arith.constant dense<0.000000e+00> : vector<2x128xf32>
    %273 = tpu.matmul %270, %272, %cst_283 {dimension_numbers = #tpu.dot_dimension_numbers<[1], [0], [0], [1], [0, 0, 1, 1], [], []>} : vector<2x16xf32>, vector<16x128xf32>, vector<2x128xf32> -> vector<2x128xf32>
    %274 = arith.addf %267, %273 : vector<2x128xf32>
    %c3_284 = arith.constant 3 : index
    %c0_285 = arith.constant 0 : index
    %c0_286 = arith.constant 0 : index
    %275 = vector.load %arg12[%c3_284, %c0_285, %c0_286] : memref<12x2x24xf32, #tpu.memory_space<vmem>>, vector<1x2x24xf32>
    %276 = vector.shape_cast %275 : vector<1x2x24xf32> to vector<2x24xf32>
    %cst_287 = arith.constant dense<0.000000e+00> : vector<2x16xf32>
    %277 = tpu.matmul %276, %254, %cst_287 {dimension_numbers = #tpu.dot_dimension_numbers<[1], [0], [0], [1], [0, 0, 1, 1], [], []>} : vector<2x24xf32>, vector<24x16xf32>, vector<2x16xf32> -> vector<2x16xf32>
    %c3_288 = arith.constant 3 : index
    %c0_289 = arith.constant 0 : index
    %c0_290 = arith.constant 0 : index
    %278 = vector.load %arg13[%c3_288, %c0_289, %c0_290] : memref<12x16x128xf32, #tpu.memory_space<vmem>>, vector<1x16x128xf32>
    %279 = vector.shape_cast %278 : vector<1x16x128xf32> to vector<16x128xf32>
    %cst_291 = arith.constant dense<0.000000e+00> : vector<2x128xf32>
    %280 = tpu.matmul %277, %279, %cst_291 {dimension_numbers = #tpu.dot_dimension_numbers<[1], [0], [0], [1], [0, 0, 1, 1], [], []>} : vector<2x16xf32>, vector<16x128xf32>, vector<2x128xf32> -> vector<2x128xf32>
    %281 = arith.addf %274, %280 : vector<2x128xf32>
    %c4_292 = arith.constant 4 : index
    %c0_293 = arith.constant 0 : index
    %c0_294 = arith.constant 0 : index
    %282 = vector.load %arg12[%c4_292, %c0_293, %c0_294] : memref<12x2x24xf32, #tpu.memory_space<vmem>>, vector<1x2x24xf32>
    %283 = vector.shape_cast %282 : vector<1x2x24xf32> to vector<2x24xf32>
    %cst_295 = arith.constant dense<0.000000e+00> : vector<2x16xf32>
    %284 = tpu.matmul %283, %254, %cst_295 {dimension_numbers = #tpu.dot_dimension_numbers<[1], [0], [0], [1], [0, 0, 1, 1], [], []>} : vector<2x24xf32>, vector<24x16xf32>, vector<2x16xf32> -> vector<2x16xf32>
    %c4_296 = arith.constant 4 : index
    %c0_297 = arith.constant 0 : index
    %c0_298 = arith.constant 0 : index
    %285 = vector.load %arg13[%c4_296, %c0_297, %c0_298] : memref<12x16x128xf32, #tpu.memory_space<vmem>>, vector<1x16x128xf32>
    %286 = vector.shape_cast %285 : vector<1x16x128xf32> to vector<16x128xf32>
    %cst_299 = arith.constant dense<0.000000e+00> : vector<2x128xf32>
    %287 = tpu.matmul %284, %286, %cst_299 {dimension_numbers = #tpu.dot_dimension_numbers<[1], [0], [0], [1], [0, 0, 1, 1], [], []>} : vector<2x16xf32>, vector<16x128xf32>, vector<2x128xf32> -> vector<2x128xf32>
    %288 = arith.addf %281, %287 : vector<2x128xf32>
    %c5_300 = arith.constant 5 : index
    %c0_301 = arith.constant 0 : index
    %c0_302 = arith.constant 0 : index
    %289 = vector.load %arg12[%c5_300, %c0_301, %c0_302] : memref<12x2x24xf32, #tpu.memory_space<vmem>>, vector<1x2x24xf32>
    %290 = vector.shape_cast %289 : vector<1x2x24xf32> to vector<2x24xf32>
    %cst_303 = arith.constant dense<0.000000e+00> : vector<2x16xf32>
    %291 = tpu.matmul %290, %254, %cst_303 {dimension_numbers = #tpu.dot_dimension_numbers<[1], [0], [0], [1], [0, 0, 1, 1], [], []>} : vector<2x24xf32>, vector<24x16xf32>, vector<2x16xf32> -> vector<2x16xf32>
    %c5_304 = arith.constant 5 : index
    %c0_305 = arith.constant 0 : index
    %c0_306 = arith.constant 0 : index
    %292 = vector.load %arg13[%c5_304, %c0_305, %c0_306] : memref<12x16x128xf32, #tpu.memory_space<vmem>>, vector<1x16x128xf32>
    %293 = vector.shape_cast %292 : vector<1x16x128xf32> to vector<16x128xf32>
    %cst_307 = arith.constant dense<0.000000e+00> : vector<2x128xf32>
    %294 = tpu.matmul %291, %293, %cst_307 {dimension_numbers = #tpu.dot_dimension_numbers<[1], [0], [0], [1], [0, 0, 1, 1], [], []>} : vector<2x16xf32>, vector<16x128xf32>, vector<2x128xf32> -> vector<2x128xf32>
    %295 = arith.addf %288, %294 : vector<2x128xf32>
    %c6_308 = arith.constant 6 : index
    %c0_309 = arith.constant 0 : index
    %c0_310 = arith.constant 0 : index
    %296 = vector.load %arg12[%c6_308, %c0_309, %c0_310] : memref<12x2x24xf32, #tpu.memory_space<vmem>>, vector<1x2x24xf32>
    %297 = vector.shape_cast %296 : vector<1x2x24xf32> to vector<2x24xf32>
    %cst_311 = arith.constant dense<0.000000e+00> : vector<2x16xf32>
    %298 = tpu.matmul %297, %254, %cst_311 {dimension_numbers = #tpu.dot_dimension_numbers<[1], [0], [0], [1], [0, 0, 1, 1], [], []>} : vector<2x24xf32>, vector<24x16xf32>, vector<2x16xf32> -> vector<2x16xf32>
    %c6_312 = arith.constant 6 : index
    %c0_313 = arith.constant 0 : index
    %c0_314 = arith.constant 0 : index
    %299 = vector.load %arg13[%c6_312, %c0_313, %c0_314] : memref<12x16x128xf32, #tpu.memory_space<vmem>>, vector<1x16x128xf32>
    %300 = vector.shape_cast %299 : vector<1x16x128xf32> to vector<16x128xf32>
    %cst_315 = arith.constant dense<0.000000e+00> : vector<2x128xf32>
    %301 = tpu.matmul %298, %300, %cst_315 {dimension_numbers = #tpu.dot_dimension_numbers<[1], [0], [0], [1], [0, 0, 1, 1], [], []>} : vector<2x16xf32>, vector<16x128xf32>, vector<2x128xf32> -> vector<2x128xf32>
    %302 = arith.addf %295, %301 : vector<2x128xf32>
    %c7_316 = arith.constant 7 : index
    %c0_317 = arith.constant 0 : index
    %c0_318 = arith.constant 0 : index
    %303 = vector.load %arg12[%c7_316, %c0_317, %c0_318] : memref<12x2x24xf32, #tpu.memory_space<vmem>>, vector<1x2x24xf32>
    %304 = vector.shape_cast %303 : vector<1x2x24xf32> to vector<2x24xf32>
    %cst_319 = arith.constant dense<0.000000e+00> : vector<2x16xf32>
    %305 = tpu.matmul %304, %254, %cst_319 {dimension_numbers = #tpu.dot_dimension_numbers<[1], [0], [0], [1], [0, 0, 1, 1], [], []>} : vector<2x24xf32>, vector<24x16xf32>, vector<2x16xf32> -> vector<2x16xf32>
    %c7_320 = arith.constant 7 : index
    %c0_321 = arith.constant 0 : index
    %c0_322 = arith.constant 0 : index
    %306 = vector.load %arg13[%c7_320, %c0_321, %c0_322] : memref<12x16x128xf32, #tpu.memory_space<vmem>>, vector<1x16x128xf32>
    %307 = vector.shape_cast %306 : vector<1x16x128xf32> to vector<16x128xf32>
    %cst_323 = arith.constant dense<0.000000e+00> : vector<2x128xf32>
    %308 = tpu.matmul %305, %307, %cst_323 {dimension_numbers = #tpu.dot_dimension_numbers<[1], [0], [0], [1], [0, 0, 1, 1], [], []>} : vector<2x16xf32>, vector<16x128xf32>, vector<2x128xf32> -> vector<2x128xf32>
    %309 = arith.addf %302, %308 : vector<2x128xf32>
    %c8_324 = arith.constant 8 : index
    %c0_325 = arith.constant 0 : index
    %c0_326 = arith.constant 0 : index
    %310 = vector.load %arg12[%c8_324, %c0_325, %c0_326] : memref<12x2x24xf32, #tpu.memory_space<vmem>>, vector<1x2x24xf32>
    %311 = vector.shape_cast %310 : vector<1x2x24xf32> to vector<2x24xf32>
    %cst_327 = arith.constant dense<0.000000e+00> : vector<2x16xf32>
    %312 = tpu.matmul %311, %254, %cst_327 {dimension_numbers = #tpu.dot_dimension_numbers<[1], [0], [0], [1], [0, 0, 1, 1], [], []>} : vector<2x24xf32>, vector<24x16xf32>, vector<2x16xf32> -> vector<2x16xf32>
    %c8_328 = arith.constant 8 : index
    %c0_329 = arith.constant 0 : index
    %c0_330 = arith.constant 0 : index
    %313 = vector.load %arg13[%c8_328, %c0_329, %c0_330] : memref<12x16x128xf32, #tpu.memory_space<vmem>>, vector<1x16x128xf32>
    %314 = vector.shape_cast %313 : vector<1x16x128xf32> to vector<16x128xf32>
    %cst_331 = arith.constant dense<0.000000e+00> : vector<2x128xf32>
    %315 = tpu.matmul %312, %314, %cst_331 {dimension_numbers = #tpu.dot_dimension_numbers<[1], [0], [0], [1], [0, 0, 1, 1], [], []>} : vector<2x16xf32>, vector<16x128xf32>, vector<2x128xf32> -> vector<2x128xf32>
    %316 = arith.addf %309, %315 : vector<2x128xf32>
    %c9 = arith.constant 9 : index
    %c0_332 = arith.constant 0 : index
    %c0_333 = arith.constant 0 : index
    %317 = vector.load %arg12[%c9, %c0_332, %c0_333] : memref<12x2x24xf32, #tpu.memory_space<vmem>>, vector<1x2x24xf32>
    %318 = vector.shape_cast %317 : vector<1x2x24xf32> to vector<2x24xf32>
    %cst_334 = arith.constant dense<0.000000e+00> : vector<2x16xf32>
    %319 = tpu.matmul %318, %254, %cst_334 {dimension_numbers = #tpu.dot_dimension_numbers<[1], [0], [0], [1], [0, 0, 1, 1], [], []>} : vector<2x24xf32>, vector<24x16xf32>, vector<2x16xf32> -> vector<2x16xf32>
    %c9_335 = arith.constant 9 : index
    %c0_336 = arith.constant 0 : index
    %c0_337 = arith.constant 0 : index
    %320 = vector.load %arg13[%c9_335, %c0_336, %c0_337] : memref<12x16x128xf32, #tpu.memory_space<vmem>>, vector<1x16x128xf32>
    %321 = vector.shape_cast %320 : vector<1x16x128xf32> to vector<16x128xf32>
    %cst_338 = arith.constant dense<0.000000e+00> : vector<2x128xf32>
    %322 = tpu.matmul %319, %321, %cst_338 {dimension_numbers = #tpu.dot_dimension_numbers<[1], [0], [0], [1], [0, 0, 1, 1], [], []>} : vector<2x16xf32>, vector<16x128xf32>, vector<2x128xf32> -> vector<2x128xf32>
    %323 = arith.addf %316, %322 : vector<2x128xf32>
    %c10 = arith.constant 10 : index
    %c0_339 = arith.constant 0 : index
    %c0_340 = arith.constant 0 : index
    %324 = vector.load %arg12[%c10, %c0_339, %c0_340] : memref<12x2x24xf32, #tpu.memory_space<vmem>>, vector<1x2x24xf32>
    %325 = vector.shape_cast %324 : vector<1x2x24xf32> to vector<2x24xf32>
    %cst_341 = arith.constant dense<0.000000e+00> : vector<2x16xf32>
    %326 = tpu.matmul %325, %254, %cst_341 {dimension_numbers = #tpu.dot_dimension_numbers<[1], [0], [0], [1], [0, 0, 1, 1], [], []>} : vector<2x24xf32>, vector<24x16xf32>, vector<2x16xf32> -> vector<2x16xf32>
    %c10_342 = arith.constant 10 : index
    %c0_343 = arith.constant 0 : index
    %c0_344 = arith.constant 0 : index
    %327 = vector.load %arg13[%c10_342, %c0_343, %c0_344] : memref<12x16x128xf32, #tpu.memory_space<vmem>>, vector<1x16x128xf32>
    %328 = vector.shape_cast %327 : vector<1x16x128xf32> to vector<16x128xf32>
    %cst_345 = arith.constant dense<0.000000e+00> : vector<2x128xf32>
    %329 = tpu.matmul %326, %328, %cst_345 {dimension_numbers = #tpu.dot_dimension_numbers<[1], [0], [0], [1], [0, 0, 1, 1], [], []>} : vector<2x16xf32>, vector<16x128xf32>, vector<2x128xf32> -> vector<2x128xf32>
    %330 = arith.addf %323, %329 : vector<2x128xf32>
    %c11 = arith.constant 11 : index
    %c0_346 = arith.constant 0 : index
    %c0_347 = arith.constant 0 : index
    %331 = vector.load %arg12[%c11, %c0_346, %c0_347] : memref<12x2x24xf32, #tpu.memory_space<vmem>>, vector<1x2x24xf32>
    %332 = vector.shape_cast %331 : vector<1x2x24xf32> to vector<2x24xf32>
    %cst_348 = arith.constant dense<0.000000e+00> : vector<2x16xf32>
    %333 = tpu.matmul %332, %254, %cst_348 {dimension_numbers = #tpu.dot_dimension_numbers<[1], [0], [0], [1], [0, 0, 1, 1], [], []>} : vector<2x24xf32>, vector<24x16xf32>, vector<2x16xf32> -> vector<2x16xf32>
    %c11_349 = arith.constant 11 : index
    %c0_350 = arith.constant 0 : index
    %c0_351 = arith.constant 0 : index
    %334 = vector.load %arg13[%c11_349, %c0_350, %c0_351] : memref<12x16x128xf32, #tpu.memory_space<vmem>>, vector<1x16x128xf32>
    %335 = vector.shape_cast %334 : vector<1x16x128xf32> to vector<16x128xf32>
    %cst_352 = arith.constant dense<0.000000e+00> : vector<2x128xf32>
    %336 = tpu.matmul %333, %335, %cst_352 {dimension_numbers = #tpu.dot_dimension_numbers<[1], [0], [0], [1], [0, 0, 1, 1], [], []>} : vector<2x16xf32>, vector<16x128xf32>, vector<2x128xf32> -> vector<2x128xf32>
    %337 = arith.addf %330, %336 : vector<2x128xf32>
    %c0_353 = arith.constant 0 : index
    %c0_354 = arith.constant 0 : index
    %338 = vector.load %arg14[%c0_353, %c0_354] : memref<1x128xf32, #tpu.memory_space<vmem>>, vector<1x128xf32>
    %339 = vector.broadcast %338 : vector<1x128xf32> to vector<2x128xf32>
    %340 = arith.addf %337, %339 : vector<2x128xf32>
    %cst_355 = arith.constant 0.000000e+00 : f32
    %341 = vector.broadcast %cst_355 : f32 to vector<2x128xf32>
    %342 = arith.maximumf %340, %341 : vector<2x128xf32>
    %c0_356 = arith.constant 0 : index
    %c0_357 = arith.constant 0 : index
    %343 = vector.load %arg15[%c0_356, %c0_357] : memref<128x1xf32, #tpu.memory_space<vmem>>, vector<128x1xf32>
    %cst_358 = arith.constant dense<0.000000e+00> : vector<2x1xf32>
    %344 = tpu.matmul %342, %343, %cst_358 {dimension_numbers = #tpu.dot_dimension_numbers<[1], [0], [0], [1], [0, 0, 1, 1], [], []>} : vector<2x128xf32>, vector<128x1xf32>, vector<2x1xf32> -> vector<2x1xf32>
    %c0_359 = arith.constant 0 : index
    %c0_360 = arith.constant 0 : index
    %345 = vector.load %arg16[%c0_359, %c0_360] : memref<1x1xf32, #tpu.memory_space<vmem>>, vector<1x1xf32>
    %346 = vector.broadcast %345 : vector<1x1xf32> to vector<2x1xf32>
    %347 = arith.addf %344, %346 : vector<2x1xf32>
    %c0_361 = arith.constant 0 : index
    %c0_362 = arith.constant 0 : index
    %348 = vector.load %arg17[%c0_361, %c0_362] : memref<128x8xf32, #tpu.memory_space<vmem>>, vector<128x8xf32>
    %cst_363 = arith.constant dense<0.000000e+00> : vector<2x8xf32>
    %349 = tpu.matmul %342, %348, %cst_363 {dimension_numbers = #tpu.dot_dimension_numbers<[1], [0], [0], [1], [0, 0, 1, 1], [], []>} : vector<2x128xf32>, vector<128x8xf32>, vector<2x8xf32> -> vector<2x8xf32>
    %c0_364 = arith.constant 0 : index
    %c0_365 = arith.constant 0 : index
    %350 = vector.load %arg18[%c0_364, %c0_365] : memref<1x8xf32, #tpu.memory_space<vmem>>, vector<1x8xf32>
    %351 = vector.broadcast %350 : vector<1x8xf32> to vector<2x8xf32>
    %352 = arith.addf %349, %351 : vector<2x8xf32>
    %cst_366 = arith.constant dense<0.000000e+00> : vector<2xf32>
    %353 = vector.multi_reduction <add>, %352, %cst_366 [1] : vector<2x8xf32> to vector<2xf32>
    %354 = vector.shape_cast %353 : vector<2xf32> to vector<2x1xf32>
    %cst_367 = arith.constant 8.000000e+00 : f32
    %355 = vector.broadcast %cst_367 : f32 to vector<2x1xf32>
    %356 = arith.divf %354, %355 : vector<2x1xf32>
    %357 = vector.broadcast %356 : vector<2x1xf32> to vector<2x8xf32>
    %358 = arith.subf %352, %357 : vector<2x8xf32>
    %359 = vector.broadcast %347 : vector<2x1xf32> to vector<2x8xf32>
    %360 = arith.addf %359, %358 : vector<2x8xf32>
    %c0_368 = arith.constant 0 : index
    %c0_369 = arith.constant 0 : index
    %361 = vector.load %arg19[%c0_368, %c0_369] : memref<2x8xf32, #tpu.memory_space<vmem>>, vector<2x8xf32>
    tpu.vector_store %arg19[%c0_368, %c0_369], %360 {strides = array<i32>} : memref<2x8xf32, #tpu.memory_space<vmem>>, vector<2x8xf32>,
    return
  }
  func.func @transform_0(%arg0: i32) -> (i32, i32, i32) {
    %c0_i32 = arith.constant 0 : i32
    %c0_i32_0 = arith.constant 0 : i32
    %c0_i32_1 = arith.constant 0 : i32
    %c0_i32_2 = arith.constant 0 : i32
    return %c0_i32, %c0_i32_0, %c0_i32_1 : i32, i32, i32
  }
  func.func @transform_1(%arg0: i32) -> (i32, i32) {
    %c0_i32 = arith.constant 0 : i32
    %c0_i32_0 = arith.constant 0 : i32
    %c0_i32_1 = arith.constant 0 : i32
    return %c0_i32, %c0_i32_0 : i32, i32
  }
  func.func @transform_2(%arg0: i32) -> (i32, i32) {
    %c0_i32 = arith.constant 0 : i32
    %c0_i32_0 = arith.constant 0 : i32
    %c0_i32_1 = arith.constant 0 : i32
    return %c0_i32, %c0_i32_0 : i32, i32
  }
  func.func @transform_3(%arg0: i32) -> (i32, i32, i32) {
    %c0_i32 = arith.constant 0 : i32
    %c0_i32_0 = arith.constant 0 : i32
    %c0_i32_1 = arith.constant 0 : i32
    %c0_i32_2 = arith.constant 0 : i32
    return %c0_i32, %c0_i32_0, %c0_i32_1 : i32, i32, i32
  }
  func.func @transform_4(%arg0: i32) -> (i32, i32) {
    %c0_i32 = arith.constant 0 : i32
    %c0_i32_0 = arith.constant 0 : i32
    %c0_i32_1 = arith.constant 0 : i32
    return %c0_i32, %c0_i32_0 : i32, i32
  }
  func.func @transform_5(%arg0: i32) -> (i32, i32, i32) {
    %c0_i32 = arith.constant 0 : i32
    %c0_i32_0 = arith.constant 0 : i32
    %c0_i32_1 = arith.constant 0 : i32
    %c0_i32_2 = arith.constant 0 : i32
    return %c0_i32, %c0_i32_0, %c0_i32_1 : i32, i32, i32
  }
  func.func @transform_6(%arg0: i32) -> (i32, i32, i32) {
    %c0_i32 = arith.constant 0 : i32
    %c0_i32_0 = arith.constant 0 : i32
    %c0_i32_1 = arith.constant 0 : i32
    %c0_i32_2 = arith.constant 0 : i32
    return %c0_i32, %c0_i32_0, %c0_i32_1 : i32, i32, i32
  }
  func.func @transform_7(%arg0: i32) -> (i32, i32) {
    %c0_i32 = arith.constant 0 : i32
    %c0_i32_0 = arith.constant 0 : i32
    %c0_i32_1 = arith.constant 0 : i32
    return %c0_i32, %c0_i32_0 : i32, i32
  }
  func.func @transform_8(%arg0: i32) -> (i32, i32, i32) {
    %c0_i32 = arith.constant 0 : i32
    %c0_i32_0 = arith.constant 0 : i32
    %c0_i32_1 = arith.constant 0 : i32
    %c0_i32_2 = arith.constant 0 : i32
    return %c0_i32, %c0_i32_0, %c0_i32_1 : i32, i32, i32
  }
  func.func @transform_9(%arg0: i32) -> (i32, i32, i32) {
    %c0_i32 = arith.constant 0 : i32
    %c0_i32_0 = arith.constant 0 : i32
    %c0_i32_1 = arith.constant 0 : i32
    %c0_i32_2 = arith.constant 0 : i32
    return %c0_i32, %c0_i32_0, %c0_i32_1 : i32, i32, i32
  }
  func.func @transform_10(%arg0: i32) -> (i32, i32) {
    %c0_i32 = arith.constant 0 : i32
    %c0_i32_0 = arith.constant 0 : i32
    %c0_i32_1 = arith.constant 0 : i32
    return %c0_i32, %c0_i32_0 : i32, i32
  }
  func.func @transform_11(%arg0: i32) -> (i32, i32, i32) {
    %c0_i32 = arith.constant 0 : i32
    %c0_i32_0 = arith.constant 0 : i32
    %c0_i32_1 = arith.constant 0 : i32
    %c0_i32_2 = arith.constant 0 : i32
    return %c0_i32, %c0_i32_0, %c0_i32_1 : i32, i32, i32
  }
  func.func @transform_12(%arg0: i32) -> (i32, i32, i32) {
    %c0_i32 = arith.constant 0 : i32
    %c0_i32_0 = arith.constant 0 : i32
    %c0_i32_1 = arith.constant 0 : i32
    %c0_i32_2 = arith.constant 0 : i32
    return %c0_i32, %c0_i32_0, %c0_i32_1 : i32, i32, i32
  }
  func.func @transform_13(%arg0: i32) -> (i32, i32) {
    %c0_i32 = arith.constant 0 : i32
    %c0_i32_0 = arith.constant 0 : i32
    %c0_i32_1 = arith.constant 0 : i32
    return %c0_i32, %c0_i32_0 : i32, i32
  }
  func.func @transform_14(%arg0: i32) -> (i32, i32) {
    %c0_i32 = arith.constant 0 : i32
    %c0_i32_0 = arith.constant 0 : i32
    %c0_i32_1 = arith.constant 0 : i32
    return %c0_i32, %c0_i32_0 : i32, i32
  }
  func.func @transform_15(%arg0: i32) -> (i32, i32) {
    %c0_i32 = arith.constant 0 : i32
    %c0_i32_0 = arith.constant 0 : i32
    %c0_i32_1 = arith.constant 0 : i32
    return %c0_i32, %c0_i32_0 : i32, i32
  }
  func.func @transform_16(%arg0: i32) -> (i32, i32) {
    %c0_i32 = arith.constant 0 : i32
    %c0_i32_0 = arith.constant 0 : i32
    %c0_i32_1 = arith.constant 0 : i32
    return %c0_i32, %c0_i32_0 : i32, i32
  }
  func.func @transform_17(%arg0: i32) -> (i32, i32) {
    %c0_i32 = arith.constant 0 : i32
    %c0_i32_0 = arith.constant 0 : i32
    %c0_i32_1 = arith.constant 0 : i32
    return %c0_i32, %c0_i32_0 : i32, i32
  }
  func.func @transform_18(%arg0: i32) -> (i32, i32) {
    %c0_i32 = arith.constant 0 : i32
    %c0_i32_0 = arith.constant 0 : i32
    %c0_i32_1 = arith.constant 0 : i32
    return %c0_i32, %c0_i32_0 : i32, i32
  }
}

</mosaic_0001>

<bundles_post_ra>
// kernel: duel_qnet_forward.1
= control target key start
LH: loop header
LB: loop body
LE: loop exit
PB: predicated region body
PF: predicated region fallthrough
CT: control target
= control target key end

     0   :  { %s8591_s0 = inlined_call_operand.vmem [shape: f32[9,120,9], index: 0, kind: input, shape index: {}]   ;;  %s8592_s1 = inlined_call_operand.vmem [shape: f32[9,8], index: 1, kind: input, shape index: {}]   ;;  %s8593_s2 = inlined_call_operand.vmem [shape: f32[1,8], index: 2, kind: input, shape index: {}]   ;;  %s8594_s3 = inlined_call_operand.vmem [shape: f32[9,8,8], index: 3, kind: input, shape index: {}]   ;;  %s8595_s4 = inlined_call_operand.vmem [shape: f32[1,8], index: 4, kind: input, shape index: {}]   ;;  %s8596_s5 = inlined_call_operand.vmem [shape: f32[9,64,120], index: 5, kind: input, shape index: {}]   ;;  %s8597_s6 = inlined_call_operand.vmem [shape: f32[9,8,8], index: 6, kind: input, shape index: {}]   ;;  %s8598_s7 = inlined_call_operand.vmem [shape: f32[1,8], index: 7, kind: input, shape index: {}]   ;;  %s8599_s8 = inlined_call_operand.vmem [shape: f32[9,24,64], index: 8, kind: input, shape index: {}]   ;;  %s8600_s9 = inlined_call_operand.vmem [shape: f32[9,8,16], index: 9, kind: input, shape index: {}]   ;;  %s8601_s10 = inlined_call_operand.vmem [shape: f32[1,16], index: 10, kind: input, shape index: {}]   ;;  %s8602_s11 = inlined_call_operand.vmem [shape: f32[12,2,24], index: 11, kind: input, shape index: {}]   ;;  %s8603_s12 = inlined_call_operand.vmem [shape: f32[12,16,128], index: 12, kind: input, shape index: {}]   ;;  %s8604_s13 = inlined_call_operand.vmem [shape: f32[1,128], index: 13, kind: input, shape index: {}]   ;;  %s8605_s14 = inlined_call_operand.vmem [shape: f32[128,1], index: 14, kind: input, shape index: {}]   ;;  %s8606_s15 = inlined_call_operand.<no memory space> [shape: f32[1,1], index: 15, kind: input, shape index: {}]   ;;  %s8607_s16 = inlined_call_operand.vmem [shape: f32[128,8], index: 16, kind: input, shape index: {}]   ;;  %s8608_s17 = inlined_call_operand.vmem [shape: f32[1,8], index: 17, kind: input, shape index: {}]   ;;  %s8609_s18 = inlined_call_operand.hbm [shape: f32[2,8], index: 18, kind: output, shape index: {}]  }
   0x1   :  { %8613 = sst [smem:[#allocation15_spill]] %s8591_s0  ;;  %v23_v0 = vstv %s8606_s15 }
   0x2   :  { %8614 = sst [smem:[#allocation16_spill]] %s8592_s1  ;;  %24 = vst [vmem:[#allocation2] sm:$0x1] %v23_v0 }
   0x3   :  { %8615 = sst [smem:[#allocation17_spill]] %s8593_s2 }
   0x4   :  { %s8616_s0 = sld [smem:[#allocation16_spill]]  ;;  %vm129_vm0 = vcmask 1040384   ;;  %vm83_vm1 = vcmask 72704  }
   0x5   :  { %s8617_s21 = sld [smem:[#allocation15_spill]] }
   0xa   :  { %v6155_v1 = vld [vmem:[%s8616_s0 + $0x8] sm:$0x1]  ;;  %v6160_v2 = vld [vmem:[%s8616_s0] sm:$0xff] }
   0xb   :  { %5236 = vmatpush.msk.msra.mxu0 %vm129_vm0, %v6155_v1  ;;  %5267 = vmatpush.msk.msra.mxu1 %vm129_vm0, %v6155_v1  ;;  %v62_v3 = vld [vmem:[%s8617_s21] sm:$0xff]  ;;  %v5252_v4 = vld [vmem:[%s8617_s21 + $0x78] sm:$0xff] }
   0xd   :  { %148 = vmatpush.msra.mxu0 %v6160_v2  ;;  %287 = vmatpush.msra.mxu1 %v6160_v2 }
   0xe   :  { %5237 = vmatmul.msk.f32.vlgmr.msra.gmra.mxu0 %vm83_vm1, %v62_v3  ;;  %5268 = vmatmul.msk.f32.vlgmr.msra.gmra.mxu1 %vm83_vm1, %v5252_v4 }
   0xf   :  { %5376 = vmatpush.msk.msrb.mxu0 %vm129_vm0, %v6155_v1 }
  0x10   :  { %25 = vsyncpa [#allocation4], 0  ;;  %v63_v5 = vld [vmem:[%s8617_s21 + $0x8] sm:$0xff]  ;;  %v5253_v6 = vld [vmem:[%s8617_s21 + $0x80] sm:$0xff]  ;;  %s8618_s25 = sld [smem:[#allocation17_spill]]  ;;  %vm351_vm2 = vcmask 64512  }
  0x11   :  { %904 = vmatpush.msrb.mxu0 %v6160_v2  ;;  %v64_v7 = vld [vmem:[%s8617_s21 + $0x10] sm:$0xff]  ;;  %v5254_v8 = vld [vmem:[%s8617_s21 + $0x88] sm:$0xff]  ;;  %v65_v9 = vld [vmem:[%s8617_s21 + $0x18] sm:$0xff]  ;;  %vm2442_vm3 = vcmask 982016   ;;  %vm3781_vm4 = vcmask 523264   ;;  %vm4493_vm5 = vcmask 195584  }
  0x12   :  { %v5255_v10 = vld [vmem:[%s8617_s21 + $0x90] sm:$0xff]  ;;  %v66_v11 = vld [vmem:[%s8617_s21 + $0x20] sm:$0xff]  ;;  %v5256_v12 = vld [vmem:[%s8617_s21 + $0x98] sm:$0xff]  ;;  %vm4547_vm6 = vcmask 130048   ;;  %vm5200_vm7 = vcmask 58368   ;;  %s5227_s2 = sshll.u32 %s8609_s18, 4  ;;  %s5228_s2 = int_to_ptr.hbm [resolvable:$true] %s5227_s2 }
  0x13   :  { %5470 = vmatpush.msk.msra.mxu0 %vm129_vm0, %v6155_v1  ;;  %v67_v13 = vld [vmem:[%s8617_s21 + $0x28] sm:$0xff]  ;;  %v5257_v14 = vld [vmem:[%s8617_s21 + $0xa0] sm:$0xff]  ;;  %v68_v15 = vld [vmem:[%s8617_s21 + $0x30] sm:$0xff] }
  0x14   :  { %v5258_v16 = vld [vmem:[%s8617_s21 + $0xa8] sm:$0xff]  ;;  %v69_v17 = vld [vmem:[%s8617_s21 + $0x38] sm:$0xff]  ;;  %v5259_v18 = vld [vmem:[%s8617_s21 + $0xb0] sm:$0xff] }
  0x15   :  { %1428 = vmatpush.msra.mxu0 %v6160_v2  ;;  %v70_v19 = vld [vmem:[%s8617_s21 + $0x40] sm:$0xff]  ;;  %v5260_v20 = vld [vmem:[%s8617_s21 + $0xb8] sm:$0xff]  ;;  %v71_v21 = vld [vmem:[%s8617_s21 + $0x48] sm:$0xff] }
  0x16   :  { %5238 = vmatmul.msk.f32.gmra.mxu0 %vm83_vm1, %v63_v5  ;;  %5269 = vmatmul.msk.f32.gmra.mxu1 %vm83_vm1, %v5253_v6  ;;  %v5261_v22 = vld [vmem:[%s8617_s21 + $0xc0] sm:$0xff]  ;;  %v72_v23 = vld [vmem:[%s8617_s21 + $0x50] sm:$0xff]  ;;  %v5262_v24 = vld [vmem:[%s8617_s21 + $0xc8] sm:$0xff] }
  0x17   :  { %v73_v25 = vld [vmem:[%s8617_s21 + $0x58] sm:$0xff]  ;;  %v5263_v26 = vld [vmem:[%s8617_s21 + $0xd0] sm:$0xff]  ;;  %v74_v27 = vld [vmem:[%s8617_s21 + $0x60] sm:$0xff] }
  0x18   :  { %v5264_v28 = vld [vmem:[%s8617_s21 + $0xd8] sm:$0xff]  ;;  %v5283_v29 = vld [vmem:[%s8594_s3 + $0x8] sm:$0xff]  ;;  %v210_v30 = vld [vmem:[%s8594_s3] sm:$0xff] }
  0x19   :  { %412 = vmatpush.msra.mxu2 %v5283_v29  ;;  %519 = vmatpush.msra.mxu3 %v210_v30  ;;  %v75_v31 = vld [vmem:[%s8617_s21 + $0x68] sm:$0xff]  ;;  %v5265_v32 = vld [vmem:[%s8617_s21 + $0xe0] sm:$0xff]  ;;  %v76_v33 = vld [vmem:[%s8617_s21 + $0x70] sm:$0xff] }
  0x1a   :  { %v5266_v34 = vld [vmem:[%s8617_s21 + $0xe8] sm:$0xff]  ;;  %v6306_v35 = vld [vmem:[%s8618_s25] ss:$0 sm:$0xff] }
  0x1b   :  { %5329 = vmatpush.msk.msrb.mxu2 %vm129_vm0, %v6155_v1 }
  0x1d   :  { %642 = vmatpush.msrb.mxu2 %v6160_v2 }
  0x1e   :  { %5239 = vmatmul.msk.f32.gmra.mxu0 %vm83_vm1, %v64_v7  ;;  %5270 = vmatmul.msk.f32.gmra.mxu1 %vm83_vm1, %v5254_v8 }
  0x26   :  { %5240 = vmatmul.msk.f32.gmra.mxu0 %vm83_vm1, %v65_v9  ;;  %5271 = vmatmul.msk.f32.gmra.mxu1 %vm83_vm1, %v5255_v10 }
  0x2e   :  { %5241 = vmatmul.msk.f32.gmra.mxu0 %vm83_vm1, %v66_v11  ;;  %5272 = vmatmul.msk.f32.gmra.mxu1 %vm83_vm1, %v5256_v12 }
  0x36   :  { %5242 = vmatmul.msk.f32.gmra.mxu0 %vm83_vm1, %v67_v13  ;;  %5273 = vmatmul.msk.f32.gmra.mxu1 %vm83_vm1, %v5257_v14 }
  0x3e   :  { %5243 = vmatmul.msk.f32.gmra.mxu0 %vm83_vm1, %v68_v15  ;;  %5274 = vmatmul.msk.f32.gmra.mxu1 %vm83_vm1, %v5258_v16 }
  0x46   :  { %5244 = vmatmul.msk.f32.gmra.mxu0 %vm83_vm1, %v69_v17  ;;  %5275 = vmatmul.msk.f32.gmra.mxu1 %vm83_vm1, %v5259_v18 }
  0x4e   :  { %5245 = vmatmul.msk.f32.gmra.mxu0 %vm83_vm1, %v70_v19  ;;  %5276 = vmatmul.msk.f32.gmra.mxu1 %vm83_vm1, %v5260_v20 }
  0x56   :  { %5246 = vmatmul.msk.f32.gmra.mxu0 %vm83_vm1, %v71_v21  ;;  %5277 = vmatmul.msk.f32.gmra.mxu1 %vm83_vm1, %v5261_v22 }
  0x5e   :  { %5247 = vmatmul.msk.f32.gmra.mxu0 %vm83_vm1, %v72_v23  ;;  %5278 = vmatmul.msk.f32.gmra.mxu1 %vm83_vm1, %v5262_v24 }
  0x66   :  { %5248 = vmatmul.msk.f32.gmra.mxu0 %vm83_vm1, %v73_v25  ;;  %5279 = vmatmul.msk.f32.gmra.mxu1 %vm83_vm1, %v5263_v26 }
  0x6e   :  { %5249 = vmatmul.msk.f32.gmra.mxu0 %vm83_vm1, %v74_v27  ;;  %5280 = vmatmul.msk.f32.gmra.mxu1 %vm83_vm1, %v5264_v28 }
  0x76   :  { %5250 = vmatmul.msk.f32.gmra.mxu0 %vm83_vm1, %v75_v31  ;;  %5281 = vmatmul.msk.f32.gmra.mxu1 %vm83_vm1, %v5265_v32 }
  0x7e   :  { %5251 = vmatmul.msk.f32.gmra.mxu0 %vm83_vm1, %v76_v33  ;;  %5282 = vmatmul.msk.f32.gmra.mxu1 %vm83_vm1, %v5266_v34 }
  0x8b   :  { %v150_v36 = vpop.f32.mrf.mxu0  ;;  %v289_v37 = vpop.f32.mrf.mxu1 }
  0x8c   :  { %v151_v38 = vadd.f32 %v6306_v35, %v150_v36  ;;  %v290_v39 = vadd.f32 %v6306_v35, %v289_v37 }
  0x8e   :  { %v195_v40 = vmax.f32 %v151_v38, 0.0  ;;  %v334_v41 = vmax.f32 %v290_v39, 0.0 }
  0x90   :  { %5284 = vmatmul.msk.f32.vlgmr.msra.gmra.mxu2 %vm351_vm2, %v334_v41  ;;  %5299 = vmatmul.msk.f32.vlgmr.msra.gmra.mxu3 %vm351_vm2, %v195_v40 }
  0x91   :  { %5423 = vmatpush.msk.msra.mxu2 %vm129_vm0, %v6155_v1 }
  0x93   :  { %v153_v42 = vpop.f32.mrf.mxu0  ;;  %v292_v43 = vpop.f32.mrf.mxu1  ;;  %1166 = vmatpush.msra.mxu2 %v6160_v2 }
  0x94   :  { %v154_v44 = vadd.f32 %v6306_v35, %v153_v42  ;;  %v293_v45 = vadd.f32 %v6306_v35, %v292_v43 }
  0x96   :  { %v196_v46 = vmax.f32 %v154_v44, 0.0  ;;  %v335_v47 = vmax.f32 %v293_v45, 0.0 }
  0x98   :  { %5285 = vmatmul.msk.f32.gmra.mxu2 %vm351_vm2, %v335_v47  ;;  %5300 = vmatmul.msk.f32.gmra.mxu3 %vm351_vm2, %v196_v46 }
  0x9b   :  { %v156_v48 = vpop.f32.mrf.mxu0  ;;  %v295_v49 = vpop.f32.mrf.mxu1 }
  0x9c   :  { %v157_v50 = vadd.f32 %v6306_v35, %v156_v48  ;;  %v296_v51 = vadd.f32 %v6306_v35, %v295_v49 }
  0x9e   :  { %v197_v52 = vmax.f32 %v157_v50, 0.0  ;;  %v336_v53 = vmax.f32 %v296_v51, 0.0 }
  0xa0   :  { %5286 = vmatmul.msk.f32.gmra.mxu2 %vm351_vm2, %v336_v53  ;;  %5301 = vmatmul.msk.f32.gmra.mxu3 %vm351_vm2, %v197_v52 }
  0xa3   :  { %v159_v54 = vpop.f32.mrf.mxu0  ;;  %v298_v55 = vpop.f32.mrf.mxu1 }
  0xa4   :  { %v160_v56 = vadd.f32 %v6306_v35, %v159_v54  ;;  %v299_v57 = vadd.f32 %v6306_v35, %v298_v55 }
  0xa6   :  { %v198_v58 = vmax.f32 %v160_v56, 0.0  ;;  %v337_v59 = vmax.f32 %v299_v57, 0.0  ;;  %v5361_v57 = vld [vmem:[%s8617_s21 + $0x168] sm:$0xff] }
  0xa7   :  { %5377 = vmatmul.msk.f32.vlgmr.msrb.gmra.mxu0 %vm83_vm1, %v5361_v57 }
  0xa8   :  { %5287 = vmatmul.msk.f32.gmra.mxu2 %vm351_vm2, %v337_v59  ;;  %5302 = vmatmul.msk.f32.gmra.mxu3 %vm351_vm2, %v198_v58 }
  0xa9   :  { %5564 = vmatpush.msk.msrb.mxu0 %vm129_vm0, %v6155_v1 }
  0xab   :  { %v162_v60 = vpop.f32.mrf.mxu0  ;;  %v301_v61 = vpop.f32.mrf.mxu1  ;;  %1952 = vmatpush.msrb.mxu0 %v6160_v2 }
  0xac   :  { %v163_v62 = vadd.f32 %v6306_v35, %v162_v60  ;;  %v302_v63 = vadd.f32 %v6306_v35, %v301_v61 }
  0xae   :  { %v199_v0 = vmax.f32 %v163_v62, 0.0  ;;  %v338_v3 = vmax.f32 %v302_v63, 0.0 }
  0xb0   :  { %5288 = vmatmul.msk.f32.gmra.mxu2 %vm351_vm2, %v338_v3  ;;  %5303 = vmatmul.msk.f32.gmra.mxu3 %vm351_vm2, %v199_v0  ;;  %v5362_v0 = vld [vmem:[%s8617_s21 + $0x170] sm:$0xff] }
  0xb1   :  { %5378 = vmatmul.msk.f32.gmra.mxu0 %vm83_vm1, %v5362_v0 }
  0xb3   :  { %v165_v4 = vpop.f32.mrf.mxu0  ;;  %v304_v5 = vpop.f32.mrf.mxu1 }
  0xb4   :  { %v166_v6 = vadd.f32 %v6306_v35, %v165_v4  ;;  %v305_v7 = vadd.f32 %v6306_v35, %v304_v5  ;;  %v5363_v5 = vld [vmem:[%s8617_s21 + $0x178] sm:$0xff] }
  0xb6   :  { %v200_v8 = vmax.f32 %v166_v6, 0.0  ;;  %v339_v9 = vmax.f32 %v305_v7, 0.0  ;;  %v5314_v6 = vld [vmem:[%s8617_s21 + $0xf0] sm:$0xff]  ;;  %v5364_v7 = vld [vmem:[%s8617_s21 + $0x180] sm:$0xff] }
  0xb8   :  { %5289 = vmatmul.msk.f32.gmra.mxu2 %vm351_vm2, %v339_v9  ;;  %5304 = vmatmul.msk.f32.gmra.mxu3 %vm351_vm2, %v200_v8  ;;  %v5315_v8 = vld [vmem:[%s8617_s21 + $0xf8] sm:$0xff] }
  0xb9   :  { %5379 = vmatmul.msk.f32.gmra.mxu0 %vm83_vm1, %v5363_v5 }
  0xbb   :  { %v168_v10 = vpop.f32.mrf.mxu0  ;;  %v307_v11 = vpop.f32.mrf.mxu1 }
  0xbc   :  { %v169_v12 = vadd.f32 %v6306_v35, %v168_v10  ;;  %v308_v13 = vadd.f32 %v6306_v35, %v307_v11  ;;  %v5365_v10 = vld [vmem:[%s8617_s21 + $0x188] sm:$0xff]  ;;  %v5316_v11 = vld [vmem:[%s8617_s21 + $0x100] sm:$0xff] }
  0xbe   :  { %v201_v14 = vmax.f32 %v169_v12, 0.0  ;;  %v340_v15 = vmax.f32 %v308_v13, 0.0  ;;  %v5366_v13 = vld [vmem:[%s8617_s21 + $0x190] sm:$0xff] }
  0xc0   :  { %5290 = vmatmul.msk.f32.gmra.mxu2 %vm351_vm2, %v340_v15  ;;  %5305 = vmatmul.msk.f32.gmra.mxu3 %vm351_vm2, %v201_v14  ;;  %v5317_v14 = vld [vmem:[%s8617_s21 + $0x108] sm:$0xff] }
  0xc1   :  { %5380 = vmatmul.msk.f32.gmra.mxu0 %vm83_vm1, %v5364_v7  ;;  %v5410_v7 = vld [vmem:[%s8617_s21 + $0x1f0] sm:$0xff] }
  0xc3   :  { %v171_v16 = vpop.f32.mrf.mxu0  ;;  %v310_v17 = vpop.f32.mrf.mxu1 }
  0xc4   :  { %v172_v18 = vadd.f32 %v6306_v35, %v171_v16  ;;  %v311_v19 = vadd.f32 %v6306_v35, %v310_v17  ;;  %v5367_v16 = vld [vmem:[%s8617_s21 + $0x198] sm:$0xff]  ;;  %v5318_v17 = vld [vmem:[%s8617_s21 + $0x110] sm:$0xff] }
  0xc6   :  { %v202_v20 = vmax.f32 %v172_v18, 0.0  ;;  %v341_v21 = vmax.f32 %v311_v19, 0.0  ;;  %v5368_v19 = vld [vmem:[%s8617_s21 + $0x1a0] sm:$0xff] }
  0xc8   :  { %5291 = vmatmul.msk.f32.gmra.mxu2 %vm351_vm2, %v341_v21  ;;  %5306 = vmatmul.msk.f32.gmra.mxu3 %vm351_vm2, %v202_v20  ;;  %v5319_v20 = vld [vmem:[%s8617_s21 + $0x118] sm:$0xff] }
  0xc9   :  { %5381 = vmatmul.msk.f32.gmra.mxu0 %vm83_vm1, %v5365_v10  ;;  %v5459_v10 = vld [vmem:[%s8617_s21 + $0x278] sm:$0xff] }
  0xcb   :  { %v174_v22 = vpop.f32.mrf.mxu0  ;;  %v313_v23 = vpop.f32.mrf.mxu1 }
  0xcc   :  { %v175_v24 = vadd.f32 %v6306_v35, %v174_v22  ;;  %v314_v25 = vadd.f32 %v6306_v35, %v313_v23  ;;  %v5369_v22 = vld [vmem:[%s8617_s21 + $0x1a8] sm:$0xff]  ;;  %v5320_v23 = vld [vmem:[%s8617_s21 + $0x120] sm:$0xff] }
  0xce   :  { %v203_v26 = vmax.f32 %v175_v24, 0.0  ;;  %v342_v27 = vmax.f32 %v314_v25, 0.0  ;;  %v5370_v25 = vld [vmem:[%s8617_s21 + $0x1b0] sm:$0xff] }
  0xd0   :  { %5292 = vmatmul.msk.f32.gmra.mxu2 %vm351_vm2, %v342_v27  ;;  %5307 = vmatmul.msk.f32.gmra.mxu3 %vm351_vm2, %v203_v26  ;;  %v5321_v26 = vld [vmem:[%s8617_s21 + $0x128] sm:$0xff] }
  0xd1   :  { %5382 = vmatmul.msk.f32.gmra.mxu0 %vm83_vm1, %v5366_v13 }
  0xd3   :  { %v177_v28 = vpop.f32.mrf.mxu0  ;;  %v316_v29 = vpop.f32.mrf.mxu1 }
  0xd4   :  { %v178_v30 = vadd.f32 %v6306_v35, %v177_v28  ;;  %v317_v31 = vadd.f32 %v6306_v35, %v316_v29  ;;  %v5371_v28 = vld [vmem:[%s8617_s21 + $0x1b8] sm:$0xff]  ;;  %v5322_v29 = vld [vmem:[%s8617_s21 + $0x130] sm:$0xff] }
  0xd6   :  { %v204_v32 = vmax.f32 %v178_v30, 0.0  ;;  %v343_v33 = vmax.f32 %v317_v31, 0.0  ;;  %v5372_v31 = vld [vmem:[%s8617_s21 + $0x1c0] sm:$0xff] }
  0xd8   :  { %5293 = vmatmul.msk.f32.gmra.mxu2 %vm351_vm2, %v343_v33  ;;  %5308 = vmatmul.msk.f32.gmra.mxu3 %vm351_vm2, %v204_v32  ;;  %v5323_v32 = vld [vmem:[%s8617_s21 + $0x138] sm:$0xff] }
  0xd9   :  { %5383 = vmatmul.msk.f32.gmra.mxu0 %vm83_vm1, %v5367_v16 }
  0xdb   :  { %v180_v34 = vpop.f32.mrf.mxu0  ;;  %v319_v36 = vpop.f32.mrf.mxu1 }
  0xdc   :  { %v181_v37 = vadd.f32 %v6306_v35, %v180_v34  ;;  %v320_v38 = vadd.f32 %v6306_v35, %v319_v36  ;;  %v5345_v34 = vld [vmem:[%s8594_s3 + $0x10] sm:$0xff]  ;;  %v5373_v36 = vld [vmem:[%s8617_s21 + $0x1c8] sm:$0xff] }
  0xdd   :  { %766 = vmatpush.msrb.mxu3 %v5345_v34  ;;  %v5412_v34 = vld [vmem:[%s8617_s21 + $0x200] sm:$0xff] }
  0xde   :  { %v205_v39 = vmax.f32 %v181_v37, 0.0  ;;  %v344_v40 = vmax.f32 %v320_v38, 0.0  ;;  %v5324_v37 = vld [vmem:[%s8617_s21 + $0x140] sm:$0xff] }
  0xe0   :  { %5294 = vmatmul.msk.f32.gmra.mxu2 %vm351_vm2, %v344_v40  ;;  %5309 = vmatmul.msk.f32.gmra.mxu3 %vm351_vm2, %v205_v39  ;;  %v5374_v39 = vld [vmem:[%s8617_s21 + $0x1d0] sm:$0xff]  ;;  %v5325_v40 = vld [vmem:[%s8617_s21 + $0x148] sm:$0xff] }
  0xe1   :  { %5384 = vmatmul.msk.f32.gmra.mxu0 %vm83_vm1, %v5368_v19 }
  0xe3   :  { %v183_v41 = vpop.f32.mrf.mxu0  ;;  %v322_v42 = vpop.f32.mrf.mxu1 }
  0xe4   :  { %v184_v43 = vadd.f32 %v6306_v35, %v183_v41  ;;  %v323_v44 = vadd.f32 %v6306_v35, %v322_v42  ;;  %v5375_v42 = vld [vmem:[%s8617_s21 + $0x1d8] sm:$0xff] }
  0xe6   :  { %v206_v45 = vmax.f32 %v184_v43, 0.0  ;;  %v345_v46 = vmax.f32 %v323_v44, 0.0  ;;  %v5326_v43 = vld [vmem:[%s8617_s21 + $0x150] sm:$0xff] }
  0xe8   :  { %5295 = vmatmul.msk.f32.gmra.mxu2 %vm351_vm2, %v345_v46  ;;  %5310 = vmatmul.msk.f32.gmra.mxu3 %vm351_vm2, %v206_v45  ;;  %v5327_v45 = vld [vmem:[%s8617_s21 + $0x158] sm:$0xff] }
  0xe9   :  { %5385 = vmatmul.msk.f32.gmra.mxu0 %vm83_vm1, %v5369_v22  ;;  %v5455_v46 = vld [vmem:[%s8617_s21 + $0x258] sm:$0xff] }
  0xeb   :  { %v186_v47 = vpop.f32.mrf.mxu0  ;;  %v325_v48 = vpop.f32.mrf.mxu1 }
  0xec   :  { %v187_v49 = vadd.f32 %v6306_v35, %v186_v47  ;;  %v326_v50 = vadd.f32 %v6306_v35, %v325_v48 }
  0xee   :  { %v207_v51 = vmax.f32 %v187_v49, 0.0  ;;  %v346_v52 = vmax.f32 %v326_v50, 0.0  ;;  %v5328_v49 = vld [vmem:[%s8617_s21 + $0x160] sm:$0xff] }
  0xf0   :  { %5296 = vmatmul.msk.f32.gmra.mxu2 %vm351_vm2, %v346_v52  ;;  %5311 = vmatmul.msk.f32.gmra.mxu3 %vm351_vm2, %v207_v51  ;;  %v5456_v51 = vld [vmem:[%s8617_s21 + $0x260] sm:$0xff]  ;;  %v5392_v52 = vld [vmem:[%s8594_s3 + $0x18] sm:$0xff] }
  0xf1   :  { %5386 = vmatmul.msk.f32.gmra.mxu0 %vm83_vm1, %v5370_v25  ;;  %1028 = vmatpush.msrb.mxu1 %v5392_v52 }
  0xf3   :  { %v189_v53 = vpop.f32.mrf.mxu0  ;;  %v328_v54 = vpop.f32.mrf.mxu1 }
  0xf4   :  { %v190_v55 = vadd.f32 %v6306_v35, %v189_v53  ;;  %v329_v56 = vadd.f32 %v6306_v35, %v328_v54 }
  0xf6   :  { %v208_v58 = vmax.f32 %v190_v55, 0.0  ;;  %v347_v59 = vmax.f32 %v329_v56, 0.0  ;;  %v5408_v56 = vld [vmem:[%s8617_s21 + $0x1e0] sm:$0xff] }
  0xf8   :  { %5297 = vmatmul.msk.f32.gmra.mxu2 %vm351_vm2, %v347_v59  ;;  %5312 = vmatmul.msk.f32.gmra.mxu3 %vm351_vm2, %v208_v58  ;;  %v5457_v58 = vld [vmem:[%s8617_s21 + $0x268] sm:$0xff] }
  0xf9   :  { %5387 = vmatmul.msk.f32.gmra.mxu0 %vm83_vm1, %v5371_v28 }
  0xfb   :  { %v192_v60 = vpop.f32.mrf.mxu0  ;;  %v331_v61 = vpop.f32.mrf.mxu1 }
  0xfc   :  { %v193_v62 = vadd.f32 %v6306_v35, %v192_v60  ;;  %v332_v63 = vadd.f32 %v6306_v35, %v331_v61 }
  0xfe   :  { %v209_v3 = vmax.f32 %v193_v62, 0.0  ;;  %v348_v4 = vmax.f32 %v332_v63, 0.0  ;;  %v5409_v63 = vld [vmem:[%s8617_s21 + $0x1e8] sm:$0xff] }
 0x100   :  { %5298 = vmatmul.msk.f32.gmra.mxu2 %vm351_vm2, %v348_v4  ;;  %5313 = vmatmul.msk.f32.gmra.mxu3 %vm351_vm2, %v209_v3  ;;  %v5458_v3 = vld [vmem:[%s8617_s21 + $0x270] sm:$0xff] }
 0x101   :  { %5388 = vmatmul.msk.f32.gmra.mxu0 %vm83_vm1, %v5372_v31 }
 0x108   :  { %5330 = vmatmul.msk.f32.vlgmr.msrb.gmra.mxu2 %vm83_vm1, %v5314_v6 }
 0x109   :  { %5517 = vmatpush.msk.msrb.mxu2 %vm129_vm0, %v6155_v1  ;;  %5389 = vmatmul.msk.f32.gmra.mxu0 %vm83_vm1, %v5373_v36 }
 0x10b   :  { %1690 = vmatpush.msrb.mxu2 %v6160_v2 }
 0x110   :  { %5331 = vmatmul.msk.f32.gmra.mxu2 %vm83_vm1, %v5315_v8 }
 0x111   :  { %5390 = vmatmul.msk.f32.gmra.mxu0 %vm83_vm1, %v5374_v39 }
 0x113   :  { %v6401_v9 = vpop.f32.mrf.mxu2  ;;  %v6549_v59 = vpop.f32.mrf.mxu3 }
 0x118   :  { %5332 = vmatmul.msk.f32.gmra.mxu2 %vm83_vm1, %v5316_v11 }
 0x119   :  { %5391 = vmatmul.msk.f32.gmra.mxu0 %vm83_vm1, %v5375_v42 }
 0x11b   :  { %v6411_v12 = vpop.f32.mrf.mxu2 }
 0x120   :  { %5333 = vmatmul.msk.f32.gmra.mxu2 %vm83_vm1, %v5317_v14 }
 0x121   :  { %5471 = vmatmul.msk.f32.vlgmr.msra.gmra.mxu0 %vm83_vm1, %v5455_v46  ;;  %v5413_v46 = vld [vmem:[%s8617_s21 + $0x208] sm:$0xff] }
 0x123   :  { %v6421_v15 = vpop.f32.mrf.mxu2 }
 0x124   :  { %v906_v48 = vpop.f32.mrf.mxu0 }
 0x125   :  { %v907_v50 = vadd.f32 %v6306_v35, %v906_v48 }
 0x127   :  { %v951_v53 = vmax.f32 %v907_v50, 0.0 }
 0x128   :  { %5334 = vmatmul.msk.f32.gmra.mxu2 %vm83_vm1, %v5318_v17 }
 0x129   :  { %5472 = vmatmul.msk.f32.gmra.mxu0 %vm83_vm1, %v5456_v51  ;;  %5393 = vmatmul.msk.f32.vlgmr.msrb.gmra.mxu1 %vm351_vm2, %v951_v53 }
 0x12b   :  { %v6431_v18 = vpop.f32.mrf.mxu2 }
 0x12e   :  { %v909_v55 = vpop.f32.mrf.mxu0 }
 0x12f   :  { %v910_v57 = vadd.f32 %v6306_v35, %v909_v55 }
 0x130   :  { %5335 = vmatmul.msk.f32.gmra.mxu2 %vm83_vm1, %v5319_v20  ;;  %v5411_v20 = vld [vmem:[%s8617_s21 + $0x1f8] sm:$0xff] }
 0x131   :  { %5473 = vmatmul.msk.f32.gmra.mxu0 %vm83_vm1, %v5457_v58  ;;  %v952_v60 = vmax.f32 %v910_v57, 0.0  ;;  %v5414_v57 = vld [vmem:[%s8617_s21 + $0x210] sm:$0xff] }
 0x133   :  { %v6441_v21 = vpop.f32.mrf.mxu2  ;;  %5394 = vmatmul.msk.f32.gmra.mxu1 %vm351_vm2, %v952_v60  ;;  %v5463_v60 = vld [vmem:[%s8617_s21 + $0x298] sm:$0xff] }
 0x136   :  { %v912_v62 = vpop.f32.mrf.mxu0 }
 0x137   :  { %v913_v0 = vadd.f32 %v6306_v35, %v912_v62 }
 0x138   :  { %5336 = vmatmul.msk.f32.gmra.mxu2 %vm83_vm1, %v5320_v23  ;;  %v5460_v23 = vld [vmem:[%s8617_s21 + $0x280] sm:$0xff] }
 0x139   :  { %5474 = vmatmul.msk.f32.gmra.mxu0 %vm83_vm1, %v5458_v3  ;;  %v953_v4 = vmax.f32 %v913_v0, 0.0 }
 0x13b   :  { %v6451_v24 = vpop.f32.mrf.mxu2  ;;  %5395 = vmatmul.msk.f32.gmra.mxu1 %vm351_vm2, %v953_v4 }
 0x13e   :  { %v915_v6 = vpop.f32.mrf.mxu0 }
 0x13f   :  { %v916_v8 = vadd.f32 %v6306_v35, %v915_v6 }
 0x140   :  { %5337 = vmatmul.msk.f32.gmra.mxu2 %vm83_vm1, %v5321_v26 }
 0x141   :  { %5475 = vmatmul.msk.f32.gmra.mxu0 %vm83_vm1, %v5459_v10  ;;  %v954_v13 = vmax.f32 %v916_v8, 0.0 }
 0x143   :  { %v6461_v27 = vpop.f32.mrf.mxu2  ;;  %5396 = vmatmul.msk.f32.gmra.mxu1 %vm351_vm2, %v954_v13 }
 0x146   :  { %v918_v19 = vpop.f32.mrf.mxu0 }
 0x147   :  { %v919_v22 = vadd.f32 %v6306_v35, %v918_v19  ;;  %v5416_v19 = vld [vmem:[%s8617_s21 + $0x220] sm:$0xff] }
 0x148   :  { %5338 = vmatmul.msk.f32.gmra.mxu2 %vm83_vm1, %v5322_v29 }
 0x149   :  { %5476 = vmatmul.msk.f32.gmra.mxu0 %vm83_vm1, %v5460_v23  ;;  %v955_v26 = vmax.f32 %v919_v22, 0.0  ;;  %v5465_v22 = vld [vmem:[%s8617_s21 + $0x2a8] sm:$0xff] }
 0x14b   :  { %v6471_v30 = vpop.f32.mrf.mxu2  ;;  %5397 = vmatmul.msk.f32.gmra.mxu1 %vm351_vm2, %v955_v26 }
 0x14e   :  { %v921_v31 = vpop.f32.mrf.mxu0 }
 0x14f   :  { %v922_v36 = vadd.f32 %v6306_v35, %v921_v31 }
 0x150   :  { %5339 = vmatmul.msk.f32.gmra.mxu2 %vm83_vm1, %v5323_v32 }
 0x153   :  { %v6481_v33 = vpop.f32.mrf.mxu2 }
 0x158   :  { %5340 = vmatmul.msk.f32.gmra.mxu2 %vm83_vm1, %v5324_v37  ;;  %v5461_v37 = vld [vmem:[%s8617_s21 + $0x288] sm:$0xff] }
 0x159   :  { %5477 = vmatmul.msk.f32.gmra.mxu0 %vm83_vm1, %v5461_v37  ;;  %v5466_v37 = vld [vmem:[%s8617_s21 + $0x2b0] sm:$0xff] }
 0x15b   :  { %v6494_v38 = vpop.f32.mrf.mxu2 }
 0x160   :  { %5341 = vmatmul.msk.f32.gmra.mxu2 %vm83_vm1, %v5325_v40  ;;  %v956_v40 = vmax.f32 %v922_v36, 0.0 }
 0x162   :  { %5398 = vmatmul.msk.f32.gmra.mxu1 %vm351_vm2, %v956_v40 }
 0x163   :  { %v6504_v41 = vpop.f32.mrf.mxu2 }
 0x168   :  { %5342 = vmatmul.msk.f32.gmra.mxu2 %vm83_vm1, %v5326_v43 }
 0x16b   :  { %v6514_v44 = vpop.f32.mrf.mxu2 }
 0x170   :  { %5343 = vmatmul.msk.f32.gmra.mxu2 %vm83_vm1, %v5327_v45  ;;  %v924_v45 = vpop.f32.mrf.mxu0 }
 0x171   :  { %v925_v48 = vadd.f32 %v6306_v35, %v924_v45 }
 0x173   :  { %v6524_v47 = vpop.f32.mrf.mxu2  ;;  %v957_v52 = vmax.f32 %v925_v48, 0.0 }
 0x175   :  { %5399 = vmatmul.msk.f32.gmra.mxu1 %vm351_vm2, %v957_v52  ;;  %v5439_v52 = vld [vmem:[%s8594_s3 + $0x20] sm:$0xff] }
 0x176   :  { %1290 = vmatpush.msra.mxu3 %v5439_v52 }
 0x178   :  { %5344 = vmatmul.msk.f32.gmra.mxu2 %vm83_vm1, %v5328_v49  ;;  %v5462_v49 = vld [vmem:[%s8617_s21 + $0x290] sm:$0xff] }
 0x179   :  { %5478 = vmatmul.msk.f32.gmra.mxu0 %vm83_vm1, %v5462_v49  ;;  %v5467_v49 = vld [vmem:[%s8617_s21 + $0x2b8] sm:$0xff] }
 0x17b   :  { %v6539_v54 = vpop.f32.mrf.mxu2 }
 0x180   :  { %5424 = vmatmul.msk.f32.vlgmr.msra.gmra.mxu2 %vm83_vm1, %v5408_v56  ;;  %v927_v56 = vpop.f32.mrf.mxu0 }
 0x181   :  { %5611 = vmatpush.msk.msra.mxu2 %vm129_vm0, %v6155_v1  ;;  %v6567_v1 = vpop.f32.mrf.mxu3  ;;  %v928_v58 = vadd.f32 %v6306_v35, %v927_v56  ;;  %5479 = vmatmul.msk.f32.gmra.mxu0 %vm83_vm1, %v5463_v60  ;;  %v5419_v60 = vld [vmem:[%s8617_s21 + $0x238] sm:$0xff] }
 0x183   :  { %v6555_v61 = vpop.f32.mrf.mxu2  ;;  %2214 = vmatpush.msra.mxu2 %v6160_v2 }
 0x188   :  { %5425 = vmatmul.msk.f32.gmra.mxu2 %vm83_vm1, %v5409_v63  ;;  %v958_v63 = vmax.f32 %v928_v58, 0.0 }
 0x189   :  { %v6582_v14 = vpop.f32.mrf.mxu3 }
 0x18a   :  { %5400 = vmatmul.msk.f32.gmra.mxu1 %vm351_vm2, %v958_v63  ;;  %v5468_v63 = vld [vmem:[%s8617_s21 + $0x2c0] sm:$0xff] }
 0x18b   :  { %v644_v2 = vpop.f32.mrf.mxu2 }
 0x18c   :  { %v645_v5 = vadd.f32 %v6306_v35, %v644_v2  ;;  %v930_v2 = vpop.f32.mrf.mxu0 }
 0x18d   :  { %v931_v6 = vadd.f32 %v6306_v35, %v930_v2 }
 0x18e   :  { %v689_v11 = vmax.f32 %v645_v5, 0.0  ;;  %v5415_v5 = vld [vmem:[%s8617_s21 + $0x218] sm:$0xff] }
 0x18f   :  { %v959_v10 = vmax.f32 %v931_v6, 0.0 }
 0x190   :  { %5346 = vmatmul.msk.f32.vlgmr.msrb.gmra.mxu3 %vm351_vm2, %v689_v11  ;;  %5426 = vmatmul.msk.f32.gmra.mxu2 %vm83_vm1, %v5410_v7  ;;  %v5464_v7 = vld [vmem:[%s8617_s21 + $0x2a0] sm:$0xff] }
 0x191   :  { %v6597_v32 = vpop.f32.mrf.mxu3  ;;  %5480 = vmatmul.msk.f32.gmra.mxu0 %vm83_vm1, %v5464_v7 }
 0x192   :  { %5401 = vmatmul.msk.f32.gmra.mxu1 %vm351_vm2, %v959_v10 }
 0x193   :  { %v647_v16 = vpop.f32.mrf.mxu2 }
 0x194   :  { %v648_v17 = vadd.f32 %v6306_v35, %v647_v16 }
 0x196   :  { %v690_v25 = vmax.f32 %v648_v17, 0.0  ;;  %v933_v17 = vpop.f32.mrf.mxu0 }
 0x198   :  { %5347 = vmatmul.msk.f32.gmra.mxu3 %vm351_vm2, %v690_v25  ;;  %5427 = vmatmul.msk.f32.gmra.mxu2 %vm83_vm1, %v5411_v20  ;;  %v934_v20 = vadd.f32 %v6306_v35, %v933_v17 }
 0x199   :  { %v6619_v51 = vpop.f32.mrf.mxu3  ;;  %5481 = vmatmul.msk.f32.gmra.mxu0 %vm83_vm1, %v5465_v22 }
 0x19a   :  { %v960_v25 = vmax.f32 %v934_v20, 0.0 }
 0x19b   :  { %v650_v28 = vpop.f32.mrf.mxu2 }
 0x19c   :  { %v651_v29 = vadd.f32 %v6306_v35, %v650_v28  ;;  %5402 = vmatmul.msk.f32.gmra.mxu1 %vm351_vm2, %v960_v25  ;;  %v5421_v25 = vld [vmem:[%s8617_s21 + $0x248] sm:$0xff] }
 0x19e   :  { %v691_v39 = vmax.f32 %v651_v29, 0.0  ;;  %v936_v29 = vpop.f32.mrf.mxu0 }
 0x19f   :  { %v937_v36 = vadd.f32 %v6306_v35, %v936_v29 }
 0x1a0   :  { %5348 = vmatmul.msk.f32.gmra.mxu3 %vm351_vm2, %v691_v39  ;;  %5428 = vmatmul.msk.f32.gmra.mxu2 %vm83_vm1, %v5412_v34  ;;  %v5417_v34 = vld [vmem:[%s8617_s21 + $0x228] sm:$0xff] }
 0x1a1   :  { %v6635_v0 = vpop.f32.mrf.mxu3  ;;  %5482 = vmatmul.msk.f32.gmra.mxu0 %vm83_vm1, %v5466_v37  ;;  %v961_v40 = vmax.f32 %v937_v36, 0.0 }
 0x1a3   :  { %v653_v42 = vpop.f32.mrf.mxu2 }
 0x1a4   :  { %v654_v43 = vadd.f32 %v6306_v35, %v653_v42  ;;  %5403 = vmatmul.msk.f32.gmra.mxu1 %vm351_vm2, %v961_v40 }
 0x1a6   :  { %v692_v50 = vmax.f32 %v654_v43, 0.0  ;;  %v939_v45 = vpop.f32.mrf.mxu0 }
 0x1a7   :  { %v940_v48 = vadd.f32 %v6306_v35, %v939_v45  ;;  %v5550_v45 = vld [vmem:[%s8617_s21 + $0x350] sm:$0xff] }
 0x1a8   :  { %5349 = vmatmul.msk.f32.gmra.mxu3 %vm351_vm2, %v692_v50  ;;  %5429 = vmatmul.msk.f32.gmra.mxu2 %vm83_vm1, %v5413_v46  ;;  %v5418_v46 = vld [vmem:[%s8617_s21 + $0x230] sm:$0xff] }
 0x1a9   :  { %v6650_v11 = vpop.f32.mrf.mxu3  ;;  %5483 = vmatmul.msk.f32.gmra.mxu0 %vm83_vm1, %v5467_v49 }
 0x1ab   :  { %v656_v53 = vpop.f32.mrf.mxu2 }
 0x1ac   :  { %v657_v55 = vadd.f32 %v6306_v35, %v656_v53 }
 0x1ae   :  { %v693_v62 = vmax.f32 %v657_v55, 0.0  ;;  %v962_v55 = vmax.f32 %v940_v48, 0.0  ;;  %v942_v58 = vpop.f32.mrf.mxu0  ;;  %v5486_v48 = vld [vmem:[%s8594_s3 + $0x28] sm:$0xff] }
 0x1af   :  { %1552 = vmatpush.msra.mxu1 %v5486_v48 }
 0x1b0   :  { %5350 = vmatmul.msk.f32.gmra.mxu3 %vm351_vm2, %v693_v62  ;;  %5430 = vmatmul.msk.f32.gmra.mxu2 %vm83_vm1, %v5414_v57  ;;  %v943_v62 = vadd.f32 %v6306_v35, %v942_v58  ;;  %v5551_v58 = vld [vmem:[%s8617_s21 + $0x358] sm:$0xff] }
 0x1b1   :  { %v6665_v31 = vpop.f32.mrf.mxu3  ;;  %5404 = vmatmul.msk.f32.gmra.mxu1 %vm351_vm2, %v962_v55  ;;  %5484 = vmatmul.msk.f32.gmra.mxu0 %vm83_vm1, %v5468_v63 }
 0x1b3   :  { %v659_v3 = vpop.f32.mrf.mxu2 }
 0x1b4   :  { %v660_v4 = vadd.f32 %v6306_v35, %v659_v3 }
 0x1b6   :  { %v694_v8 = vmax.f32 %v660_v4, 0.0  ;;  %v963_v4 = vmax.f32 %v943_v62, 0.0  ;;  %v945_v7 = vpop.f32.mrf.mxu0  ;;  %v1030_v62 = vpop.f32.mrf.mxu1 }
 0x1b7   :  { %v946_v10 = vadd.f32 %v6306_v35, %v945_v7  ;;  %v5503_v7 = vld [vmem:[%s8617_s21 + $0x2d8] sm:$0xff] }
 0x1b8   :  { %5351 = vmatmul.msk.f32.gmra.mxu3 %vm351_vm2, %v694_v8  ;;  %5431 = vmatmul.msk.f32.gmra.mxu2 %vm83_vm1, %v5415_v5  ;;  %v5420_v8 = vld [vmem:[%s8617_s21 + $0x240] sm:$0xff] }
 0x1b9   :  { %v6690_v53 = vpop.f32.mrf.mxu3  ;;  %5405 = vmatmul.msk.f32.gmra.mxu1 %vm351_vm2, %v963_v4  ;;  %v964_v17 = vmax.f32 %v946_v10, 0.0  ;;  %v5552_v10 = vld [vmem:[%s8617_s21 + $0x360] sm:$0xff] }
 0x1bb   :  { %v662_v13 = vpop.f32.mrf.mxu2 }
 0x1bc   :  { %v663_v16 = vadd.f32 %v6306_v35, %v662_v13  ;;  %v5469_v13 = vld [vmem:[%s8617_s21 + $0x2c8] sm:$0xff] }
 0x1bd   :  { %5485 = vmatmul.msk.f32.gmra.mxu0 %vm83_vm1, %v5469_v13 }
 0x1be   :  { %v695_v23 = vmax.f32 %v663_v16, 0.0 }
 0x1c0   :  { %5352 = vmatmul.msk.f32.gmra.mxu3 %vm351_vm2, %v695_v23  ;;  %5432 = vmatmul.msk.f32.gmra.mxu2 %vm83_vm1, %v5416_v19  ;;  %v948_v23 = vpop.f32.mrf.mxu0 }
 0x1c1   :  { %v6706_v2 = vpop.f32.mrf.mxu3  ;;  %5406 = vmatmul.msk.f32.gmra.mxu1 %vm351_vm2, %v964_v17 }
 0x1c3   :  { %v665_v26 = vpop.f32.mrf.mxu2 }
 0x1c4   :  { %v666_v28 = vadd.f32 %v6306_v35, %v665_v26  ;;  %v949_v26 = vadd.f32 %v6306_v35, %v948_v23 }
 0x1c6   :  { %v696_v39 = vmax.f32 %v666_v28, 0.0  ;;  %v5549_v28 = vld [vmem:[%s8617_s21 + $0x348] sm:$0xff] }
 0x1c7   :  { %5565 = vmatmul.msk.f32.vlgmr.msrb.gmra.mxu0 %vm83_vm1, %v5549_v28 }
 0x1c8   :  { %5353 = vmatmul.msk.f32.gmra.mxu3 %vm351_vm2, %v696_v39  ;;  %5433 = vmatmul.msk.f32.gmra.mxu2 %vm83_vm1, %v5417_v34  ;;  %v965_v34 = vmax.f32 %v949_v26, 0.0  ;;  %v1430_v39 = vpop.f32.mrf.mxu0  ;;  %v5504_v26 = vld [vmem:[%s8617_s21 + $0x2e0] sm:$0xff] }
 0x1c9   :  { %v6721_v19 = vpop.f32.mrf.mxu3 }
 0x1ca   :  { %5407 = vmatmul.msk.f32.gmra.mxu1 %vm351_vm2, %v965_v34 }
 0x1cb   :  { %v668_v42 = vpop.f32.mrf.mxu2 }
 0x1cc   :  { %v669_v43 = vadd.f32 %v6306_v35, %v668_v42  ;;  %v5422_v42 = vld [vmem:[%s8617_s21 + $0x250] sm:$0xff] }
 0x1ce   :  { %v697_v50 = vmax.f32 %v669_v43, 0.0  ;;  %v1431_v43 = vadd.f32 %v6306_v35, %v1430_v39 }
 0x1cf   :  { %5566 = vmatmul.msk.f32.gmra.mxu0 %vm83_vm1, %v5550_v45 }
 0x1d0   :  { %5354 = vmatmul.msk.f32.gmra.mxu3 %vm351_vm2, %v697_v50  ;;  %5434 = vmatmul.msk.f32.gmra.mxu2 %vm83_vm1, %v5418_v46  ;;  %v1475_v49 = vmax.f32 %v1431_v43, 0.0  ;;  %v1433_v55 = vpop.f32.mrf.mxu0 }
 0x1d1   :  { %v6736_v40 = vpop.f32.mrf.mxu3 }
 0x1d2   :  { %5487 = vmatmul.msk.f32.vlgmr.msra.gmra.mxu1 %vm351_vm2, %v1475_v49  ;;  %v5554_v49 = vld [vmem:[%s8617_s21 + $0x370] sm:$0xff] }
 0x1d3   :  { %v671_v56 = vpop.f32.mrf.mxu2 }
 0x1d4   :  { %v672_v57 = vadd.f32 %v6306_v35, %v671_v56  ;;  %v5502_v56 = vld [vmem:[%s8617_s21 + $0x2d0] sm:$0xff] }
 0x1d6   :  { %v698_v3 = vmax.f32 %v672_v57, 0.0  ;;  %v1434_v57 = vadd.f32 %v6306_v35, %v1433_v55 }
 0x1d7   :  { %5567 = vmatmul.msk.f32.gmra.mxu0 %vm83_vm1, %v5551_v58 }
 0x1d8   :  { %5355 = vmatmul.msk.f32.gmra.mxu3 %vm351_vm2, %v698_v3  ;;  %5435 = vmatmul.msk.f32.gmra.mxu2 %vm83_vm1, %v5419_v60  ;;  %v1476_v3 = vmax.f32 %v1434_v57, 0.0 }
 0x1d9   :  { %v6761_v63 = vpop.f32.mrf.mxu3 }
 0x1da   :  { %5488 = vmatmul.msk.f32.gmra.mxu1 %vm351_vm2, %v1476_v3 }
 0x1db   :  { %v674_v5 = vpop.f32.mrf.mxu2 }
 0x1dc   :  { %v675_v6 = vadd.f32 %v6306_v35, %v674_v5 }
 0x1de   :  { %v699_v16 = vmax.f32 %v675_v6, 0.0  ;;  %v1436_v6 = vpop.f32.mrf.mxu0 }
 0x1df   :  { %5568 = vmatmul.msk.f32.gmra.mxu0 %vm83_vm1, %v5552_v10 }
 0x1e0   :  { %5356 = vmatmul.msk.f32.gmra.mxu3 %vm351_vm2, %v699_v16  ;;  %5436 = vmatmul.msk.f32.gmra.mxu2 %vm83_vm1, %v5420_v8  ;;  %v1437_v8 = vadd.f32 %v6306_v35, %v1436_v6  ;;  %v1033_v16 = vpop.f32.mrf.mxu1 }
 0x1e2   :  { %v1477_v17 = vmax.f32 %v1437_v8, 0.0 }
 0x1e3   :  { %v677_v20 = vpop.f32.mrf.mxu2 }
 0x1e4   :  { %v678_v22 = vadd.f32 %v6306_v35, %v677_v20  ;;  %v6777_v20 = vpop.f32.mrf.mxu3  ;;  %5489 = vmatmul.msk.f32.gmra.mxu1 %vm351_vm2, %v1477_v17 }
 0x1e6   :  { %v700_v29 = vmax.f32 %v678_v22, 0.0 }
 0x1e8   :  { %5357 = vmatmul.msk.f32.gmra.mxu3 %vm351_vm2, %v700_v29  ;;  %5437 = vmatmul.msk.f32.gmra.mxu2 %vm83_vm1, %v5421_v25  ;;  %v1439_v25 = vpop.f32.mrf.mxu0  ;;  %v5553_v29 = vld [vmem:[%s8617_s21 + $0x368] sm:$0xff] }
 0x1e9   :  { %v1440_v28 = vadd.f32 %v6306_v35, %v1439_v25  ;;  %5569 = vmatmul.msk.f32.gmra.mxu0 %vm83_vm1, %v5553_v29  ;;  %v5556_v29 = vld [vmem:[%s8617_s21 + $0x380] sm:$0xff] }
 0x1eb   :  { %v680_v36 = vpop.f32.mrf.mxu2 }
 0x1ec   :  { %v681_v37 = vadd.f32 %v6306_v35, %v680_v36  ;;  %v6788_v36 = vpop.f32.mrf.mxu1  ;;  %v6794_v39 = vpop.f32.mrf.mxu3 }
 0x1ee   :  { %v701_v46 = vmax.f32 %v681_v37, 0.0  ;;  %v1478_v37 = vmax.f32 %v1440_v28, 0.0 }
 0x1f0   :  { %5358 = vmatmul.msk.f32.gmra.mxu3 %vm351_vm2, %v701_v46  ;;  %5438 = vmatmul.msk.f32.gmra.mxu2 %vm83_vm1, %v5422_v42  ;;  %v1442_v45 = vpop.f32.mrf.mxu0  ;;  %v5505_v46 = vld [vmem:[%s8617_s21 + $0x2e8] sm:$0xff] }
 0x1f1   :  { %5490 = vmatmul.msk.f32.gmra.mxu1 %vm351_vm2, %v1478_v37  ;;  %v1443_v48 = vadd.f32 %v6306_v35, %v1442_v45  ;;  %5570 = vmatmul.msk.f32.gmra.mxu0 %vm83_vm1, %v5554_v49  ;;  %v5508_v49 = vld [vmem:[%s8617_s21 + $0x300] sm:$0xff] }
 0x1f3   :  { %v683_v50 = vpop.f32.mrf.mxu2  ;;  %v1479_v55 = vmax.f32 %v1443_v48, 0.0 }
 0x1f4   :  { %v684_v52 = vadd.f32 %v6306_v35, %v683_v50 }
 0x1f6   :  { %v702_v60 = vmax.f32 %v684_v52, 0.0  ;;  %v6804_v52 = vpop.f32.mrf.mxu1 }
 0x1f8   :  { %5359 = vmatmul.msk.f32.gmra.mxu3 %vm351_vm2, %v702_v60  ;;  %5518 = vmatmul.msk.f32.vlgmr.msrb.gmra.mxu2 %vm83_vm1, %v5502_v56  ;;  %v522_v56 = vadd.f32 %v6549_v59, %v6401_v9 }
 0x1f9   :  { %5491 = vmatmul.msk.f32.gmra.mxu1 %vm351_vm2, %v1479_v55  ;;  %v5557_v55 = vld [vmem:[%s8617_s21 + $0x388] sm:$0xff] }
 0x1fb   :  { %v686_v4 = vpop.f32.mrf.mxu2 }
 0x1fc   :  { %v687_v5 = vadd.f32 %v6306_v35, %v686_v4  ;;  %v1445_v4 = vpop.f32.mrf.mxu0 }
 0x1fd   :  { %v1446_v6 = vadd.f32 %v6306_v35, %v1445_v4 }
 0x1fe   :  { %v703_v13 = vmax.f32 %v687_v5, 0.0  ;;  %v5506_v5 = vld [vmem:[%s8617_s21 + $0x2f0] sm:$0xff]  ;;  %v6822_v9 = vpop.f32.mrf.mxu1 }
 0x1ff   :  { %v1480_v59 = vmax.f32 %v1446_v6, 0.0  ;;  %v5509_v6 = vld [vmem:[%s8617_s21 + $0x308] sm:$0xff] }
 0x200   :  { %5360 = vmatmul.msk.f32.gmra.mxu3 %vm351_vm2, %v703_v13  ;;  %5519 = vmatmul.msk.f32.gmra.mxu2 %vm83_vm1, %v5503_v7  ;;  %v5555_v7 = vld [vmem:[%s8617_s21 + $0x378] sm:$0xff]  ;;  %v525_v13 = vadd.f32 %v6567_v1, %v6411_v12 }
 0x201   :  { %5571 = vmatmul.msk.f32.gmra.mxu0 %vm83_vm1, %v5555_v7  ;;  %5492 = vmatmul.msk.f32.gmra.mxu1 %vm351_vm2, %v1480_v59 }
 0x203   :  { %v1168_v22 = vpop.f32.mrf.mxu2 }
 0x204   :  { %v1169_v23 = vadd.f32 %v6306_v35, %v1168_v22  ;;  %v1448_v25 = vpop.f32.mrf.mxu0 }
 0x205   :  { %v1449_v28 = vadd.f32 %v6306_v35, %v1448_v25 }
 0x206   :  { %v1213_v34 = vmax.f32 %v1169_v23, 0.0  ;;  %v6840_v12 = vpop.f32.mrf.mxu1 }
 0x207   :  { %v1481_v1 = vmax.f32 %v1449_v28, 0.0 }
 0x208   :  { %5440 = vmatmul.msk.f32.vlgmr.msra.gmra.mxu3 %vm351_vm2, %v1213_v34  ;;  %5520 = vmatmul.msk.f32.gmra.mxu2 %vm83_vm1, %v5504_v26  ;;  %v5507_v26 = vld [vmem:[%s8617_s21 + $0x2f8] sm:$0xff] }
 0x209   :  { %5572 = vmatmul.msk.f32.gmra.mxu0 %vm83_vm1, %v5556_v29  ;;  %5493 = vmatmul.msk.f32.gmra.mxu1 %vm351_vm2, %v1481_v1  ;;  %v5559_v29 = vld [vmem:[%s8617_s21 + $0x398] sm:$0xff] }
 0x20b   :  { %v1171_v42 = vpop.f32.mrf.mxu2 }
 0x20c   :  { %v1172_v43 = vadd.f32 %v6306_v35, %v1171_v42  ;;  %v528_v42 = vadd.f32 %v6582_v14, %v6421_v15  ;;  %v1451_v48 = vpop.f32.mrf.mxu0 }
 0x20e   :  { %v1214_v50 = vmax.f32 %v1172_v43, 0.0  ;;  %v6859_v15 = vpop.f32.mrf.mxu1 }
 0x210   :  { %5441 = vmatmul.msk.f32.gmra.mxu3 %vm351_vm2, %v1214_v50  ;;  %5521 = vmatmul.msk.f32.gmra.mxu2 %vm83_vm1, %v5505_v46  ;;  %v1452_v50 = vadd.f32 %v6306_v35, %v1451_v48  ;;  %v5511_v48 = vld [vmem:[%s8617_s21 + $0x318] sm:$0xff] }
 0x211   :  { %5573 = vmatmul.msk.f32.gmra.mxu0 %vm83_vm1, %v5557_v55 }
 0x212   :  { %v1482_v14 = vmax.f32 %v1452_v50, 0.0  ;;  %v5560_v50 = vld [vmem:[%s8617_s21 + $0x3a0] sm:$0xff] }
 0x213   :  { %v768_v57 = vpop.f32.mrf.mxu3  ;;  %v1174_v58 = vpop.f32.mrf.mxu2 }
 0x214   :  { %v813_v60 = vadd.f32 %v768_v57, %v522_v56  ;;  %v1175_v3 = vadd.f32 %v6306_v35, %v1174_v58  ;;  %5494 = vmatmul.msk.f32.gmra.mxu1 %vm351_vm2, %v1482_v14 }
 0x216   :  { %v1215_v8 = vmax.f32 %v1175_v3, 0.0  ;;  %v6820_v10 = vadd.f32 %v1030_v62, %v813_v60 }
 0x218   :  { %5442 = vmatmul.msk.f32.gmra.mxu3 %vm351_vm2, %v1215_v8  ;;  %5522 = vmatmul.msk.f32.gmra.mxu2 %vm83_vm1, %v5506_v5  ;;  %v1454_v5 = vpop.f32.mrf.mxu0 }
 0x21b   :  { %v771_v17 = vpop.f32.mrf.mxu3  ;;  %v1177_v22 = vpop.f32.mrf.mxu2 }
 0x21c   :  { %v814_v23 = vadd.f32 %v771_v17, %v525_v13  ;;  %v1178_v62 = vadd.f32 %v6306_v35, %v1177_v22  ;;  %v6886_v13 = vpop.f32.mrf.mxu1  ;;  %v534_v17 = vadd.f32 %v6619_v51, %v6441_v21  ;;  %v537_v51 = vadd.f32 %v6635_v0, %v6451_v24 }
 0x21e   :  { %v1216_v34 = vmax.f32 %v1178_v62, 0.0  ;;  %v6838_v37 = vadd.f32 %v1033_v16, %v814_v23 }
 0x220   :  { %5443 = vmatmul.msk.f32.gmra.mxu3 %vm351_vm2, %v1216_v34  ;;  %5523 = vmatmul.msk.f32.gmra.mxu2 %vm83_vm1, %v5507_v26  ;;  %v1457_v25 = vpop.f32.mrf.mxu0  ;;  %v5510_v26 = vld [vmem:[%s8617_s21 + $0x310] sm:$0xff] }
 0x223   :  { %v774_v43 = vpop.f32.mrf.mxu3  ;;  %v1180_v45 = vpop.f32.mrf.mxu2 }
 0x224   :  { %v815_v46 = vadd.f32 %v774_v43, %v528_v42  ;;  %v1181_v16 = vadd.f32 %v6306_v35, %v1180_v45  ;;  %v531_v35 = vadd.f32 %v6597_v32, %v6431_v18  ;;  %v5558_v18 = vld [vmem:[%s8617_s21 + $0x390] sm:$0xff]  ;;  %v1054_v42 = vpop.f32.mrf.mxu1 }
 0x225   :  { %5574 = vmatmul.msk.f32.gmra.mxu0 %vm83_vm1, %v5558_v18 }
 0x226   :  { %v1217_v56 = vmax.f32 %v1181_v16, 0.0  ;;  %v6857_v57 = vadd.f32 %v6788_v36, %v815_v46  ;;  %v6870_v36 = vld [vmem:[%s8618_s25] ss:$0 sm:$0xff] }
 0x227   :  { %v1455_v7 = vadd.f32 %v6870_v36, %v1454_v5  ;;  %v1458_v28 = vadd.f32 %v6870_v36, %v1457_v25  ;;  %v5562_v25 = vld [vmem:[%s8617_s21 + $0x3b0] sm:$0xff] }
 0x228   :  { %5444 = vmatmul.msk.f32.gmra.mxu3 %vm351_vm2, %v1217_v56  ;;  %5524 = vmatmul.msk.f32.gmra.mxu2 %vm83_vm1, %v5508_v49  ;;  %v540_v56 = vadd.f32 %v6650_v11, %v6461_v27  ;;  %v5533_v11 = vld [vmem:[%s8594_s3 + $0x30] sm:$0xff] }
 0x229   :  { %v1483_v59 = vmax.f32 %v1455_v7, 0.0  ;;  %v1484_v21 = vmax.f32 %v1458_v28, 0.0  ;;  %1814 = vmatpush.msrb.mxu3 %v5533_v11 }
 0x22b   :  { %v777_v58 = vpop.f32.mrf.mxu3  ;;  %v1183_v60 = vpop.f32.mrf.mxu2  ;;  %5495 = vmatmul.msk.f32.gmra.mxu1 %vm351_vm2, %v1483_v59 }
 0x22c   :  { %v816_v3 = vadd.f32 %v777_v58, %v531_v35  ;;  %v1184_v4 = vadd.f32 %v6870_v36, %v1183_v60 }
 0x22d   :  { %5575 = vmatmul.msk.f32.gmra.mxu0 %vm83_vm1, %v5559_v29  ;;  %v546_v29 = vadd.f32 %v6690_v53, %v6481_v33 }
 0x22e   :  { %v1218_v32 = vmax.f32 %v1184_v4, 0.0  ;;  %v6881_v8 = vadd.f32 %v6804_v52, %v816_v3  ;;  %v1057_v3 = vpop.f32.mrf.mxu1  ;;  %v5512_v4 = vld [vmem:[%s8617_s21 + $0x320] sm:$0xff] }
 0x230   :  { %5445 = vmatmul.msk.f32.gmra.mxu3 %vm351_vm2, %v1218_v32  ;;  %5525 = vmatmul.msk.f32.gmra.mxu2 %vm83_vm1, %v5509_v6  ;;  %v5561_v6 = vld [vmem:[%s8617_s21 + $0x3a8] sm:$0xff]  ;;  %v543_v32 = vadd.f32 %v6665_v31, %v6471_v30 }
 0x233   :  { %v780_v22 = vpop.f32.mrf.mxu3  ;;  %v1186_v23 = vpop.f32.mrf.mxu2  ;;  %5496 = vmatmul.msk.f32.gmra.mxu1 %vm351_vm2, %v1484_v21 }
 0x234   :  { %v817_v62 = vadd.f32 %v780_v22, %v534_v17  ;;  %v1187_v52 = vadd.f32 %v6870_v36, %v1186_v23 }
 0x235   :  { %5576 = vmatmul.msk.f32.gmra.mxu0 %vm83_vm1, %v5560_v50 }
 0x236   :  { %v1219_v34 = vmax.f32 %v1187_v52, 0.0  ;;  %v6900_v1 = vadd.f32 %v6822_v9, %v817_v62  ;;  %v1460_v9 = vpop.f32.mrf.mxu0  ;;  %v5513_v62 = vld [vmem:[%s8617_s21 + $0x328] sm:$0xff]  ;;  %v1060_v30 = vpop.f32.mrf.mxu1 }
 0x237   :  { %v1461_v49 = vadd.f32 %v6870_v36, %v1460_v9 }
 0x238   :  { %5446 = vmatmul.msk.f32.gmra.mxu3 %vm351_vm2, %v1219_v34  ;;  %5526 = vmatmul.msk.f32.gmra.mxu2 %vm83_vm1, %v5510_v26 }
 0x239   :  { %v1485_v0 = vmax.f32 %v1461_v49, 0.0  ;;  %v549_v49 = vadd.f32 %v6706_v2, %v6494_v38  ;;  %v552_v38 = vadd.f32 %v6721_v19, %v6504_v41  ;;  %v5580_v41 = vld [vmem:[%s8594_s3 + $0x38] sm:$0xff] }
 0x23a   :  { %2076 = vmatpush.msrb.mxu1 %v5580_v41 }
 0x23b   :  { %v783_v43 = vpop.f32.mrf.mxu3  ;;  %v1189_v45 = vpop.f32.mrf.mxu2  ;;  %5497 = vmatmul.msk.f32.gmra.mxu1 %vm351_vm2, %v1485_v0 }
 0x23c   :  { %v818_v46 = vadd.f32 %v783_v43, %v537_v51  ;;  %v1190_v16 = vadd.f32 %v6870_v36, %v1189_v45  ;;  %v5514_v45 = vld [vmem:[%s8617_s21 + $0x330] sm:$0xff] }
 0x23d   :  { %5577 = vmatmul.msk.f32.gmra.mxu0 %vm83_vm1, %v5561_v6 }
 0x23e   :  { %v1220_v55 = vmax.f32 %v1190_v16, 0.0  ;;  %v6917_v24 = vadd.f32 %v6840_v12, %v818_v46  ;;  %v1463_v12 = vpop.f32.mrf.mxu0  ;;  %v5563_v16 = vld [vmem:[%s8617_s21 + $0x3b8] sm:$0xff]  ;;  %v1063_v53 = vpop.f32.mrf.mxu1 }
 0x23f   :  { %v1464_v5 = vadd.f32 %v6870_v36, %v1463_v12 }
 0x240   :  { %5447 = vmatmul.msk.f32.gmra.mxu3 %vm351_vm2, %v1220_v55  ;;  %5527 = vmatmul.msk.f32.gmra.mxu2 %vm83_vm1, %v5511_v48 }
 0x241   :  { %v1486_v18 = vmax.f32 %v1464_v5, 0.0 }
 0x243   :  { %v786_v14 = vpop.f32.mrf.mxu3  ;;  %v1192_v35 = vpop.f32.mrf.mxu2  ;;  %5498 = vmatmul.msk.f32.gmra.mxu1 %vm351_vm2, %v1486_v18 }
 0x244   :  { %v819_v58 = vadd.f32 %v786_v14, %v540_v56  ;;  %v1193_v60 = vadd.f32 %v6870_v36, %v1192_v35  ;;  %v5515_v14 = vld [vmem:[%s8617_s21 + $0x338] sm:$0xff] }
 0x245   :  { %5578 = vmatmul.msk.f32.gmra.mxu0 %vm83_vm1, %v5562_v25 }
 0x246   :  { %v1221_v7 = vmax.f32 %v1193_v60, 0.0  ;;  %v6934_v27 = vadd.f32 %v6859_v15, %v819_v58  ;;  %v1466_v23 = vpop.f32.mrf.mxu0  ;;  %v1066_v2 = vpop.f32.mrf.mxu1 }
 0x247   :  { %v1467_v52 = vadd.f32 %v6870_v36, %v1466_v23 }
 0x248   :  { %5448 = vmatmul.msk.f32.gmra.mxu3 %vm351_vm2, %v1221_v7  ;;  %5528 = vmatmul.msk.f32.gmra.mxu2 %vm83_vm1, %v5512_v4 }
 0x249   :  { %v1487_v31 = vmax.f32 %v1467_v52, 0.0 }
 0x24b   :  { %v789_v59 = vpop.f32.mrf.mxu3  ;;  %v1195_v15 = vpop.f32.mrf.mxu2  ;;  %5499 = vmatmul.msk.f32.gmra.mxu1 %vm351_vm2, %v1487_v31 }
 0x24c   :  { %v820_v17 = vadd.f32 %v789_v59, %v543_v32  ;;  %v1196_v22 = vadd.f32 %v6870_v36, %v1195_v15  ;;  %v555_v15 = vadd.f32 %v6736_v40, %v6514_v44  ;;  %v558_v44 = vadd.f32 %v6761_v63, %v6524_v47 }
 0x24d   :  { %5579 = vmatmul.msk.f32.gmra.mxu0 %vm83_vm1, %v5563_v16  ;;  %v561_v47 = vadd.f32 %v6777_v20, %v6539_v54  ;;  %v564_v20 = vadd.f32 %v6794_v39, %v6555_v61 }
 0x24e   :  { %v1222_v26 = vmax.f32 %v1196_v22, 0.0  ;;  %v6954_v28 = vadd.f32 %v6886_v13, %v820_v17  ;;  %v1469_v13 = vpop.f32.mrf.mxu0  ;;  %v1069_v52 = vpop.f32.mrf.mxu1 }
 0x24f   :  { %v1470_v46 = vadd.f32 %v6870_v36, %v1469_v13 }
 0x250   :  { %5449 = vmatmul.msk.f32.gmra.mxu3 %vm351_vm2, %v1222_v26  ;;  %5529 = vmatmul.msk.f32.gmra.mxu2 %vm83_vm1, %v5513_v62  ;;  %v5596_v26 = vld [vmem:[%s8617_s21 + $0x3c0] sm:$0xff] }
 0x251   :  { %v1488_v33 = vmax.f32 %v1470_v46, 0.0 }
 0x253   :  { %v792_v34 = vpop.f32.mrf.mxu3  ;;  %v1198_v21 = vpop.f32.mrf.mxu2  ;;  %5500 = vmatmul.msk.f32.gmra.mxu1 %vm351_vm2, %v1488_v33 }
 0x254   :  { %v821_v51 = vadd.f32 %v792_v34, %v546_v29  ;;  %v1199_v43 = vadd.f32 %v6870_v36, %v1198_v21 }
 0x256   :  { %v1223_v9 = vmax.f32 %v1199_v43, 0.0  ;;  %v6970_v48 = vadd.f32 %v1054_v42, %v821_v51  ;;  %v1472_v42 = vpop.f32.mrf.mxu0  ;;  %v1072_v33 = vpop.f32.mrf.mxu1 }
 0x257   :  { %v1473_v35 = vadd.f32 %v6870_v36, %v1472_v42 }
 0x258   :  { %5450 = vmatmul.msk.f32.gmra.mxu3 %vm351_vm2, %v1223_v9  ;;  %5530 = vmatmul.msk.f32.gmra.mxu2 %vm83_vm1, %v5514_v45  ;;  %v5597_v45 = vld [vmem:[%s8617_s21 + $0x3c8] sm:$0xff] }
 0x259   :  { %v1489_v12 = vmax.f32 %v1473_v35, 0.0 }
 0x25b   :  { %v795_v50 = vpop.f32.mrf.mxu3  ;;  %v1201_v55 = vpop.f32.mrf.mxu2  ;;  %5501 = vmatmul.msk.f32.gmra.mxu1 %vm351_vm2, %v1489_v12 }
 0x25c   :  { %v822_v0 = vadd.f32 %v795_v50, %v549_v49  ;;  %v1202_v56 = vadd.f32 %v6870_v36, %v1201_v55 }
 0x25e   :  { %v1224_v58 = vmax.f32 %v1202_v56, 0.0  ;;  %v6983_v60 = vadd.f32 %v1057_v3, %v822_v0  ;;  %v1954_v11 = vpop.f32.mrf.mxu0  ;;  %v5516_v3 = vld [vmem:[%s8617_s21 + $0x340] sm:$0xff]  ;;  %v5598_v56 = vld [vmem:[%s8617_s21 + $0x3d0] sm:$0xff]  ;;  %v1554_v54 = vpop.f32.mrf.mxu1 }
 0x25f   :  { %v1955_v18 = vadd.f32 %v6870_v36, %v1954_v11 }
 0x260   :  { %5451 = vmatmul.msk.f32.gmra.mxu3 %vm351_vm2, %v1224_v58  ;;  %5531 = vmatmul.msk.f32.gmra.mxu2 %vm83_vm1, %v5515_v14 }
 0x261   :  { %v1999_v19 = vmax.f32 %v1955_v18, 0.0 }
 0x263   :  { %v798_v4 = vpop.f32.mrf.mxu3  ;;  %v1204_v5 = vpop.f32.mrf.mxu2  ;;  %5581 = vmatmul.msk.f32.vlgmr.msrb.gmra.mxu1 %vm351_vm2, %v1999_v19 }
 0x264   :  { %v823_v6 = vadd.f32 %v798_v4, %v552_v38  ;;  %v1205_v7 = vadd.f32 %v6870_v36, %v1204_v5 }
 0x266   :  { %v1225_v32 = vmax.f32 %v1205_v7, 0.0  ;;  %v6995_v59 = vadd.f32 %v1060_v30, %v823_v6  ;;  %v1957_v25 = vpop.f32.mrf.mxu0  ;;  %v5599_v6 = vld [vmem:[%s8617_s21 + $0x3d8] sm:$0xff]  ;;  %v1557_v61 = vpop.f32.mrf.mxu1 }
 0x267   :  { %v1958_v30 = vadd.f32 %v6870_v36, %v1957_v25 }
 0x268   :  { %5452 = vmatmul.msk.f32.gmra.mxu3 %vm351_vm2, %v1225_v32  ;;  %5532 = vmatmul.msk.f32.gmra.mxu2 %vm83_vm1, %v5516_v3 }
 0x269   :  { %v2000_v34 = vmax.f32 %v1958_v30, 0.0 }
 0x26b   :  { %v801_v17 = vpop.f32.mrf.mxu3  ;;  %v1207_v22 = vpop.f32.mrf.mxu2  ;;  %5582 = vmatmul.msk.f32.gmra.mxu1 %vm351_vm2, %v2000_v34 }
 0x26c   :  { %v824_v23 = vadd.f32 %v801_v17, %v555_v15  ;;  %v1208_v62 = vadd.f32 %v6870_v36, %v1207_v22  ;;  %v5600_v17 = vld [vmem:[%s8617_s21 + $0x3e0] sm:$0xff] }
 0x26e   :  { %v1226_v31 = vmax.f32 %v1208_v62, 0.0  ;;  %v7010_v29 = vadd.f32 %v1063_v53, %v824_v23  ;;  %v1960_v13 = vpop.f32.mrf.mxu0 }
 0x26f   :  { %v1961_v46 = vadd.f32 %v6870_v36, %v1960_v13 }
 0x270   :  { %5453 = vmatmul.msk.f32.gmra.mxu3 %vm351_vm2, %v1226_v31  ;;  %5612 = vmatmul.msk.f32.vlgmr.msra.gmra.mxu2 %vm83_vm1, %v5596_v26  ;;  %v1560_v31 = vpop.f32.mrf.mxu1 }
 0x271   :  { %v2001_v53 = vmax.f32 %v1961_v46, 0.0 }
 0x273   :  { %v804_v40 = vpop.f32.mrf.mxu3  ;;  %v1210_v21 = vpop.f32.mrf.mxu2  ;;  %5583 = vmatmul.msk.f32.gmra.mxu1 %vm351_vm2, %v2001_v53 }
 0x274   :  { %v825_v51 = vadd.f32 %v804_v40, %v558_v44  ;;  %v1211_v43 = vadd.f32 %v6870_v36, %v1210_v21  ;;  %v5601_v44 = vld [vmem:[%s8617_s21 + $0x3e8] sm:$0xff] }
 0x276   :  { %v1227_v16 = vmax.f32 %v1211_v43, 0.0  ;;  %v7022_v9 = vadd.f32 %v1066_v2, %v825_v51  ;;  %v1963_v0 = vpop.f32.mrf.mxu0 }
 0x277   :  { %v1964_v42 = vadd.f32 %v6870_v36, %v1963_v0 }
 0x278   :  { %5454 = vmatmul.msk.f32.gmra.mxu3 %vm351_vm2, %v1227_v16  ;;  %5613 = vmatmul.msk.f32.gmra.mxu2 %vm83_vm1, %v5597_v45 }
 0x279   :  { %v2002_v58 = vmax.f32 %v1964_v42, 0.0 }
 0x27b   :  { %v807_v63 = vpop.f32.mrf.mxu3  ;;  %v1692_v49 = vpop.f32.mrf.mxu2  ;;  %5584 = vmatmul.msk.f32.gmra.mxu1 %vm351_vm2, %v2002_v58 }
 0x27c   :  { %v826_v50 = vadd.f32 %v807_v63, %v561_v47  ;;  %v1693_v55 = vadd.f32 %v6870_v36, %v1692_v49  ;;  %v1563_v49 = vpop.f32.mrf.mxu1 }
 0x27e   :  { %v1737_v14 = vmax.f32 %v1693_v55, 0.0  ;;  %v7034_v35 = vadd.f32 %v1069_v52, %v826_v50  ;;  %v1966_v5 = vpop.f32.mrf.mxu0 }
 0x27f   :  { %v1967_v7 = vadd.f32 %v6870_v36, %v1966_v5 }
 0x280   :  { %5534 = vmatmul.msk.f32.vlgmr.msrb.gmra.mxu3 %vm351_vm2, %v1737_v14  ;;  %5614 = vmatmul.msk.f32.gmra.mxu2 %vm83_vm1, %v5598_v56  ;;  %v5603_v14 = vld [vmem:[%s8617_s21 + $0x3f8] sm:$0xff] }
 0x281   :  { %v2003_v18 = vmax.f32 %v1967_v7, 0.0  ;;  %v5604_v7 = vld [vmem:[%s8617_s21 + $0x400] sm:$0xff] }
 0x283   :  { %v810_v12 = vpop.f32.mrf.mxu3  ;;  %v1695_v38 = vpop.f32.mrf.mxu2  ;;  %5585 = vmatmul.msk.f32.gmra.mxu1 %vm351_vm2, %v2003_v18 }
 0x284   :  { %v827_v2 = vadd.f32 %v810_v12, %v564_v20  ;;  %v1696_v4 = vadd.f32 %v6870_v36, %v1695_v38  ;;  %v1566_v38 = vpop.f32.mrf.mxu1 }
 0x286   :  { %v1738_v11 = vmax.f32 %v1696_v4, 0.0  ;;  %v7046_v3 = vadd.f32 %v1072_v33, %v827_v2  ;;  %v1969_v15 = vpop.f32.mrf.mxu0  ;;  %v5602_v33 = vld [vmem:[%s8617_s21 + $0x3f0] sm:$0xff] }
 0x287   :  { %v1970_v22 = vadd.f32 %v6870_v36, %v1969_v15 }
 0x288   :  { %5535 = vmatmul.msk.f32.gmra.mxu3 %vm351_vm2, %v1738_v11  ;;  %5615 = vmatmul.msk.f32.gmra.mxu2 %vm83_vm1, %v5599_v6 }
 0x289   :  { %v2004_v52 = vmax.f32 %v1970_v22, 0.0  ;;  %v5605_v22 = vld [vmem:[%s8617_s21 + $0x408] sm:$0xff] }
 0x28b   :  { %v1292_v39 = vpop.f32.mrf.mxu3  ;;  %v1698_v32 = vpop.f32.mrf.mxu2  ;;  %5586 = vmatmul.msk.f32.gmra.mxu1 %vm351_vm2, %v2004_v52 }
 0x28c   :  { %v1337_v41 = vadd.f32 %v1292_v39, %v6820_v10  ;;  %v1699_v19 = vadd.f32 %v6870_v36, %v1698_v32 }
 0x28e   :  { %v1739_v23 = vmax.f32 %v1699_v19, 0.0  ;;  %v7057_v62 = vadd.f32 %v1554_v54, %v1337_v41  ;;  %v1972_v34 = vpop.f32.mrf.mxu0 }
 0x28f   :  { %v1973_v40 = vadd.f32 %v6870_v36, %v1972_v34 }
 0x290   :  { %5536 = vmatmul.msk.f32.gmra.mxu3 %vm351_vm2, %v1739_v23  ;;  %5616 = vmatmul.msk.f32.gmra.mxu2 %vm83_vm1, %v5600_v17 }
 0x291   :  { %v2005_v43 = vmax.f32 %v1973_v40, 0.0 }
 0x293   :  { %v1295_v10 = vpop.f32.mrf.mxu3  ;;  %v1701_v25 = vpop.f32.mrf.mxu2  ;;  %5587 = vmatmul.msk.f32.gmra.mxu1 %vm351_vm2, %v2005_v43  ;;  %v5627_v43 = vld [vmem:[%s8594_s3 + $0x40] sm:$0xff] }
 0x294   :  { %v1338_v26 = vadd.f32 %v1295_v10, %v6838_v37  ;;  %v1702_v30 = vadd.f32 %v6870_v36, %v1701_v25  ;;  %2338 = vmatpush.msra.mxu3 %v5627_v43 }
 0x296   :  { %v1740_v21 = vmax.f32 %v1702_v30, 0.0  ;;  %v7068_v51 = vadd.f32 %v1557_v61, %v1338_v26  ;;  %v1975_v16 = vpop.f32.mrf.mxu0 }
 0x297   :  { %v1976_v53 = vadd.f32 %v6870_v36, %v1975_v16 }
 0x298   :  { %5537 = vmatmul.msk.f32.gmra.mxu3 %vm351_vm2, %v1740_v21  ;;  %5617 = vmatmul.msk.f32.gmra.mxu2 %vm83_vm1, %v5601_v44  ;;  %v5606_v44 = vld [vmem:[%s8617_s21 + $0x410] sm:$0xff] }
 0x299   :  { %v2006_v50 = vmax.f32 %v1976_v53, 0.0 }
 0x29b   :  { %v1298_v37 = vpop.f32.mrf.mxu3  ;;  %v1704_v13 = vpop.f32.mrf.mxu2  ;;  %5588 = vmatmul.msk.f32.gmra.mxu1 %vm351_vm2, %v2006_v50 }
 0x29c   :  { %v1339_v45 = vadd.f32 %v1298_v37, %v6857_v57  ;;  %v1705_v46 = vadd.f32 %v6870_v36, %v1704_v13 }
 0x29e   :  { %v1741_v47 = vmax.f32 %v1705_v46, 0.0  ;;  %v7079_v63 = vadd.f32 %v1560_v31, %v1339_v45  ;;  %v1978_v42 = vpop.f32.mrf.mxu0 }
 0x29f   :  { %v1979_v58 = vadd.f32 %v6870_v36, %v1978_v42 }
 0x2a0   :  { %5538 = vmatmul.msk.f32.gmra.mxu3 %vm351_vm2, %v1741_v47  ;;  %5618 = vmatmul.msk.f32.gmra.mxu2 %vm83_vm1, %v5602_v33  ;;  %v5607_v33 = vld [vmem:[%s8617_s21 + $0x418] sm:$0xff] }
 0x2a1   :  { %v2007_v12 = vmax.f32 %v1979_v58, 0.0 }
 0x2a3   :  { %v1301_v57 = vpop.f32.mrf.mxu3  ;;  %v1707_v55 = vpop.f32.mrf.mxu2  ;;  %5589 = vmatmul.msk.f32.gmra.mxu1 %vm351_vm2, %v2007_v12 }
 0x2a4   :  { %v1340_v0 = vadd.f32 %v1301_v57, %v6881_v8  ;;  %v1708_v56 = vadd.f32 %v6870_v36, %v1707_v55 }
 0x2a6   :  { %v1742_v54 = vmax.f32 %v1708_v56, 0.0  ;;  %v7090_v20 = vadd.f32 %v1563_v49, %v1340_v0  ;;  %v1981_v6 = vpop.f32.mrf.mxu0  ;;  %v5608_v56 = vld [vmem:[%s8617_s21 + $0x420] sm:$0xff] }
 0x2a7   :  { %v1982_v11 = vadd.f32 %v6870_v36, %v1981_v6 }
 0x2a8   :  { %5539 = vmatmul.msk.f32.gmra.mxu3 %vm351_vm2, %v1742_v54  ;;  %5619 = vmatmul.msk.f32.gmra.mxu2 %vm83_vm1, %v5603_v14 }
 0x2a9   :  { %v2008_v39 = vmax.f32 %v1982_v11, 0.0 }
 0x2ab   :  { %v1304_v8 = vpop.f32.mrf.mxu3  ;;  %v1710_v2 = vpop.f32.mrf.mxu2  ;;  %5590 = vmatmul.msk.f32.gmra.mxu1 %vm351_vm2, %v2008_v39  ;;  %v5610_v39 = vld [vmem:[%s8617_s21 + $0x430] sm:$0xff] }
 0x2ac   :  { %v1341_v4 = vadd.f32 %v1304_v8, %v6900_v1  ;;  %v1711_v5 = vadd.f32 %v6870_v36, %v1710_v2  ;;  %v1569_v1 = vpop.f32.mrf.mxu1  ;;  %v5609_v2 = vld [vmem:[%s8617_s21 + $0x428] sm:$0xff] }
 0x2ae   :  { %v1743_v18 = vmax.f32 %v1711_v5, 0.0  ;;  %v7101_v61 = vadd.f32 %v1566_v38, %v1341_v4  ;;  %v1984_v17 = vpop.f32.mrf.mxu0 }
 0x2af   :  { %v1985_v23 = vadd.f32 %v6870_v36, %v1984_v17 }
 0x2b0   :  { %5540 = vmatmul.msk.f32.gmra.mxu3 %vm351_vm2, %v1743_v18  ;;  %5620 = vmatmul.msk.f32.gmra.mxu2 %vm83_vm1, %v5604_v7 }
 0x2b1   :  { %v2009_v25 = vmax.f32 %v1985_v23, 0.0 }
 0x2b3   :  { %v1307_v32 = vpop.f32.mrf.mxu3  ;;  %v1713_v41 = vpop.f32.mrf.mxu2  ;;  %5591 = vmatmul.msk.f32.gmra.mxu1 %vm351_vm2, %v2009_v25 }
 0x2b4   :  { %v1342_v19 = vadd.f32 %v1307_v32, %v6917_v24  ;;  %v1714_v15 = vadd.f32 %v6870_v36, %v1713_v41 }
 0x2b6   :  { %v1744_v52 = vmax.f32 %v1714_v15, 0.0  ;;  %v7112_v10 = vadd.f32 %v1569_v1, %v1342_v19  ;;  %v1987_v34 = vpop.f32.mrf.mxu0 }
 0x2b7   :  { %v1988_v40 = vadd.f32 %v6870_v36, %v1987_v34 }
 0x2b8   :  { %5541 = vmatmul.msk.f32.gmra.mxu3 %vm351_vm2, %v1744_v52  ;;  %5621 = vmatmul.msk.f32.gmra.mxu2 %vm83_vm1, %v5605_v22 }
 0x2b9   :  { %v2010_v37 = vmax.f32 %v1988_v40, 0.0 }
 0x2bb   :  { %v1310_v24 = vpop.f32.mrf.mxu3  ;;  %v1716_v26 = vpop.f32.mrf.mxu2  ;;  %5592 = vmatmul.msk.f32.gmra.mxu1 %vm351_vm2, %v2010_v37 }
 0x2bc   :  { %v7118_v30 = vadd.f32 %v1310_v24, %v6934_v27  ;;  %v1717_v31 = vadd.f32 %v6870_v36, %v1716_v26  ;;  %v7192_v37 = vpop.f32.mrf.mxu1 }
 0x2be   :  { %v1745_v21 = vmax.f32 %v1717_v31, 0.0  ;;  %v1990_v16 = vpop.f32.mrf.mxu0 }
 0x2bf   :  { %v1991_v53 = vadd.f32 %v6870_v36, %v1990_v16 }
 0x2c0   :  { %5542 = vmatmul.msk.f32.gmra.mxu3 %vm351_vm2, %v1745_v21  ;;  %5622 = vmatmul.msk.f32.gmra.mxu2 %vm83_vm1, %v5606_v44 }
 0x2c1   :  { %v2011_v49 = vmax.f32 %v1991_v53, 0.0 }
 0x2c3   :  { %v1313_v27 = vpop.f32.mrf.mxu3  ;;  %v1719_v13 = vpop.f32.mrf.mxu2  ;;  %5593 = vmatmul.msk.f32.gmra.mxu1 %vm351_vm2, %v2011_v49 }
 0x2c4   :  { %v7132_v45 = vadd.f32 %v1313_v27, %v6954_v28  ;;  %v1720_v46 = vadd.f32 %v6870_v36, %v1719_v13 }
 0x2c6   :  { %v1746_v47 = vmax.f32 %v1720_v46, 0.0  ;;  %v1993_v0 = vpop.f32.mrf.mxu0 }
 0x2c7   :  { %v1994_v42 = vadd.f32 %v6870_v36, %v1993_v0 }
 0x2c8   :  { %5543 = vmatmul.msk.f32.gmra.mxu3 %vm351_vm2, %v1746_v47  ;;  %5623 = vmatmul.msk.f32.gmra.mxu2 %vm83_vm1, %v5607_v33  ;;  %v7200_v33 = vpop.f32.mrf.mxu1 }
 0x2c9   :  { %v2012_v58 = vmax.f32 %v1994_v42, 0.0 }
 0x2cb   :  { %v1316_v50 = vpop.f32.mrf.mxu3  ;;  %v1722_v28 = vpop.f32.mrf.mxu2  ;;  %5594 = vmatmul.msk.f32.gmra.mxu1 %vm351_vm2, %v2012_v58 }
 0x2cc   :  { %v7143_v57 = vadd.f32 %v1316_v50, %v6970_v48  ;;  %v1723_v55 = vadd.f32 %v6870_v36, %v1722_v28 }
 0x2ce   :  { %v1747_v14 = vmax.f32 %v1723_v55, 0.0  ;;  %v1996_v8 = vpop.f32.mrf.mxu0 }
 0x2cf   :  { %v1997_v4 = vadd.f32 %v6870_v36, %v1996_v8 }
 0x2d0   :  { %5544 = vmatmul.msk.f32.gmra.mxu3 %vm351_vm2, %v1747_v14  ;;  %5624 = vmatmul.msk.f32.gmra.mxu2 %vm83_vm1, %v5608_v56  ;;  %v7207_v55 = vpop.f32.mrf.mxu1 }
 0x2d1   :  { %v2013_v6 = vmax.f32 %v1997_v4, 0.0 }
 0x2d3   :  { %v1319_v54 = vpop.f32.mrf.mxu3  ;;  %v1725_v48 = vpop.f32.mrf.mxu2  ;;  %5595 = vmatmul.msk.f32.gmra.mxu1 %vm351_vm2, %v2013_v6 }
 0x2d4   :  { %v7154_v12 = vadd.f32 %v1319_v54, %v6983_v60  ;;  %v1726_v38 = vadd.f32 %v6870_v36, %v1725_v48 }
 0x2d6   :  { %v1748_v5 = vmax.f32 %v1726_v38, 0.0 }
 0x2d8   :  { %5545 = vmatmul.msk.f32.gmra.mxu3 %vm351_vm2, %v1748_v5  ;;  %5625 = vmatmul.msk.f32.gmra.mxu2 %vm83_vm1, %v5609_v2  ;;  %v7218_v48 = vpop.f32.mrf.mxu1 }
 0x2db   :  { %v1322_v7 = vpop.f32.mrf.mxu3  ;;  %v1728_v60 = vpop.f32.mrf.mxu2 }
 0x2dc   :  { %v7165_v11 = vadd.f32 %v1322_v7, %v6995_v59  ;;  %v1729_v18 = vadd.f32 %v6870_v36, %v1728_v60 }
 0x2de   :  { %v1749_v1 = vmax.f32 %v1729_v18, 0.0 }
 0x2e0   :  { %5546 = vmatmul.msk.f32.gmra.mxu3 %vm351_vm2, %v1749_v1  ;;  %5626 = vmatmul.msk.f32.gmra.mxu2 %vm83_vm1, %v5610_v39  ;;  %v7225_v6 = vpop.f32.mrf.mxu1 }
 0x2e3   :  { %v1325_v32 = vpop.f32.mrf.mxu3  ;;  %v1731_v41 = vpop.f32.mrf.mxu2 }
 0x2e4   :  { %v7174_v19 = vadd.f32 %v1325_v32, %v7010_v29  ;;  %v1732_v15 = vadd.f32 %v6870_v36, %v1731_v41 }
 0x2e6   :  { %v1750_v59 = vmax.f32 %v1732_v15, 0.0 }
 0x2e8   :  { %5547 = vmatmul.msk.f32.gmra.mxu3 %vm351_vm2, %v1750_v59  ;;  %v7233_v1 = vpop.f32.mrf.mxu1 }
 0x2eb   :  { %v1328_v17 = vpop.f32.mrf.mxu3  ;;  %v1734_v22 = vpop.f32.mrf.mxu2 }
 0x2ec   :  { %v7179_v23 = vadd.f32 %v1328_v17, %v7022_v9  ;;  %v1735_v52 = vadd.f32 %v6870_v36, %v1734_v22 }
 0x2ee   :  { %v1751_v25 = vmax.f32 %v1735_v52, 0.0 }
 0x2f0   :  { %5548 = vmatmul.msk.f32.gmra.mxu3 %vm351_vm2, %v1751_v25 }
 0x2f3   :  { %v1331_v24 = vpop.f32.mrf.mxu3  ;;  %v2216_v26 = vpop.f32.mrf.mxu2 }
 0x2f4   :  { %v7184_v29 = vadd.f32 %v1331_v24, %v7034_v35  ;;  %v2217_v31 = vadd.f32 %v6870_v36, %v2216_v26 }
 0x2f6   :  { %v2261_v34 = vmax.f32 %v2217_v31, 0.0 }
 0x2f8   :  { %5628 = vmatmul.msk.f32.vlgmr.msra.gmra.mxu3 %vm351_vm2, %v2261_v34 }
 0x2fb   :  { %v1334_v44 = vpop.f32.mrf.mxu3  ;;  %v2219_v40 = vpop.f32.mrf.mxu2 }
 0x2fc   :  { %v7189_v9 = vadd.f32 %v1334_v44, %v7046_v3  ;;  %v2220_v21 = vadd.f32 %v6870_v36, %v2219_v40 }
 0x2fe   :  { %v2262_v43 = vmax.f32 %v2220_v21, 0.0 }
 0x300   :  { %5629 = vmatmul.msk.f32.gmra.mxu3 %vm351_vm2, %v2262_v43 }
 0x303   :  { %v1816_v27 = vpop.f32.mrf.mxu3  ;;  %v2222_v35 = vpop.f32.mrf.mxu2 }
 0x304   :  { %v7196_v13 = vadd.f32 %v1816_v27, %v7057_v62  ;;  %v2223_v46 = vadd.f32 %v6870_v36, %v2222_v35 }
 0x306   :  { %8619 = vst [vmem:[#allocation6_spill] sm:$0xff] %v7196_v13  ;;  %v2263_v16 = vmax.f32 %v2223_v46, 0.0 }
 0x308   :  { %5630 = vmatmul.msk.f32.gmra.mxu3 %vm351_vm2, %v2263_v16 }
 0x30b   :  { %v1819_v3 = vpop.f32.mrf.mxu3  ;;  %v2225_v53 = vpop.f32.mrf.mxu2 }
 0x30c   :  { %v7203_v47 = vadd.f32 %v1819_v3, %v7068_v51  ;;  %v2226_v49 = vadd.f32 %v6870_v36, %v2225_v53 }
 0x30e   :  { %8620 = vst [vmem:[#allocation7_spill] sm:$0xff] %v7203_v47  ;;  %v2264_v50 = vmax.f32 %v2226_v49, 0.0 }
 0x310   :  { %5631 = vmatmul.msk.f32.gmra.mxu3 %vm351_vm2, %v2264_v50 }
 0x313   :  { %v1822_v28 = vpop.f32.mrf.mxu3  ;;  %v2228_v62 = vpop.f32.mrf.mxu2 }
 0x314   :  { %v7210_v0 = vadd.f32 %v1822_v28, %v7079_v63  ;;  %v2229_v56 = vadd.f32 %v6870_v36, %v2228_v62 }
 0x316   :  { %v2265_v42 = vmax.f32 %v2229_v56, 0.0 }
 0x318   :  { %5632 = vmatmul.msk.f32.gmra.mxu3 %vm351_vm2, %v2265_v42 }
 0x31b   :  { %v1825_v14 = vpop.f32.mrf.mxu3  ;;  %v2231_v51 = vpop.f32.mrf.mxu2 }
 0x31c   :  { %v7215_v58 = vadd.f32 %v1825_v14, %v7090_v20  ;;  %v2232_v54 = vadd.f32 %v6870_v36, %v2231_v51 }
 0x31e   :  { %v2266_v38 = vmax.f32 %v2232_v54, 0.0 }
 0x320   :  { %5633 = vmatmul.msk.f32.gmra.mxu3 %vm351_vm2, %v2266_v38 }
 0x323   :  { %v1828_v8 = vpop.f32.mrf.mxu3  ;;  %v2234_v63 = vpop.f32.mrf.mxu2 }
 0x324   :  { %v7222_v2 = vadd.f32 %v1828_v8, %v7101_v61  ;;  %v2235_v4 = vadd.f32 %v6870_v36, %v2234_v63 }
 0x326   :  { %v2267_v5 = vmax.f32 %v2235_v4, 0.0 }
 0x328   :  { %5634 = vmatmul.msk.f32.gmra.mxu3 %vm351_vm2, %v2267_v5 }
 0x32b   :  { %v1831_v20 = vpop.f32.mrf.mxu3  ;;  %v2237_v7 = vpop.f32.mrf.mxu2 }
 0x32c   :  { %v7229_v60 = vadd.f32 %v1831_v20, %v7112_v10  ;;  %v2238_v18 = vadd.f32 %v6870_v36, %v2237_v7  ;;  %v1590_v10 = vpop.f32.mrf.mxu1 }
 0x32e   :  { %v2268_v39 = vmax.f32 %v2238_v18, 0.0 }
 0x330   :  { %5635 = vmatmul.msk.f32.gmra.mxu3 %vm351_vm2, %v2268_v39 }
 0x333   :  { %v7235_v61 = vpop.f32.mrf.mxu3  ;;  %v2240_v32 = vpop.f32.mrf.mxu2 }
 0x334   :  { %v2241_v41 = vadd.f32 %v6870_v36, %v2240_v32  ;;  %v1593_v31 = vpop.f32.mrf.mxu1 }
 0x336   :  { %v2269_v15 = vmax.f32 %v2241_v41, 0.0 }
 0x338   :  { %5636 = vmatmul.msk.f32.gmra.mxu3 %vm351_vm2, %v2269_v15 }
 0x33b   :  { %v7239_v59 = vpop.f32.mrf.mxu3  ;;  %v2243_v17 = vpop.f32.mrf.mxu2 }
 0x33c   :  { %v2244_v22 = vadd.f32 %v6870_v36, %v2243_v17  ;;  %v1596_v27 = vpop.f32.mrf.mxu1 }
 0x33e   :  { %v2270_v52 = vmax.f32 %v2244_v22, 0.0 }
 0x340   :  { %5637 = vmatmul.msk.f32.gmra.mxu3 %vm351_vm2, %v2270_v52 }
 0x343   :  { %v7243_v25 = vpop.f32.mrf.mxu3  ;;  %v2246_v24 = vpop.f32.mrf.mxu2 }
 0x344   :  { %v2247_v26 = vadd.f32 %v6870_v36, %v2246_v24  ;;  %v7253_v53 = vpop.f32.mrf.mxu1 }
 0x345   :  { %8621 = vst [vmem:[#allocation8_spill] sm:$0xff] %v7253_v53 }
 0x346   :  { %v2271_v34 = vmax.f32 %v2247_v26, 0.0 }
 0x348   :  { %5638 = vmatmul.msk.f32.gmra.mxu3 %vm351_vm2, %v2271_v34 }
 0x34b   :  { %v7247_v44 = vpop.f32.mrf.mxu3  ;;  %v2249_v40 = vpop.f32.mrf.mxu2 }
 0x34c   :  { %v2250_v21 = vadd.f32 %v6870_v36, %v2249_v40  ;;  %v7258_v51 = vpop.f32.mrf.mxu1 }
 0x34d   :  { %8622 = vst [vmem:[#allocation9_spill] sm:$0xff] %v7258_v51  ;;  %v1609_v51 = vadd.f32 %v7225_v6, %v7165_v11  ;;  %v7302_v11 = vld [vmem:[%s8595_s4] ss:$0 sm:$0xff] }
 0x34e   :  { %v2272_v43 = vmax.f32 %v2250_v21, 0.0 }
 0x350   :  { %5639 = vmatmul.msk.f32.gmra.mxu3 %vm351_vm2, %v2272_v43 }
 0x353   :  { %v1846_v35 = vpop.f32.mrf.mxu3  ;;  %v2252_v46 = vpop.f32.mrf.mxu2 }
 0x354   :  { %v2253_v16 = vadd.f32 %v6870_v36, %v2252_v46  ;;  %v7261_v8 = vpop.f32.mrf.mxu1 }
 0x355   :  { %8623 = vst [vmem:[#allocation10_spill] sm:$0xff] %v7261_v8 }
 0x356   :  { %v2273_v3 = vmax.f32 %v2253_v16, 0.0 }
 0x358   :  { %5640 = vmatmul.msk.f32.gmra.mxu3 %vm351_vm2, %v2273_v3 }
 0x35b   :  { %v1849_v49 = vpop.f32.mrf.mxu3  ;;  %v2255_v50 = vpop.f32.mrf.mxu2 }
 0x35c   :  { %v2256_v28 = vadd.f32 %v6870_v36, %v2255_v50  ;;  %v7263_v4 = vpop.f32.mrf.mxu1 }
 0x35e   :  { %v2274_v62 = vmax.f32 %v2256_v28, 0.0 }
 0x360   :  { %5641 = vmatmul.msk.f32.gmra.mxu3 %vm351_vm2, %v2274_v62  ;;  %v1612_v62 = vadd.f32 %v1593_v31, %v7184_v29  ;;  %v1608_v29 = vadd.f32 %v7218_v48, %v7154_v12  ;;  %v1871_v31 = vadd.f32 %v1846_v35, %v1609_v51  ;;  %v1606_v12 = vadd.f32 %v7200_v33, %v7132_v45 }
 0x363   :  { %v1852_v56 = vpop.f32.mrf.mxu3  ;;  %v2258_v42 = vpop.f32.mrf.mxu2 }
 0x364   :  { %v2259_v14 = vadd.f32 %v6870_v36, %v2258_v42  ;;  %v7267_v20 = vpop.f32.mrf.mxu1 }
 0x366   :  { %v2275_v54 = vmax.f32 %v2259_v14, 0.0  ;;  %v1611_v14 = vadd.f32 %v1590_v10, %v7179_v23 }
 0x368   :  { %5642 = vmatmul.msk.f32.gmra.mxu3 %vm351_vm2, %v2275_v54  ;;  %v1613_v54 = vadd.f32 %v1596_v27, %v7189_v9  ;;  %v1873_v53 = vadd.f32 %v1852_v56, %v1611_v14  ;;  %v1607_v9 = vadd.f32 %v7207_v55, %v7143_v57  ;;  %v8634_v14 = vld [vmem:[#allocation8_spill] sm:$0xff] }
 0x36b   :  { %v1855_v38 = vpop.f32.mrf.mxu3 }
 0x36c   :  { %v7273_v36 = vpop.f32.mrf.mxu1 }
 0x373   :  { %v1858_v63 = vpop.f32.mrf.mxu3 }
 0x374   :  { %v7277_v32 = vpop.f32.mrf.mxu1  ;;  %v1875_v13 = vadd.f32 %v1858_v63, %v1613_v54 }
 0x37b   :  { %v7265_v5 = vpop.f32.mrf.mxu3 }
 0x37c   :  { %8624 = vst [vmem:[#allocation11_spill] sm:$0xff] %v7265_v5  ;;  %v2099_v15 = vpop.f32.mrf.mxu1  ;;  %v1874_v5 = vadd.f32 %v1855_v38, %v1612_v62 }
 0x383   :  { %v7269_v7 = vpop.f32.mrf.mxu3 }
 0x384   :  { %8625 = vst [vmem:[#allocation12_spill] sm:$0xff] %v7269_v7  ;;  %v2102_v22 = vpop.f32.mrf.mxu1  ;;  %v1610_v7 = vadd.f32 %v7233_v1, %v7174_v19  ;;  %v1870_v19 = vadd.f32 %v7247_v44, %v1608_v29  ;;  %v1868_v44 = vadd.f32 %v7239_v59, %v1606_v12 }
 0x386   :  { %v1872_v47 = vadd.f32 %v1849_v49, %v1610_v7 }
 0x38b   :  { %v7271_v18 = vpop.f32.mrf.mxu3  ;;  %v8635_v29 = vld [vmem:[#allocation12_spill] sm:$0xff] }
 0x38c   :  { %8626 = vst [vmem:[#allocation13_spill] sm:$0xff] %v7271_v18  ;;  %v2105_v26 = vpop.f32.mrf.mxu1 }
 0x393   :  { %v7275_v39 = vpop.f32.mrf.mxu3 }
 0x394   :  { %8627 = vst [vmem:[#allocation14_spill] sm:$0xff] %v7275_v39  ;;  %v2108_v40 = vpop.f32.mrf.mxu1 }
 0x395   :  { %v2133_v48 = vadd.f32 %v2108_v40, %v1871_v31 }
 0x39b   :  { %v7279_v41 = vpop.f32.mrf.mxu3 }
 0x39c   :  { %v2111_v43 = vpop.f32.mrf.mxu1 }
 0x39d   :  { %v2134_v1 = vadd.f32 %v2111_v43, %v1872_v47  ;;  %v1605_v47 = vadd.f32 %v7192_v37, %v7118_v30  ;;  %v2130_v30 = vadd.f32 %v2099_v15, %v1868_v44  ;;  %v2128_v15 = vadd.f32 %v7273_v36, %v7229_v60  ;;  %v8629_v43 = vld [vmem:[#allocation14_spill] sm:$0xff] }
 0x39e   :  { %v2126_v36 = vadd.f32 %v7263_v4, %v7215_v58  ;;  %v8630_v4 = vld [vmem:[#allocation7_spill] sm:$0xff] }
 0x39f   :  { %v1867_v45 = vadd.f32 %v7235_v61, %v1605_v47  ;;  %v2434_v47 = vld [vmem:[%s8596_s5] sm:$0xff]  ;;  %v5652_v44 = vld [vmem:[%s8596_s5 + $0x48] sm:$0xff] }
 0x3a1   :  { %v2129_v61 = vadd.f32 %v7277_v32, %v1867_v45  ;;  %v5686_v45 = vld [vmem:[%s8596_s5 + $0x90] sm:$0xff] }
 0x3a3   :  { %v7281_v17 = vpop.f32.mrf.mxu3 }
 0x3a4   :  { %v2114_v16 = vpop.f32.mrf.mxu1 }
 0x3a5   :  { %v2135_v8 = vadd.f32 %v2114_v16, %v1873_v53  ;;  %v2132_v53 = vadd.f32 %v2105_v26, %v1870_v19 }
 0x3ab   :  { %v7283_v52 = vpop.f32.mrf.mxu3 }
 0x3ac   :  { %v2117_v28 = vpop.f32.mrf.mxu1 }
 0x3ad   :  { %v2136_v39 = vadd.f32 %v2117_v28, %v1874_v5 }
 0x3b3   :  { %v7285_v24 = vpop.f32.mrf.mxu3 }
 0x3b4   :  { %v2120_v18 = vpop.f32.mrf.mxu1  ;;  %v2392_v7 = vadd.f32 %v7285_v24, %v2130_v30  ;;  %v2127_v24 = vadd.f32 %v7267_v20, %v7222_v2  ;;  %v8628_v20 = vld [vmem:[#allocation10_spill] sm:$0xff]  ;;  %v2437_v30 = vld [vmem:[%s8596_s5 + $0x18] sm:$0xff] }
 0x3b5   :  { %v2137_v23 = vadd.f32 %v2120_v18, %v1875_v13  ;;  %v1869_v13 = vadd.f32 %v7243_v25, %v1607_v9  ;;  %v8636_v9 = vld [vmem:[#allocation11_spill] sm:$0xff] }
 0x3b6   :  { %v2411_v40 = vadd.f32 %v7302_v11, %v2392_v7  ;;  %v5656_v7 = vld [vmem:[%s8596_s5 + $0x68] sm:$0xff] }
 0x3b7   :  { %v2131_v33 = vadd.f32 %v2102_v22, %v1869_v13  ;;  %v2391_v22 = vadd.f32 %v7283_v52, %v2129_v61  ;;  %v2389_v52 = vadd.f32 %v7279_v41, %v2127_v24  ;;  %v8631_v41 = vld [vmem:[#allocation9_spill] sm:$0xff]  ;;  %v2440_v24 = vld [vmem:[%s8596_s5 + $0x30] sm:$0xff] }
 0x3b8   :  { %v7367_v58 = vmax.f32 %v2411_v40, 0.0  ;;  %v2438_v61 = vld [vmem:[%s8596_s5 + $0x20] sm:$0xff]  ;;  %v5691_v40 = vld [vmem:[%s8596_s5 + $0xb8] sm:$0xff] }
 0x3b9   :  { %v2408_v62 = vadd.f32 %v7302_v11, %v2389_v52  ;;  %v5734_v52 = vld [vmem:[%s8596_s5 + $0x100] sm:$0xff] }
 0x3bb   :  { %v2364_v34 = vpop.f32.mrf.mxu3 }
 0x3bc   :  { %v2393_v37 = vadd.f32 %v2364_v34, %v2131_v33  ;;  %v2390_v34 = vadd.f32 %v7281_v17, %v2128_v15  ;;  %v2125_v17 = vadd.f32 %v8628_v20, %v7210_v0  ;;  %v2436_v33 = vld [vmem:[%s8596_s5 + $0x10] sm:$0xff]  ;;  %v2439_v15 = vld [vmem:[%s8596_s5 + $0x28] sm:$0xff] }
 0x3bd   :  { %v5700_v20 = vld [vmem:[%s8597_s6 + $0x10] sm:$0xff] }
 0x3be   :  { %v2412_v26 = vadd.f32 %v7302_v11, %v2393_v37  ;;  %v2409_v16 = vadd.f32 %v7302_v11, %v2390_v34  ;;  %v5655_v37 = vld [vmem:[%s8596_s5 + $0x60] sm:$0xff]  ;;  %v5658_v34 = vld [vmem:[%s8596_s5 + $0x78] sm:$0xff]  ;;  %2830 = vmatpush.msrb.mxu3 %v5700_v20 }
 0x3c0   :  { %v7358_v2 = vmax.f32 %v2412_v26, 0.0  ;;  %v5690_v26 = vld [vmem:[%s8596_s5 + $0xb0] sm:$0xff] }
 0x3c3   :  { %v2367_v21 = vpop.f32.mrf.mxu3 }
 0x3c4   :  { %v2394_v25 = vadd.f32 %v2367_v21, %v2132_v53  ;;  %v2410_v21 = vadd.f32 %v7302_v11, %v2391_v22  ;;  %v5685_v53 = vld [vmem:[%s8596_s5 + $0x88] sm:$0xff]  ;;  %v5657_v22 = vld [vmem:[%s8596_s5 + $0x70] sm:$0xff] }
 0x3c6   :  { %v2413_v18 = vadd.f32 %v7302_v11, %v2394_v25  ;;  %v7376_v0 = vmax.f32 %v2410_v21, 0.0  ;;  %v5654_v25 = vld [vmem:[%s8596_s5 + $0x58] sm:$0xff]  ;;  %v2508_v21 = vld [vmem:[%s8597_s6] sm:$0xff] }
 0x3c8   :  { %v7349_v60 = vmax.f32 %v2413_v18, 0.0  ;;  %v5689_v18 = vld [vmem:[%s8596_s5 + $0xa8] sm:$0xff] }
 0x3cb   :  { %v2370_v46 = vpop.f32.mrf.mxu3 }
 0x3cc   :  { %v2395_v56 = vadd.f32 %v2370_v46, %v2133_v48  ;;  %v2388_v46 = vadd.f32 %v8629_v43, %v2126_v36  ;;  %v2441_v36 = vld [vmem:[%s8596_s5 + $0x38] sm:$0xff] }
 0x3ce   :  { %v2414_v59 = vadd.f32 %v7302_v11, %v2395_v56  ;;  %v2435_v56 = vld [vmem:[%s8596_s5 + $0x8] sm:$0xff] }
 0x3d0   :  { %v7340_v32 = vmax.f32 %v2414_v59, 0.0  ;;  %v5688_v59 = vld [vmem:[%s8596_s5 + $0xa0] sm:$0xff] }
 0x3d3   :  { %v2373_v3 = vpop.f32.mrf.mxu3 }
 0x3d4   :  { %v2396_v35 = vadd.f32 %v2373_v3, %v2134_v1  ;;  %v2124_v3 = vadd.f32 %v8631_v41, %v8630_v4  ;;  %v7392_v1 = vmax.f32 %v2408_v62, 0.0 }
 0x3d6   :  { %v2386_v31 = vadd.f32 %v8635_v29, %v2124_v3 }
 0x3db   :  { %v2376_v50 = vpop.f32.mrf.mxu3 }
 0x3dc   :  { %v2397_v6 = vadd.f32 %v2376_v50, %v2135_v8  ;;  %v2415_v8 = vadd.f32 %v7302_v11, %v2396_v35  ;;  %v8632_v50 = vld [vmem:[#allocation13_spill] sm:$0xff] }
 0x3dd   :  { %v2387_v28 = vadd.f32 %v8632_v50, %v2125_v17 }
 0x3de   :  { %v2416_v51 = vadd.f32 %v7302_v11, %v2397_v6  ;;  %v2405_v6 = vadd.f32 %v7302_v11, %v2386_v31 }
 0x3df   :  { %v2406_v19 = vadd.f32 %v7302_v11, %v2387_v28 }
 0x3e0   :  { %v7323_v5 = vmax.f32 %v2416_v51, 0.0  ;;  %v7409_v48 = vmax.f32 %v2405_v6, 0.0  ;;  %v5653_v51 = vld [vmem:[%s8596_s5 + $0x50] sm:$0xff]  ;;  %v5737_v6 = vld [vmem:[%s8596_s5 + $0x118] sm:$0xff] }
 0x3e1   :  { %v7404_v13 = vmax.f32 %v2406_v19, 0.0 }
 0x3e3   :  { %v2379_v42 = vpop.f32.mrf.mxu3 }
 0x3e4   :  { %v2398_v10 = vadd.f32 %v2379_v42, %v2136_v39  ;;  %v7331_v39 = vmax.f32 %v2415_v8, 0.0  ;;  %v8633_v42 = vld [vmem:[#allocation6_spill] sm:$0xff]  ;;  %v5687_v8 = vld [vmem:[%s8596_s5 + $0x98] sm:$0xff] }
 0x3e5   :  { %v2123_v54 = vadd.f32 %v8634_v14, %v8633_v42  ;;  %v5735_v42 = vld [vmem:[%s8596_s5 + $0x108] sm:$0xff] }
 0x3e6   :  { %v2417_v57 = vadd.f32 %v7302_v11, %v2398_v10  ;;  %v7385_v10 = vmax.f32 %v2409_v16, 0.0 }
 0x3e8   :  { %v7317_v63 = vmax.f32 %v2417_v57, 0.0  ;;  %v5667_v57 = vld [vmem:[%s8597_s6 + $0x8] sm:$0xff] }
 0x3eb   :  { %v2382_v27 = vpop.f32.mrf.mxu3 }
 0x3ec   :  { %v2399_v49 = vadd.f32 %v2382_v27, %v2137_v23  ;;  %v2407_v23 = vadd.f32 %v7302_v11, %v2388_v46  ;;  %v2385_v27 = vadd.f32 %v8636_v9, %v2123_v54 }
 0x3ee   :  { %v2418_v55 = vadd.f32 %v7302_v11, %v2399_v49  ;;  %v7398_v49 = vmax.f32 %v2407_v23, 0.0  ;;  %v2404_v12 = vadd.f32 %v7302_v11, %v2385_v27  ;;  %v5651_v11 = vld [vmem:[%s8596_s5 + $0x40] sm:$0xff]  ;;  %v5736_v23 = vld [vmem:[%s8596_s5 + $0x110] sm:$0xff] }
 0x3f0   :  { %v7313_v38 = vmax.f32 %v2418_v55, 0.0  ;;  %v7414_v35 = vmax.f32 %v2404_v12, 0.0  ;;  %v5684_v55 = vld [vmem:[%s8596_s5 + $0x80] sm:$0xff] }
 0x3f2   :  { %2468 = vmatpush.msra.mxu0 %v7313_v38  ;;  %2543 = vmatpush.msra.mxu1 %v7313_v38 }
 0x3f3   :  { %2749 = vmatpush.msrb.mxu2 %v7313_v38 }
 0x3f4   :  { %2469 = vmatpush.msra.mxu0 %v7317_v63  ;;  %2544 = vmatpush.msra.mxu1 %v7317_v63 }
 0x3f5   :  { %2750 = vmatpush.msrb.mxu2 %v7317_v63 }
 0x3f6   :  { %2470 = vmatpush.msra.mxu0 %v7323_v5  ;;  %2545 = vmatpush.msra.mxu1 %v7323_v5 }
 0x3f7   :  { %2751 = vmatpush.msrb.mxu2 %v7323_v5 }
 0x3f8   :  { %2471 = vmatpush.msra.mxu0 %v7331_v39  ;;  %2546 = vmatpush.msra.mxu1 %v7331_v39 }
 0x3f9   :  { %2752 = vmatpush.msrb.mxu2 %v7331_v39 }
 0x3fa   :  { %2472 = vmatpush.msra.mxu0 %v7340_v32  ;;  %2547 = vmatpush.msra.mxu1 %v7340_v32 }
 0x3fb   :  { %2753 = vmatpush.msrb.mxu2 %v7340_v32 }
 0x3fc   :  { %2473 = vmatpush.msra.mxu0 %v7349_v60  ;;  %2548 = vmatpush.msra.mxu1 %v7349_v60 }
 0x3fd   :  { %2754 = vmatpush.msrb.mxu2 %v7349_v60 }
 0x3fe   :  { %2474 = vmatpush.msra.mxu0 %v7358_v2  ;;  %2549 = vmatpush.msra.mxu1 %v7358_v2 }
 0x3ff   :  { %2755 = vmatpush.msrb.mxu2 %v7358_v2 }
 0x400   :  { %2475 = vmatpush.msra.mxu0 %v7367_v58  ;;  %2550 = vmatpush.msra.mxu1 %v7367_v58 }
 0x401   :  { %2756 = vmatpush.msrb.mxu2 %v7367_v58 }
 0x402   :  { %2476 = vmatpush.msra.mxu0 %v7376_v0  ;;  %2551 = vmatpush.msra.mxu1 %v7376_v0 }
 0x403   :  { %2757 = vmatpush.msrb.mxu2 %v7376_v0 }
 0x404   :  { %2477 = vmatpush.msra.mxu0 %v7385_v10  ;;  %2552 = vmatpush.msra.mxu1 %v7385_v10 }
 0x405   :  { %2758 = vmatpush.msrb.mxu2 %v7385_v10 }
 0x406   :  { %2478 = vmatpush.msra.mxu0 %v7392_v1  ;;  %2553 = vmatpush.msra.mxu1 %v7392_v1 }
 0x407   :  { %2759 = vmatpush.msrb.mxu2 %v7392_v1 }
 0x408   :  { %2479 = vmatpush.msra.mxu0 %v7398_v49  ;;  %2554 = vmatpush.msra.mxu1 %v7398_v49 }
 0x409   :  { %2760 = vmatpush.msrb.mxu2 %v7398_v49 }
 0x40a   :  { %2480 = vmatpush.msra.mxu0 %v7404_v13  ;;  %2555 = vmatpush.msra.mxu1 %v7404_v13 }
 0x40b   :  { %2761 = vmatpush.msrb.mxu2 %v7404_v13 }
 0x40c   :  { %2481 = vmatpush.msra.mxu0 %v7409_v48  ;;  %2556 = vmatpush.msra.mxu1 %v7409_v48 }
 0x40d   :  { %2762 = vmatpush.msrb.mxu2 %v7409_v48 }
 0x40e   :  { %2482 = vmatpush.msra.mxu0 %v7414_v35  ;;  %2557 = vmatpush.msra.mxu1 %v7414_v35 }
 0x40f   :  { %2763 = vmatpush.msrb.mxu2 %v7414_v35  ;;  %5659 = vmatmul.msk.f32.vlgmr.msra.gmra.mxu1 %vm2442_vm3, %v5651_v11 }
 0x410   :  { %2624 = vmatpush.msrb.mxu0 %v5667_v57  ;;  %5692 = vmatmul.msk.f32.vlgmr.msrb.gmra.mxu2 %vm2442_vm3, %v5684_v55  ;;  %v5738_v55 = vld [vmem:[%s8596_s5 + $0x120] sm:$0xff] }
 0x411   :  { %3047 = vmatpush.msra.mxu2 %v7313_v38  ;;  %5643 = vmatmul.msk.f32.vlgmr.msra.gmra.mxu0 %vm2442_vm3, %v2434_v47 }
 0x412   :  { %2898 = vmatpush.msra.mxu0 %v7313_v38  ;;  %2689 = vmatpush.msrb.mxu1 %v2508_v21 }
 0x413   :  { %3048 = vmatpush.msra.mxu2 %v7317_v63 }
 0x414   :  { %2899 = vmatpush.msra.mxu0 %v7317_v63 }
 0x415   :  { %3049 = vmatpush.msra.mxu2 %v7323_v5 }
 0x416   :  { %2900 = vmatpush.msra.mxu0 %v7323_v5 }
 0x417   :  { %3050 = vmatpush.msra.mxu2 %v7331_v39  ;;  %5660 = vmatmul.msk.f32.gmra.mxu1 %vm2442_vm3, %v5652_v44 }
 0x418   :  { %2901 = vmatpush.msra.mxu0 %v7331_v39  ;;  %5693 = vmatmul.msk.f32.gmra.mxu2 %vm2442_vm3, %v5685_v53 }
 0x419   :  { %3051 = vmatpush.msra.mxu2 %v7340_v32  ;;  %5644 = vmatmul.msk.f32.gmra.mxu0 %vm2442_vm3, %v2435_v56  ;;  %v5709_v56 = vld [vmem:[%s8596_s5 + $0xc0] sm:$0xff] }
 0x41a   :  { %2902 = vmatpush.msra.mxu0 %v7340_v32 }
 0x41b   :  { %3052 = vmatpush.msra.mxu2 %v7349_v60 }
 0x41c   :  { %2903 = vmatpush.msra.mxu0 %v7349_v60 }
 0x41d   :  { %3053 = vmatpush.msra.mxu2 %v7358_v2 }
 0x41e   :  { %2904 = vmatpush.msra.mxu0 %v7358_v2 }
 0x41f   :  { %3054 = vmatpush.msra.mxu2 %v7367_v58  ;;  %5661 = vmatmul.msk.f32.gmra.mxu1 %vm2442_vm3, %v5653_v51  ;;  %v5739_v51 = vld [vmem:[%s8596_s5 + $0x128] sm:$0xff] }
 0x420   :  { %2905 = vmatpush.msra.mxu0 %v7367_v58  ;;  %5694 = vmatmul.msk.f32.gmra.mxu2 %vm2442_vm3, %v5686_v45 }
 0x421   :  { %3055 = vmatpush.msra.mxu2 %v7376_v0  ;;  %5645 = vmatmul.msk.f32.gmra.mxu0 %vm2442_vm3, %v2436_v33  ;;  %v5740_v33 = vld [vmem:[%s8596_s5 + $0x130] sm:$0xff] }
 0x422   :  { %2906 = vmatpush.msra.mxu0 %v7376_v0 }
 0x423   :  { %3056 = vmatpush.msra.mxu2 %v7385_v10 }
 0x424   :  { %2907 = vmatpush.msra.mxu0 %v7385_v10 }
 0x425   :  { %3057 = vmatpush.msra.mxu2 %v7392_v1 }
 0x426   :  { %2908 = vmatpush.msra.mxu0 %v7392_v1 }
 0x427   :  { %3058 = vmatpush.msra.mxu2 %v7398_v49  ;;  %5662 = vmatmul.msk.f32.gmra.mxu1 %vm2442_vm3, %v5654_v25  ;;  %v5710_v25 = vld [vmem:[%s8596_s5 + $0xc8] sm:$0xff] }
 0x428   :  { %2909 = vmatpush.msra.mxu0 %v7398_v49  ;;  %5695 = vmatmul.msk.f32.gmra.mxu2 %vm2442_vm3, %v5687_v8 }
 0x429   :  { %3059 = vmatpush.msra.mxu2 %v7404_v13  ;;  %5646 = vmatmul.msk.f32.gmra.mxu0 %vm2442_vm3, %v2437_v30  ;;  %v5760_v30 = vld [vmem:[%s8596_s5 + $0x148] sm:$0xff] }
 0x42a   :  { %2910 = vmatpush.msra.mxu0 %v7404_v13 }
 0x42b   :  { %3060 = vmatpush.msra.mxu2 %v7409_v48 }
 0x42c   :  { %2911 = vmatpush.msra.mxu0 %v7409_v48 }
 0x42d   :  { %3061 = vmatpush.msra.mxu2 %v7414_v35 }
 0x42e   :  { %2912 = vmatpush.msra.mxu0 %v7414_v35 }
 0x42f   :  { %3345 = vmatpush.msrb.mxu2 %v7313_v38  ;;  %5663 = vmatmul.msk.f32.gmra.mxu1 %vm2442_vm3, %v5655_v37  ;;  %v5790_v37 = vld [vmem:[%s8596_s5 + $0x1b0] sm:$0xff] }
 0x430   :  { %5696 = vmatmul.msk.f32.gmra.mxu2 %vm2442_vm3, %v5688_v59 }
 0x431   :  { %3346 = vmatpush.msrb.mxu2 %v7317_v63  ;;  %5647 = vmatmul.msk.f32.gmra.mxu0 %vm2442_vm3, %v2438_v61  ;;  %v5761_v61 = vld [vmem:[%s8596_s5 + $0x150] sm:$0xff] }
 0x433   :  { %3347 = vmatpush.msrb.mxu2 %v7323_v5 }
 0x435   :  { %3348 = vmatpush.msrb.mxu2 %v7331_v39 }
 0x437   :  { %3349 = vmatpush.msrb.mxu2 %v7340_v32  ;;  %5664 = vmatmul.msk.f32.gmra.mxu1 %vm2442_vm3, %v5656_v7  ;;  %v5791_v7 = vld [vmem:[%s8596_s5 + $0x1b8] sm:$0xff] }
 0x438   :  { %5697 = vmatmul.msk.f32.gmra.mxu2 %vm2442_vm3, %v5689_v18 }
 0x439   :  { %3350 = vmatpush.msrb.mxu2 %v7349_v60  ;;  %5648 = vmatmul.msk.f32.gmra.mxu0 %vm2442_vm3, %v2439_v15  ;;  %v5762_v15 = vld [vmem:[%s8596_s5 + $0x158] sm:$0xff] }
 0x43b   :  { %3351 = vmatpush.msrb.mxu2 %v7358_v2 }
 0x43d   :  { %3352 = vmatpush.msrb.mxu2 %v7367_v58 }
 0x43f   :  { %3353 = vmatpush.msrb.mxu2 %v7376_v0  ;;  %5665 = vmatmul.msk.f32.gmra.mxu1 %vm2442_vm3, %v5657_v22  ;;  %v5834_v22 = vld [vmem:[%s8596_s5 + $0x200] sm:$0xff] }
 0x440   :  { %5698 = vmatmul.msk.f32.gmra.mxu2 %vm2442_vm3, %v5690_v26 }
 0x441   :  { %3354 = vmatpush.msrb.mxu2 %v7385_v10  ;;  %5649 = vmatmul.msk.f32.gmra.mxu0 %vm2442_vm3, %v2440_v24  ;;  %v5750_v24 = vld [vmem:[%s8597_s6 + $0x20] sm:$0xff] }
 0x442   :  { %3128 = vmatpush.msra.mxu3 %v5750_v24 }
 0x443   :  { %3355 = vmatpush.msrb.mxu2 %v7392_v1 }
 0x445   :  { %3356 = vmatpush.msrb.mxu2 %v7398_v49 }
 0x447   :  { %3357 = vmatpush.msrb.mxu2 %v7404_v13  ;;  %5666 = vmatmul.msk.f32.gmra.mxu1 %vm2442_vm3, %v5658_v34 }
 0x448   :  { %5699 = vmatmul.msk.f32.gmra.mxu2 %vm2442_vm3, %v5691_v40  ;;  %v5763_v40 = vld [vmem:[%s8596_s5 + $0x160] sm:$0xff] }
 0x449   :  { %3358 = vmatpush.msrb.mxu2 %v7409_v48  ;;  %5650 = vmatmul.msk.f32.gmra.mxu0 %vm2442_vm3, %v2441_v36  ;;  %v5725_v36 = vld [vmem:[%s8597_s6 + $0x18] sm:$0xff] }
 0x44a   :  { %2979 = vmatpush.msra.mxu1 %v5725_v36 }
 0x44b   :  { %3359 = vmatpush.msrb.mxu2 %v7414_v35 }
 0x450   :  { %5742 = vmatmul.msk.f32.vlgmr.msra.gmra.mxu2 %vm2442_vm3, %v5734_v52  ;;  %v5835_v52 = vld [vmem:[%s8596_s5 + $0x208] sm:$0xff] }
 0x451   :  { %3643 = vmatpush.msra.mxu2 %v7313_v38 }
 0x453   :  { %3644 = vmatpush.msra.mxu2 %v7317_v63 }
 0x455   :  { %3645 = vmatpush.msra.mxu2 %v7323_v5 }
 0x457   :  { %3646 = vmatpush.msra.mxu2 %v7331_v39 }
 0x458   :  { %5743 = vmatmul.msk.f32.gmra.mxu2 %vm2442_vm3, %v5735_v42 }
 0x459   :  { %3647 = vmatpush.msra.mxu2 %v7340_v32 }
 0x45b   :  { %3648 = vmatpush.msra.mxu2 %v7349_v60 }
 0x45d   :  { %3649 = vmatpush.msra.mxu2 %v7358_v2 }
 0x45f   :  { %3650 = vmatpush.msra.mxu2 %v7367_v58 }
 0x460   :  { %5744 = vmatmul.msk.f32.gmra.mxu2 %vm2442_vm3, %v5736_v23 }
 0x461   :  { %3651 = vmatpush.msra.mxu2 %v7376_v0 }
 0x463   :  { %3652 = vmatpush.msra.mxu2 %v7385_v10 }
 0x465   :  { %3653 = vmatpush.msra.mxu2 %v7392_v1 }
 0x467   :  { %3654 = vmatpush.msra.mxu2 %v7398_v49 }
 0x468   :  { %5745 = vmatmul.msk.f32.gmra.mxu2 %vm2442_vm3, %v5737_v6 }
 0x469   :  { %3655 = vmatpush.msra.mxu2 %v7404_v13 }
 0x46b   :  { %3656 = vmatpush.msra.mxu2 %v7409_v48 }
 0x46d   :  { %3657 = vmatpush.msra.mxu2 %v7414_v35 }
 0x470   :  { %5746 = vmatmul.msk.f32.gmra.mxu2 %vm2442_vm3, %v5738_v55 }
 0x478   :  { %5747 = vmatmul.msk.f32.gmra.mxu2 %vm2442_vm3, %v5739_v51 }
 0x480   :  { %5748 = vmatmul.msk.f32.gmra.mxu2 %vm2442_vm3, %v5740_v33  ;;  %v5813_v33 = vld [vmem:[%s8596_s5 + $0x1e0] sm:$0xff] }
 0x48c   :  { %v2559_v17 = vpop.f32.mrf.mxu1 }
 0x48d   :  { %5668 = vmatmul.msk.f32.vlgmr.msrb.gmra.mxu0 %vm351_vm2, %v2559_v17  ;;  %v5764_v17 = vld [vmem:[%s8596_s5 + $0x168] sm:$0xff] }
 0x48e   :  { %3196 = vmatpush.msrb.mxu0 %v7313_v38  ;;  %v2484_v43 = vpop.f32.mrf.mxu0 }
 0x48f   :  { %5676 = vmatmul.msk.f32.vlgmr.msrb.gmra.mxu1 %vm351_vm2, %v2484_v43  ;;  %v5836_v43 = vld [vmem:[%s8596_s5 + $0x210] sm:$0xff] }
 0x490   :  { %3197 = vmatpush.msrb.mxu0 %v7317_v63 }
 0x492   :  { %3198 = vmatpush.msrb.mxu0 %v7323_v5 }
 0x493   :  { %v2765_v46 = vpop.f32.mrf.mxu2 }
 0x494   :  { %3199 = vmatpush.msrb.mxu0 %v7331_v39  ;;  %v2562_v16 = vpop.f32.mrf.mxu1  ;;  %5701 = vmatmul.msk.f32.vlgmr.msrb.gmra.mxu3 %vm351_vm2, %v2765_v46 }
 0x495   :  { %5669 = vmatmul.msk.f32.gmra.mxu0 %vm351_vm2, %v2562_v16 }
 0x496   :  { %3200 = vmatpush.msrb.mxu0 %v7340_v32  ;;  %v2487_v4 = vpop.f32.mrf.mxu0 }
 0x497   :  { %5677 = vmatmul.msk.f32.gmra.mxu1 %vm351_vm2, %v2487_v4  ;;  %v5765_v4 = vld [vmem:[%s8596_s5 + $0x170] sm:$0xff] }
 0x498   :  { %3201 = vmatpush.msrb.mxu0 %v7349_v60 }
 0x49a   :  { %3202 = vmatpush.msrb.mxu0 %v7358_v2 }
 0x49b   :  { %v2768_v41 = vpop.f32.mrf.mxu2 }
 0x49c   :  { %3203 = vmatpush.msrb.mxu0 %v7367_v58  ;;  %v2565_v3 = vpop.f32.mrf.mxu1  ;;  %5702 = vmatmul.msk.f32.gmra.mxu3 %vm351_vm2, %v2768_v41  ;;  %v5837_v41 = vld [vmem:[%s8596_s5 + $0x218] sm:$0xff] }
 0x49d   :  { %5670 = vmatmul.msk.f32.gmra.mxu0 %vm351_vm2, %v2565_v3 }
 0x49e   :  { %3204 = vmatpush.msrb.mxu0 %v7376_v0  ;;  %v2490_v50 = vpop.f32.mrf.mxu0 }
 0x49f   :  { %5678 = vmatmul.msk.f32.gmra.mxu1 %vm351_vm2, %v2490_v50 }
 0x4a0   :  { %3205 = vmatpush.msrb.mxu0 %v7385_v10 }
 0x4a2   :  { %3206 = vmatpush.msrb.mxu0 %v7392_v1 }
 0x4a3   :  { %v2771_v28 = vpop.f32.mrf.mxu2 }
 0x4a4   :  { %3207 = vmatpush.msrb.mxu0 %v7398_v49  ;;  %v2568_v62 = vpop.f32.mrf.mxu1  ;;  %5703 = vmatmul.msk.f32.gmra.mxu3 %vm351_vm2, %v2771_v28  ;;  %v5766_v28 = vld [vmem:[%s8596_s5 + $0x178] sm:$0xff] }
 0x4a5   :  { %5671 = vmatmul.msk.f32.gmra.mxu0 %vm351_vm2, %v2568_v62  ;;  %v5838_v62 = vld [vmem:[%s8596_s5 + $0x220] sm:$0xff] }
 0x4a6   :  { %3208 = vmatpush.msrb.mxu0 %v7404_v13  ;;  %v2493_v14 = vpop.f32.mrf.mxu0 }
 0x4a7   :  { %5679 = vmatmul.msk.f32.gmra.mxu1 %vm351_vm2, %v2493_v14 }
 0x4a8   :  { %3209 = vmatpush.msrb.mxu0 %v7409_v48 }
 0x4aa   :  { %3210 = vmatpush.msrb.mxu0 %v7414_v35 }
 0x4ab   :  { %v2774_v54 = vpop.f32.mrf.mxu2 }
 0x4ac   :  { %v2571_v29 = vpop.f32.mrf.mxu1  ;;  %5704 = vmatmul.msk.f32.gmra.mxu3 %vm351_vm2, %v2774_v54  ;;  %v5809_v54 = vld [vmem:[%s8596_s5 + $0x1c0] sm:$0xff] }
 0x4ad   :  { %5672 = vmatmul.msk.f32.gmra.mxu0 %vm351_vm2, %v2571_v29  ;;  %v5839_v29 = vld [vmem:[%s8596_s5 + $0x228] sm:$0xff] }
 0x4ae   :  { %v2496_v31 = vpop.f32.mrf.mxu0 }
 0x4af   :  { %5680 = vmatmul.msk.f32.gmra.mxu1 %vm351_vm2, %v2496_v31 }
 0x4b3   :  { %v2777_v27 = vpop.f32.mrf.mxu2 }
 0x4b4   :  { %v2574_v9 = vpop.f32.mrf.mxu1  ;;  %5705 = vmatmul.msk.f32.gmra.mxu3 %vm351_vm2, %v2777_v27  ;;  %v5840_v27 = vld [vmem:[%s8596_s5 + $0x230] sm:$0xff] }
 0x4b5   :  { %5673 = vmatmul.msk.f32.gmra.mxu0 %vm351_vm2, %v2574_v9  ;;  %v5810_v9 = vld [vmem:[%s8596_s5 + $0x1c8] sm:$0xff] }
 0x4b6   :  { %v2499_v19 = vpop.f32.mrf.mxu0 }
 0x4b7   :  { %5681 = vmatmul.msk.f32.gmra.mxu1 %vm351_vm2, %v2499_v19 }
 0x4bb   :  { %v2780_v11 = vpop.f32.mrf.mxu2 }
 0x4bc   :  { %v2577_v12 = vpop.f32.mrf.mxu1  ;;  %5706 = vmatmul.msk.f32.gmra.mxu3 %vm351_vm2, %v2780_v11  ;;  %v5841_v11 = vld [vmem:[%s8596_s5 + $0x238] sm:$0xff] }
 0x4bd   :  { %5674 = vmatmul.msk.f32.gmra.mxu0 %vm351_vm2, %v2577_v12  ;;  %v5811_v12 = vld [vmem:[%s8596_s5 + $0x1d0] sm:$0xff] }
 0x4be   :  { %v2502_v57 = vpop.f32.mrf.mxu0 }
 0x4bf   :  { %5682 = vmatmul.msk.f32.gmra.mxu1 %vm351_vm2, %v2502_v57 }
 0x4c3   :  { %v2783_v44 = vpop.f32.mrf.mxu2 }
 0x4c4   :  { %v2580_v47 = vpop.f32.mrf.mxu1  ;;  %5707 = vmatmul.msk.f32.gmra.mxu3 %vm351_vm2, %v2783_v44  ;;  %v5812_v44 = vld [vmem:[%s8596_s5 + $0x1d8] sm:$0xff] }
 0x4c5   :  { %5675 = vmatmul.msk.f32.gmra.mxu0 %vm351_vm2, %v2580_v47 }
 0x4c6   :  { %v2505_v53 = vpop.f32.mrf.mxu0 }
 0x4c7   :  { %5683 = vmatmul.msk.f32.gmra.mxu1 %vm351_vm2, %v2505_v53  ;;  %v5800_v53 = vld [vmem:[%s8597_s6 + $0x30] sm:$0xff] }
 0x4c8   :  { %3426 = vmatpush.msrb.mxu3 %v5800_v53 }
 0x4cb   :  { %v2786_v45 = vpop.f32.mrf.mxu2 }
 0x4cc   :  { %5708 = vmatmul.msk.f32.gmra.mxu3 %vm351_vm2, %v2786_v45 }
 0x4cd   :  { %5717 = vmatmul.msk.f32.vlgmr.msra.gmra.mxu0 %vm2442_vm3, %v5709_v56 }
 0x4ce   :  { %3494 = vmatpush.msra.mxu0 %v7313_v38  ;;  %v5741_v38 = vld [vmem:[%s8596_s5 + $0x138] sm:$0xff] }
 0x4cf   :  { %5749 = vmatmul.msk.f32.gmra.mxu2 %vm2442_vm3, %v5741_v38 }
 0x4d0   :  { %3495 = vmatpush.msra.mxu0 %v7317_v63  ;;  %v5711_v63 = vld [vmem:[%s8596_s5 + $0xd0] sm:$0xff] }
 0x4d2   :  { %3496 = vmatpush.msra.mxu0 %v7323_v5  ;;  %v5784_v5 = vld [vmem:[%s8596_s5 + $0x180] sm:$0xff] }
 0x4d3   :  { %v3063_v26 = vpop.f32.mrf.mxu2 }
 0x4d4   :  { %3497 = vmatpush.msra.mxu0 %v7331_v39  ;;  %v5712_v39 = vld [vmem:[%s8596_s5 + $0xd8] sm:$0xff]  ;;  %5751 = vmatmul.msk.f32.vlgmr.msra.gmra.mxu3 %vm351_vm2, %v3063_v26 }
 0x4d5   :  { %5718 = vmatmul.msk.f32.gmra.mxu0 %vm2442_vm3, %v5710_v25  ;;  %v5775_v25 = vld [vmem:[%s8597_s6 + $0x28] sm:$0xff] }
 0x4d6   :  { %3498 = vmatpush.msra.mxu0 %v7340_v32  ;;  %v5713_v32 = vld [vmem:[%s8596_s5 + $0xe0] sm:$0xff]  ;;  %3277 = vmatpush.msrb.mxu1 %v5775_v25 }
 0x4d7   :  { %5792 = vmatmul.msk.f32.vlgmr.msrb.gmra.mxu2 %vm2442_vm3, %v5784_v5 }
 0x4d8   :  { %3499 = vmatpush.msra.mxu0 %v7349_v60  ;;  %v5785_v60 = vld [vmem:[%s8596_s5 + $0x188] sm:$0xff] }
 0x4da   :  { %3500 = vmatpush.msra.mxu0 %v7358_v2  ;;  %v5714_v2 = vld [vmem:[%s8596_s5 + $0xe8] sm:$0xff] }
 0x4db   :  { %v3066_v21 = vpop.f32.mrf.mxu2 }
 0x4dc   :  { %3501 = vmatpush.msra.mxu0 %v7367_v58  ;;  %v5786_v58 = vld [vmem:[%s8596_s5 + $0x190] sm:$0xff]  ;;  %5752 = vmatmul.msk.f32.gmra.mxu3 %vm351_vm2, %v3066_v21 }
 0x4dd   :  { %5719 = vmatmul.msk.f32.gmra.mxu0 %vm2442_vm3, %v5711_v63 }
 0x4de   :  { %3502 = vmatpush.msra.mxu0 %v7376_v0  ;;  %v5715_v0 = vld [vmem:[%s8596_s5 + $0xf0] sm:$0xff] }
 0x4df   :  { %5793 = vmatmul.msk.f32.gmra.mxu2 %vm2442_vm3, %v5785_v60 }
 0x4e0   :  { %3503 = vmatpush.msra.mxu0 %v7385_v10  ;;  %v5787_v10 = vld [vmem:[%s8596_s5 + $0x198] sm:$0xff] }
 0x4e2   :  { %3504 = vmatpush.msra.mxu0 %v7392_v1  ;;  %v5716_v1 = vld [vmem:[%s8596_s5 + $0xf8] sm:$0xff] }
 0x4e3   :  { %v3069_v46 = vpop.f32.mrf.mxu2 }
 0x4e4   :  { %3505 = vmatpush.msra.mxu0 %v7398_v49  ;;  %v5788_v49 = vld [vmem:[%s8596_s5 + $0x1a0] sm:$0xff]  ;;  %5753 = vmatmul.msk.f32.gmra.mxu3 %vm351_vm2, %v3069_v46 }
 0x4e5   :  { %5720 = vmatmul.msk.f32.gmra.mxu0 %vm2442_vm3, %v5712_v39  ;;  %v5814_v39 = vld [vmem:[%s8596_s5 + $0x1e8] sm:$0xff]  ;;  %v5850_v46 = vld [vmem:[%s8597_s6 + $0x40] sm:$0xff] }
 0x4e6   :  { %3506 = vmatpush.msra.mxu0 %v7404_v13  ;;  %3724 = vmatpush.msra.mxu3 %v5850_v46 }
 0x4e7   :  { %5794 = vmatmul.msk.f32.gmra.mxu2 %vm2442_vm3, %v5786_v58 }
 0x4e8   :  { %3507 = vmatpush.msra.mxu0 %v7409_v48  ;;  %v5759_v48 = vld [vmem:[%s8596_s5 + $0x140] sm:$0xff] }
 0x4ea   :  { %3508 = vmatpush.msra.mxu0 %v7414_v35  ;;  %v5789_v35 = vld [vmem:[%s8596_s5 + $0x1a8] sm:$0xff] }
 0x4eb   :  { %v3072_v3 = vpop.f32.mrf.mxu2 }
 0x4ec   :  { %5754 = vmatmul.msk.f32.gmra.mxu3 %vm351_vm2, %v3072_v3 }
 0x4ed   :  { %5721 = vmatmul.msk.f32.gmra.mxu0 %vm2442_vm3, %v5713_v32 }
 0x4ef   :  { %5795 = vmatmul.msk.f32.gmra.mxu2 %vm2442_vm3, %v5787_v10 }
 0x4f3   :  { %v3075_v42 = vpop.f32.mrf.mxu2 }
 0x4f4   :  { %5755 = vmatmul.msk.f32.gmra.mxu3 %vm351_vm2, %v3075_v42 }
 0x4f5   :  { %5722 = vmatmul.msk.f32.gmra.mxu0 %vm2442_vm3, %v5714_v2 }
 0x4f7   :  { %5796 = vmatmul.msk.f32.gmra.mxu2 %vm2442_vm3, %v5788_v49  ;;  %v5816_v49 = vld [vmem:[%s8596_s5 + $0x1f8] sm:$0xff] }
 0x4fb   :  { %v3078_v31 = vpop.f32.mrf.mxu2 }
 0x4fc   :  { %5756 = vmatmul.msk.f32.gmra.mxu3 %vm351_vm2, %v3078_v31 }
 0x4fd   :  { %5723 = vmatmul.msk.f32.gmra.mxu0 %vm2442_vm3, %v5715_v0  ;;  %v5815_v0 = vld [vmem:[%s8596_s5 + $0x1f0] sm:$0xff] }
 0x4ff   :  { %5797 = vmatmul.msk.f32.gmra.mxu2 %vm2442_vm3, %v5789_v35 }
 0x503   :  { %v3081_v19 = vpop.f32.mrf.mxu2 }
 0x504   :  { %5757 = vmatmul.msk.f32.gmra.mxu3 %vm351_vm2, %v3081_v19 }
 0x505   :  { %5724 = vmatmul.msk.f32.gmra.mxu0 %vm2442_vm3, %v5716_v1 }
 0x507   :  { %5798 = vmatmul.msk.f32.gmra.mxu2 %vm2442_vm3, %v5790_v37 }
 0x50a   :  { %v7725_v13 = vpop.f32.mrf.mxu0 }
 0x50c   :  { %v7876_v60 = vpop.f32.mrf.mxu1 }
 0x50d   :  { %5767 = vmatmul.msk.f32.vlgmr.msrb.gmra.mxu0 %vm2442_vm3, %v5759_v48 }
 0x50f   :  { %5799 = vmatmul.msk.f32.gmra.mxu2 %vm2442_vm3, %v5791_v7 }
 0x512   :  { %v7735_v8 = vpop.f32.mrf.mxu0 }
 0x514   :  { %v7889_v48 = vpop.f32.mrf.mxu1 }
 0x515   :  { %5768 = vmatmul.msk.f32.gmra.mxu0 %vm2442_vm3, %v5760_v30 }
 0x517   :  { %5842 = vmatmul.msk.f32.vlgmr.msra.gmra.mxu2 %vm2442_vm3, %v5834_v22  ;;  %v7843_v57 = vpop.f32.mrf.mxu3 }
 0x51a   :  { %v7745_v59 = vpop.f32.mrf.mxu0 }
 0x51d   :  { %5769 = vmatmul.msk.f32.gmra.mxu0 %vm2442_vm3, %v5761_v61  ;;  %v7897_v61 = vpop.f32.mrf.mxu1 }
 0x51f   :  { %5843 = vmatmul.msk.f32.gmra.mxu2 %vm2442_vm3, %v5835_v52  ;;  %v7856_v56 = vpop.f32.mrf.mxu3 }
 0x522   :  { %v7755_v18 = vpop.f32.mrf.mxu0 }
 0x525   :  { %5770 = vmatmul.msk.f32.gmra.mxu0 %vm2442_vm3, %v5762_v15  ;;  %v7903_v24 = vpop.f32.mrf.mxu1 }
 0x527   :  { %5844 = vmatmul.msk.f32.gmra.mxu2 %vm2442_vm3, %v5836_v43  ;;  %v7868_v63 = vpop.f32.mrf.mxu3 }
 0x52a   :  { %v7769_v34 = vpop.f32.mrf.mxu0 }
 0x52d   :  { %5771 = vmatmul.msk.f32.gmra.mxu0 %vm2442_vm3, %v5763_v40  ;;  %v7910_v21 = vpop.f32.mrf.mxu1 }
 0x52f   :  { %5845 = vmatmul.msk.f32.gmra.mxu2 %vm2442_vm3, %v5837_v41  ;;  %v7878_v2 = vpop.f32.mrf.mxu3 }
 0x532   :  { %v7783_v20 = vpop.f32.mrf.mxu0 }
 0x535   :  { %5772 = vmatmul.msk.f32.gmra.mxu0 %vm2442_vm3, %v5764_v17 }
 0x537   :  { %5846 = vmatmul.msk.f32.gmra.mxu2 %vm2442_vm3, %v5838_v62  ;;  %v7892_v35 = vpop.f32.mrf.mxu3  ;;  %v7925_v62 = vpop.f32.mrf.mxu1 }
 0x53a   :  { %v7794_v16 = vpop.f32.mrf.mxu0 }
 0x53d   :  { %5773 = vmatmul.msk.f32.gmra.mxu0 %vm2442_vm3, %v5765_v4 }
 0x53f   :  { %5847 = vmatmul.msk.f32.gmra.mxu2 %vm2442_vm3, %v5839_v29  ;;  %v7899_v7 = vpop.f32.mrf.mxu3  ;;  %v7931_v29 = vpop.f32.mrf.mxu1 }
 0x542   :  { %v7805_v50 = vpop.f32.mrf.mxu0 }
 0x545   :  { %5774 = vmatmul.msk.f32.gmra.mxu0 %vm2442_vm3, %v5766_v28  ;;  %v5825_v28 = vld [vmem:[%s8597_s6 + $0x38] sm:$0xff] }
 0x547   :  { %5848 = vmatmul.msk.f32.gmra.mxu2 %vm2442_vm3, %v5840_v27  ;;  %v7906_v40 = vpop.f32.mrf.mxu3  ;;  %v7937_v19 = vpop.f32.mrf.mxu1 }
 0x54a   :  { %v2914_v14 = vpop.f32.mrf.mxu0 }
 0x54b   :  { %5726 = vmatmul.msk.f32.vlgmr.msra.gmra.mxu1 %vm351_vm2, %v2914_v14 }
 0x54c   :  { %3575 = vmatpush.msra.mxu1 %v5825_v28 }
 0x54d   :  { %5817 = vmatmul.msk.f32.vlgmr.msra.gmra.mxu0 %vm2442_vm3, %v5809_v54 }
 0x54f   :  { %5849 = vmatmul.msk.f32.gmra.mxu2 %vm2442_vm3, %v5841_v11  ;;  %v7912_v17 = vpop.f32.mrf.mxu3 }
 0x552   :  { %v2917_v23 = vpop.f32.mrf.mxu0  ;;  %v3084_v55 = vpop.f32.mrf.mxu2 }
 0x553   :  { %5727 = vmatmul.msk.f32.gmra.mxu1 %vm351_vm2, %v2917_v23  ;;  %5758 = vmatmul.msk.f32.gmra.mxu3 %vm351_vm2, %v3084_v55 }
 0x555   :  { %5818 = vmatmul.msk.f32.gmra.mxu0 %vm2442_vm3, %v5810_v9 }
 0x557   :  { %v7919_v3 = vpop.f32.mrf.mxu3 }
 0x55a   :  { %v2920_v6 = vpop.f32.mrf.mxu0  ;;  %v3361_v51 = vpop.f32.mrf.mxu2 }
 0x55b   :  { %5728 = vmatmul.msk.f32.gmra.mxu1 %vm351_vm2, %v2920_v6  ;;  %5801 = vmatmul.msk.f32.vlgmr.msrb.gmra.mxu3 %vm351_vm2, %v3361_v51 }
 0x55d   :  { %5819 = vmatmul.msk.f32.gmra.mxu0 %vm2442_vm3, %v5811_v12 }
 0x55f   :  { %v7928_v54 = vpop.f32.mrf.mxu3 }
 0x562   :  { %v2923_v47 = vpop.f32.mrf.mxu0  ;;  %v3364_v38 = vpop.f32.mrf.mxu2 }
 0x563   :  { %5729 = vmatmul.msk.f32.gmra.mxu1 %vm351_vm2, %v2923_v47  ;;  %5802 = vmatmul.msk.f32.gmra.mxu3 %vm351_vm2, %v3364_v38 }
 0x565   :  { %5820 = vmatmul.msk.f32.gmra.mxu0 %vm2442_vm3, %v5812_v44 }
 0x567   :  { %v7934_v9 = vpop.f32.mrf.mxu3 }
 0x56a   :  { %v2926_v45 = vpop.f32.mrf.mxu0  ;;  %v3367_v32 = vpop.f32.mrf.mxu2 }
 0x56b   :  { %5730 = vmatmul.msk.f32.gmra.mxu1 %vm351_vm2, %v2926_v45  ;;  %5803 = vmatmul.msk.f32.gmra.mxu3 %vm351_vm2, %v3367_v32 }
 0x56d   :  { %5821 = vmatmul.msk.f32.gmra.mxu0 %vm2442_vm3, %v5813_v33 }
 0x56f   :  { %v7940_v12 = vpop.f32.mrf.mxu3 }
 0x572   :  { %v2929_v5 = vpop.f32.mrf.mxu0  ;;  %v3370_v10 = vpop.f32.mrf.mxu2 }
 0x573   :  { %5731 = vmatmul.msk.f32.gmra.mxu1 %vm351_vm2, %v2929_v5  ;;  %5804 = vmatmul.msk.f32.gmra.mxu3 %vm351_vm2, %v3370_v10 }
 0x575   :  { %5822 = vmatmul.msk.f32.gmra.mxu0 %vm2442_vm3, %v5814_v39 }
 0x577   :  { %v7944_v44 = vpop.f32.mrf.mxu3 }
 0x57a   :  { %v2932_v58 = vpop.f32.mrf.mxu0  ;;  %v3373_v30 = vpop.f32.mrf.mxu2 }
 0x57b   :  { %5732 = vmatmul.msk.f32.gmra.mxu1 %vm351_vm2, %v2932_v58  ;;  %5805 = vmatmul.msk.f32.gmra.mxu3 %vm351_vm2, %v3373_v30 }
 0x57d   :  { %5823 = vmatmul.msk.f32.gmra.mxu0 %vm2442_vm3, %v5815_v0 }
 0x57f   :  { %v7950_v33 = vpop.f32.mrf.mxu3 }
 0x582   :  { %v2935_v1 = vpop.f32.mrf.mxu0  ;;  %v3376_v15 = vpop.f32.mrf.mxu2 }
 0x583   :  { %5733 = vmatmul.msk.f32.gmra.mxu1 %vm351_vm2, %v2935_v1  ;;  %5806 = vmatmul.msk.f32.gmra.mxu3 %vm351_vm2, %v3376_v15 }
 0x585   :  { %5824 = vmatmul.msk.f32.gmra.mxu0 %vm2442_vm3, %v5816_v49 }
 0x587   :  { %v7956_v39 = vpop.f32.mrf.mxu3 }
 0x58a   :  { %v3212_v37 = vpop.f32.mrf.mxu0  ;;  %v3379_v26 = vpop.f32.mrf.mxu2 }
 0x58b   :  { %5776 = vmatmul.msk.f32.vlgmr.msrb.gmra.mxu1 %vm351_vm2, %v3212_v37  ;;  %5807 = vmatmul.msk.f32.gmra.mxu3 %vm351_vm2, %v3379_v26 }
 0x592   :  { %v3215_v22 = vpop.f32.mrf.mxu0  ;;  %v3382_v52 = vpop.f32.mrf.mxu2 }
 0x593   :  { %5777 = vmatmul.msk.f32.gmra.mxu1 %vm351_vm2, %v3215_v22  ;;  %5808 = vmatmul.msk.f32.gmra.mxu3 %vm351_vm2, %v3382_v52 }
 0x59a   :  { %v3218_v36 = vpop.f32.mrf.mxu0  ;;  %v3659_v4 = vpop.f32.mrf.mxu2 }
 0x59b   :  { %5778 = vmatmul.msk.f32.gmra.mxu1 %vm351_vm2, %v3218_v36  ;;  %5851 = vmatmul.msk.f32.vlgmr.msra.gmra.mxu3 %vm351_vm2, %v3659_v4 }
 0x5a2   :  { %v3221_v43 = vpop.f32.mrf.mxu0  ;;  %v3662_v42 = vpop.f32.mrf.mxu2 }
 0x5a3   :  { %5779 = vmatmul.msk.f32.gmra.mxu1 %vm351_vm2, %v3221_v43  ;;  %5852 = vmatmul.msk.f32.gmra.mxu3 %vm351_vm2, %v3662_v42 }
 0x5aa   :  { %v3224_v41 = vpop.f32.mrf.mxu0  ;;  %v3665_v31 = vpop.f32.mrf.mxu2 }
 0x5ab   :  { %5780 = vmatmul.msk.f32.gmra.mxu1 %vm351_vm2, %v3224_v41  ;;  %5853 = vmatmul.msk.f32.gmra.mxu3 %vm351_vm2, %v3665_v31 }
 0x5b2   :  { %v3227_v14 = vpop.f32.mrf.mxu0  ;;  %v3668_v27 = vpop.f32.mrf.mxu2 }
 0x5b3   :  { %5781 = vmatmul.msk.f32.gmra.mxu1 %vm351_vm2, %v3227_v14  ;;  %5854 = vmatmul.msk.f32.gmra.mxu3 %vm351_vm2, %v3668_v27 }
 0x5ba   :  { %v3230_v23 = vpop.f32.mrf.mxu0  ;;  %v3671_v11 = vpop.f32.mrf.mxu2 }
 0x5bb   :  { %5782 = vmatmul.msk.f32.gmra.mxu1 %vm351_vm2, %v3230_v23  ;;  %5855 = vmatmul.msk.f32.gmra.mxu3 %vm351_vm2, %v3671_v11 }
 0x5c2   :  { %v3233_v6 = vpop.f32.mrf.mxu0  ;;  %v3674_v53 = vpop.f32.mrf.mxu2 }
 0x5c3   :  { %5783 = vmatmul.msk.f32.gmra.mxu1 %vm351_vm2, %v3233_v6  ;;  %5856 = vmatmul.msk.f32.gmra.mxu3 %vm351_vm2, %v3674_v53 }
 0x5c8   :  { %v2981_v55 = vpop.f32.mrf.mxu1 }
 0x5ca   :  { %v3510_v47 = vpop.f32.mrf.mxu0  ;;  %v3677_v25 = vpop.f32.mrf.mxu2 }
 0x5cb   :  { %5826 = vmatmul.msk.f32.vlgmr.msra.gmra.mxu1 %vm351_vm2, %v3510_v47  ;;  %5857 = vmatmul.msk.f32.gmra.mxu3 %vm351_vm2, %v3677_v25 }
 0x5d0   :  { %v7947_v51 = vpop.f32.mrf.mxu1 }
 0x5d2   :  { %v3513_v45 = vpop.f32.mrf.mxu0  ;;  %v3680_v32 = vpop.f32.mrf.mxu2 }
 0x5d3   :  { %5827 = vmatmul.msk.f32.gmra.mxu1 %vm351_vm2, %v3513_v45  ;;  %5858 = vmatmul.msk.f32.gmra.mxu3 %vm351_vm2, %v3680_v32  ;;  %v2692_v45 = vadd.f32 %v7876_v60, %v7725_v13 }
 0x5d6   :  { %v7962_v10 = vpop.f32.mrf.mxu3 }
 0x5d8   :  { %v7953_v38 = vpop.f32.mrf.mxu1 }
 0x5da   :  { %v3516_v5 = vpop.f32.mrf.mxu0 }
 0x5db   :  { %5828 = vmatmul.msk.f32.gmra.mxu1 %vm351_vm2, %v3516_v5  ;;  %v2856_v5 = vadd.f32 %v7843_v57, %v2692_v45 }
 0x5dd   :  { %v3005_v32 = vadd.f32 %v2981_v55, %v2856_v5 }
 0x5de   :  { %v3428_v30 = vpop.f32.mrf.mxu3 }
 0x5e0   :  { %v7959_v58 = vpop.f32.mrf.mxu1 }
 0x5e2   :  { %v3519_v0 = vpop.f32.mrf.mxu0 }
 0x5e3   :  { %5829 = vmatmul.msk.f32.gmra.mxu1 %vm351_vm2, %v3519_v0 }
 0x5e6   :  { %v7967_v22 = vpop.f32.mrf.mxu3 }
 0x5e7   :  { %8637 = vst [vmem:[#allocation10_spill] sm:$0xff] %v7967_v22 }
 0x5e8   :  { %v2993_v1 = vpop.f32.mrf.mxu1 }
 0x5ea   :  { %v3522_v49 = vpop.f32.mrf.mxu0 }
 0x5eb   :  { %5830 = vmatmul.msk.f32.gmra.mxu1 %vm351_vm2, %v3522_v49  ;;  %v3154_v49 = vadd.f32 %v7919_v3, %v3005_v32  ;;  %v2710_v3 = vadd.f32 %v7931_v29, %v7794_v16  ;;  %v2713_v32 = vadd.f32 %v7937_v19, %v7805_v50  ;;  %v2695_v50 = vadd.f32 %v7889_v48, %v7735_v8 }
 0x5ed   :  { %v2863_v29 = vadd.f32 %v7912_v17, %v2713_v32 }
 0x5ee   :  { %v7970_v52 = vpop.f32.mrf.mxu3  ;;  %v8646_v32 = vld [vmem:[#allocation10_spill] sm:$0xff] }
 0x5ef   :  { %8638 = vst [vmem:[#allocation14_spill] sm:$0xff] %v7970_v52 }
 0x5f0   :  { %v2996_v37 = vpop.f32.mrf.mxu1 }
 0x5f2   :  { %v3525_v15 = vpop.f32.mrf.mxu0 }
 0x5f3   :  { %5831 = vmatmul.msk.f32.gmra.mxu1 %vm351_vm2, %v3525_v15 }
 0x5f6   :  { %v7973_v41 = vpop.f32.mrf.mxu3 }
 0x5f7   :  { %8639 = vst [vmem:[#allocation7_spill] sm:$0xff] %v7973_v41 }
 0x5f8   :  { %v2999_v26 = vpop.f32.mrf.mxu1 }
 0x5fa   :  { %v3528_v36 = vpop.f32.mrf.mxu0 }
 0x5fb   :  { %5832 = vmatmul.msk.f32.gmra.mxu1 %vm351_vm2, %v3528_v36 }
 0x5fe   :  { %v7977_v42 = vpop.f32.mrf.mxu3 }
 0x600   :  { %v3002_v43 = vpop.f32.mrf.mxu1 }
 0x602   :  { %v3531_v46 = vpop.f32.mrf.mxu0 }
 0x603   :  { %5833 = vmatmul.msk.f32.gmra.mxu1 %vm351_vm2, %v3531_v46 }
 0x606   :  { %v7981_v31 = vpop.f32.mrf.mxu3 }
 0x608   :  { %v3279_v4 = vpop.f32.mrf.mxu1 }
 0x609   :  { %v3303_v15 = vadd.f32 %v3279_v4, %v3154_v49  ;;  %v2704_v4 = vadd.f32 %v7910_v21, %v7769_v34  ;;  %v3012_v21 = vadd.f32 %v3002_v43, %v2863_v29 }
 0x60b   :  { %v3452_v46 = vadd.f32 %v3428_v30, %v3303_v15  ;;  %v2707_v30 = vadd.f32 %v7925_v62, %v7783_v20  ;;  %v2701_v15 = vadd.f32 %v7903_v24, %v7755_v18  ;;  %v2860_v16 = vadd.f32 %v7892_v35, %v2704_v4 }
 0x60d   :  { %v2859_v62 = vadd.f32 %v7878_v2, %v2701_v15  ;;  %v3009_v34 = vadd.f32 %v2993_v1, %v2860_v16 }
 0x60e   :  { %v3446_v27 = vpop.f32.mrf.mxu3 }
 0x60f   :  { %v3008_v35 = vadd.f32 %v7959_v58, %v2859_v62 }
 0x610   :  { %v7975_v28 = vpop.f32.mrf.mxu1 }
 0x611   :  { %8640 = vst [vmem:[#allocation9_spill] sm:$0xff] %v7975_v28  ;;  %v3157_v48 = vadd.f32 %v7940_v12, %v3008_v35  ;;  %v5868_v35 = vld [vmem:[%s8600_s9 + $0x8] sm:$0xff] }
 0x616   :  { %v7983_v47 = vpop.f32.mrf.mxu3 }
 0x617   :  { %8641 = vst [vmem:[#allocation13_spill] sm:$0xff] %v7983_v47 }
 0x618   :  { %v7979_v14 = vpop.f32.mrf.mxu1 }
 0x61e   :  { %v3726_v25 = vpop.f32.mrf.mxu3 }
 0x620   :  { %v3288_v23 = vpop.f32.mrf.mxu1 }
 0x621   :  { %v3306_v43 = vadd.f32 %v3288_v23, %v3157_v48 }
 0x626   :  { %v7989_v36 = vpop.f32.mrf.mxu3 }
 0x628   :  { %v3291_v6 = vpop.f32.mrf.mxu1 }
 0x62e   :  { %v7993_v28 = vpop.f32.mrf.mxu3 }
 0x630   :  { %v3294_v11 = vpop.f32.mrf.mxu1 }
 0x636   :  { %v7997_v60 = vpop.f32.mrf.mxu3 }
 0x638   :  { %v3297_v53 = vpop.f32.mrf.mxu1 }
 0x63e   :  { %v3738_v55 = vpop.f32.mrf.mxu3 }
 0x640   :  { %v3300_v0 = vpop.f32.mrf.mxu1 }
 0x646   :  { %v3741_v5 = vpop.f32.mrf.mxu3 }
 0x648   :  { %v3577_v22 = vpop.f32.mrf.mxu1 }
 0x649   :  { %v3601_v52 = vadd.f32 %v3577_v22, %v3452_v46  ;;  %v2862_v22 = vadd.f32 %v7906_v40, %v2710_v3  ;;  %v2698_v40 = vadd.f32 %v7897_v61, %v7745_v59  ;;  %v3158_v61 = vadd.f32 %v7944_v44, %v3009_v34  ;;  %v8643_v3 = vld [vmem:[#allocation9_spill] sm:$0xff] }
 0x64b   :  { %v7991_v41 = vadd.f32 %v3726_v25, %v3601_v52  ;;  %v2861_v25 = vadd.f32 %v7899_v7, %v2707_v30  ;;  %v3011_v49 = vadd.f32 %v2999_v26, %v2862_v22  ;;  %v2858_v18 = vadd.f32 %v7868_v63, %v2698_v40 }
 0x64c   :  { %v3307_v63 = vadd.f32 %v3291_v6, %v3158_v61  ;;  %v3780_v61 = vld [vmem:[%s8599_s8 + $0x10] sm:$0xff] }
 0x64d   :  { %v3010_v20 = vadd.f32 %v2996_v37, %v2861_v25  ;;  %v3160_v7 = vadd.f32 %v7956_v39, %v3011_v49  ;;  %v2857_v37 = vadd.f32 %v7856_v56, %v2695_v50  ;;  %v3007_v2 = vadd.f32 %v7953_v38, %v2858_v18 }
 0x64e   :  { %v3744_v19 = vpop.f32.mrf.mxu3  ;;  %v3161_v39 = vadd.f32 %v7962_v10, %v3012_v21  ;;  %v3456_v10 = vadd.f32 %v7977_v42, %v3307_v63 }
 0x64f   :  { %v3159_v24 = vadd.f32 %v7950_v33, %v3010_v20  ;;  %v3309_v17 = vadd.f32 %v3297_v53, %v3160_v7  ;;  %v3006_v8 = vadd.f32 %v7947_v51, %v2857_v37  ;;  %v3156_v33 = vadd.f32 %v7934_v9, %v3007_v2  ;;  %v5863_v37 = vld [vmem:[%s8599_s8 + $0x20] sm:$0xff]  ;;  %v5864_v2 = vld [vmem:[%s8599_s8 + $0x28] sm:$0xff] }
 0x650   :  { %v7995_v47 = vpop.f32.mrf.mxu1  ;;  %v3310_v58 = vadd.f32 %v3300_v0, %v3161_v39  ;;  %v8644_v0 = vld [vmem:[#allocation7_spill] sm:$0xff]  ;;  %v3817_v39 = vld [vmem:[%s8600_s9] sm:$0xff] }
 0x651   :  { %v3308_v1 = vadd.f32 %v3294_v11, %v3159_v24  ;;  %v3458_v26 = vadd.f32 %v3446_v27, %v3309_v17  ;;  %v3155_v38 = vadd.f32 %v7928_v54, %v3006_v8  ;;  %v3305_v44 = vadd.f32 %v7979_v14, %v3156_v33  ;;  %v8642_v11 = vld [vmem:[#allocation13_spill] sm:$0xff]  ;;  %v5885_v17 = vld [vmem:[%s8599_s8 + $0x48] sm:$0xff] }
 0x652   :  { %v3459_v46 = vadd.f32 %v8642_v11, %v3310_v58  ;;  %v3455_v30 = vadd.f32 %v8644_v0, %v3306_v43  ;;  %v6017_v54 = vld [vmem:[%s8598_s7] ss:$0 sm:$0xff]  ;;  %v5887_v8 = vld [vmem:[%s8599_s8 + $0x58] sm:$0xff] }
 0x653   :  { %v3457_v56 = vadd.f32 %v7981_v31, %v3308_v1  ;;  %v3304_v12 = vadd.f32 %v8643_v3, %v3155_v38  ;;  %v8645_v31 = vld [vmem:[#allocation14_spill] sm:$0xff]  ;;  %v5886_v1 = vld [vmem:[%s8599_s8 + $0x50] sm:$0xff]  ;;  %v5876_v38 = vld [vmem:[%s8599_s8 + $0x38] sm:$0xff] }
 0x654   :  { %v3454_v4 = vadd.f32 %v8645_v31, %v3305_v44  ;;  %v3778_v24 = vld [vmem:[%s8599_s8] sm:$0xff]  ;;  %v5897_v3 = vld [vmem:[%s8599_s8 + $0x70] sm:$0xff]  ;;  %v5936_v31 = vld [vmem:[%s8599_s8 + $0xc8] sm:$0xff] }
 0x655   :  { %v5906_v44 = vld [vmem:[%s8599_s8 + $0x80] sm:$0xff] }
 0x656   :  { %v3747_v27 = vpop.f32.mrf.mxu3  ;;  %v5877_v11 = vld [vmem:[%s8599_s8 + $0x40] sm:$0xff] }
 0x657   :  { %v5917_v0 = vld [vmem:[%s8599_s8 + $0xa0] sm:$0xff] }
 0x658   :  { %v3583_v13 = vpop.f32.mrf.mxu1 }
 0x659   :  { %v3603_v49 = vadd.f32 %v3583_v13, %v3454_v4  ;;  %v5881_v4 = vld [vmem:[%s8600_s9 + $0x10] sm:$0xff] }
 0x65b   :  { %v3752_v34 = vadd.f32 %v7993_v28, %v3603_v49 }
 0x65d   :  { %v3764_v28 = vadd.f32 %v6017_v54, %v3752_v34 }
 0x65f   :  { %v8068_v50 = vmax.f32 %v3764_v28, 0.0 }
 0x660   :  { %v3586_v57 = vpop.f32.mrf.mxu1 }
 0x661   :  { %v3604_v14 = vadd.f32 %v3586_v57, %v3455_v30  ;;  %v5925_v30 = vld [vmem:[%s8599_s8 + $0xa8] sm:$0xff] }
 0x668   :  { %v3589_v45 = vpop.f32.mrf.mxu1 }
 0x669   :  { %v3605_v9 = vadd.f32 %v3589_v45, %v3456_v10  ;;  %v3753_v45 = vadd.f32 %v7997_v60, %v3604_v14  ;;  %v5907_v10 = vld [vmem:[%s8599_s8 + $0x88] sm:$0xff] }
 0x66b   :  { %v3754_v15 = vadd.f32 %v3738_v55, %v3605_v9  ;;  %v3765_v57 = vadd.f32 %v6017_v54, %v3753_v45  ;;  %v5926_v9 = vld [vmem:[%s8599_s8 + $0xb0] sm:$0xff] }
 0x66d   :  { %v3766_v7 = vadd.f32 %v6017_v54, %v3754_v15 }
 0x66f   :  { %v8057_v60 = vmax.f32 %v3766_v7, 0.0  ;;  %v5901_v7 = vld [vmem:[%s8600_s9 + $0x20] sm:$0xff] }
 0x670   :  { %v3592_v52 = vpop.f32.mrf.mxu1 }
 0x671   :  { %v3606_v51 = vadd.f32 %v3592_v52, %v3457_v56  ;;  %v3453_v52 = vadd.f32 %v8646_v32, %v3304_v12  ;;  %v5875_v56 = vld [vmem:[%s8599_s8 + $0x30] sm:$0xff] }
 0x672   :  { %v5915_v12 = vld [vmem:[%s8599_s8 + $0x90] sm:$0xff] }
 0x673   :  { %v3755_v42 = vadd.f32 %v3741_v5, %v3606_v51  ;;  %v3602_v20 = vadd.f32 %v7995_v47, %v3453_v52  ;;  %v3762_v5 = vadd.f32 %v6017_v54, %v7991_v41  ;;  %v5862_v41 = vld [vmem:[%s8599_s8 + $0x18] sm:$0xff]  ;;  %v5896_v51 = vld [vmem:[%s8599_s8 + $0x68] sm:$0xff] }
 0x675   :  { %v3767_v40 = vadd.f32 %v6017_v54, %v3755_v42  ;;  %v3751_v13 = vadd.f32 %v7989_v36, %v3602_v20  ;;  %v8062_v36 = vmax.f32 %v3765_v57, 0.0  ;;  %v8078_v18 = vmax.f32 %v3762_v5, 0.0  ;;  %v5937_v42 = vld [vmem:[%s8599_s8 + $0xd0] sm:$0xff] }
 0x677   :  { %v8052_v47 = vmax.f32 %v3767_v40, 0.0  ;;  %v3763_v55 = vadd.f32 %v6017_v54, %v3751_v13  ;;  %v5911_v40 = vld [vmem:[%s8600_s9 + $0x28] sm:$0xff] }
 0x678   :  { %v3595_v59 = vpop.f32.mrf.mxu1 }
 0x679   :  { %v3607_v53 = vadd.f32 %v3595_v59, %v3458_v26  ;;  %v3779_v59 = vld [vmem:[%s8599_s8 + $0x8] sm:$0xff] }
 0x67b   :  { %v3756_v23 = vadd.f32 %v3744_v19, %v3607_v53  ;;  %v8073_v19 = vmax.f32 %v3763_v55, 0.0  ;;  %v5905_v53 = vld [vmem:[%s8599_s8 + $0x78] sm:$0xff] }
 0x67d   :  { %v3768_v16 = vadd.f32 %v6017_v54, %v3756_v23  ;;  %v5935_v23 = vld [vmem:[%s8599_s8 + $0xc0] sm:$0xff] }
 0x67f   :  { %v8046_v21 = vmax.f32 %v3768_v16, 0.0 }
 0x680   :  { %v3598_v6 = vpop.f32.mrf.mxu1 }
 0x681   :  { %v3608_v22 = vadd.f32 %v3598_v6, %v3459_v46  ;;  %v5895_v46 = vld [vmem:[%s8599_s8 + $0x60] sm:$0xff]  ;;  %v5927_v6 = vld [vmem:[%s8599_s8 + $0xb8] sm:$0xff] }
 0x683   :  { %v3757_v25 = vadd.f32 %v3747_v27, %v3608_v22  ;;  %v5916_v27 = vld [vmem:[%s8599_s8 + $0x98] sm:$0xff] }
 0x685   :  { %v3769_v29 = vadd.f32 %v6017_v54, %v3757_v25  ;;  %v5891_v25 = vld [vmem:[%s8600_s9 + $0x18] sm:$0xff] }
 0x686   :  { %6002 = vmatpush.msrb.mxu3 %v5891_v25 }
 0x687   :  { %v8043_v62 = vmax.f32 %v3769_v29, 0.0 }
 0x688   :  { %4231 = vmatpush.msra.mxu3 %v5911_v40 }
 0x689   :  { %3799 = vmatpush.msrb.mxu0 %v8043_v62  ;;  %3839 = vmatpush.msrb.mxu1 %v8043_v62 }
 0x68a   :  { %4029 = vmatpush.msrb.mxu2 %v8043_v62 }
 0x68b   :  { %3800 = vmatpush.msrb.mxu0 %v8046_v21  ;;  %3840 = vmatpush.msrb.mxu1 %v8046_v21 }
 0x68c   :  { %4030 = vmatpush.msrb.mxu2 %v8046_v21 }
 0x68d   :  { %3801 = vmatpush.msrb.mxu0 %v8052_v47  ;;  %3841 = vmatpush.msrb.mxu1 %v8052_v47 }
 0x68e   :  { %4031 = vmatpush.msrb.mxu2 %v8052_v47 }
 0x68f   :  { %3802 = vmatpush.msrb.mxu0 %v8057_v60  ;;  %3842 = vmatpush.msrb.mxu1 %v8057_v60 }
 0x690   :  { %4032 = vmatpush.msrb.mxu2 %v8057_v60 }
 0x691   :  { %3803 = vmatpush.msrb.mxu0 %v8062_v36  ;;  %3843 = vmatpush.msrb.mxu1 %v8062_v36 }
 0x692   :  { %4033 = vmatpush.msrb.mxu2 %v8062_v36 }
 0x693   :  { %3804 = vmatpush.msrb.mxu0 %v8068_v50  ;;  %3844 = vmatpush.msrb.mxu1 %v8068_v50 }
 0x694   :  { %4034 = vmatpush.msrb.mxu2 %v8068_v50 }
 0x695   :  { %3805 = vmatpush.msrb.mxu0 %v8073_v19  ;;  %3845 = vmatpush.msrb.mxu1 %v8073_v19 }
 0x696   :  { %4035 = vmatpush.msrb.mxu2 %v8073_v19 }
 0x697   :  { %3806 = vmatpush.msrb.mxu0 %v8078_v18  ;;  %3846 = vmatpush.msrb.mxu1 %v8078_v18 }
 0x698   :  { %4036 = vmatpush.msrb.mxu2 %v8078_v18  ;;  %5865 = vmatmul.msk.f32.vlgmr.msrb.gmra.mxu1 %vm3781_vm4, %v5862_v41 }
 0x699   :  { %3883 = vmatpush.msra.mxu0 %v5868_v35  ;;  %5888 = vmatmul.msk.f32.vlgmr.msrb.gmra.mxu2 %vm3781_vm4, %v5885_v17 }
 0x69a   :  { %4187 = vmatpush.msra.mxu2 %v8043_v62  ;;  %5859 = vmatmul.msk.f32.vlgmr.msrb.gmra.mxu0 %vm3781_vm4, %v3778_v24 }
 0x69b   :  { %3950 = vmatpush.msrb.mxu0 %v8043_v62  ;;  %3918 = vmatpush.msra.mxu1 %v3817_v39 }
 0x69c   :  { %4188 = vmatpush.msra.mxu2 %v8046_v21 }
 0x69d   :  { %3951 = vmatpush.msrb.mxu0 %v8046_v21  ;;  %3994 = vmatpush.msrb.mxu1 %v5881_v4 }
 0x69e   :  { %4189 = vmatpush.msra.mxu2 %v8052_v47 }
 0x69f   :  { %3952 = vmatpush.msrb.mxu0 %v8052_v47 }
 0x6a0   :  { %4190 = vmatpush.msra.mxu2 %v8057_v60  ;;  %5866 = vmatmul.msk.f32.gmra.mxu1 %vm3781_vm4, %v5863_v37 }
 0x6a1   :  { %3953 = vmatpush.msrb.mxu0 %v8057_v60  ;;  %5889 = vmatmul.msk.f32.gmra.mxu2 %vm3781_vm4, %v5886_v1 }
 0x6a2   :  { %4191 = vmatpush.msra.mxu2 %v8062_v36  ;;  %5860 = vmatmul.msk.f32.gmra.mxu0 %vm3781_vm4, %v3779_v59 }
 0x6a3   :  { %3954 = vmatpush.msrb.mxu0 %v8062_v36 }
 0x6a4   :  { %4192 = vmatpush.msra.mxu2 %v8068_v50 }
 0x6a5   :  { %3955 = vmatpush.msrb.mxu0 %v8068_v50 }
 0x6a6   :  { %4193 = vmatpush.msra.mxu2 %v8073_v19 }
 0x6a7   :  { %3956 = vmatpush.msrb.mxu0 %v8073_v19 }
 0x6a8   :  { %4194 = vmatpush.msra.mxu2 %v8078_v18  ;;  %5867 = vmatmul.msk.f32.gmra.mxu1 %vm3781_vm4, %v5864_v2 }
 0x6a9   :  { %3957 = vmatpush.msrb.mxu0 %v8078_v18  ;;  %5890 = vmatmul.msk.f32.gmra.mxu2 %vm3781_vm4, %v5887_v8 }
 0x6aa   :  { %6003 = vmatpush.msrb.mxu2 %v8043_v62  ;;  %5861 = vmatmul.msk.f32.gmra.mxu0 %vm3781_vm4, %v3780_v61 }
 0x6ac   :  { %6004 = vmatpush.msrb.mxu2 %v8046_v21 }
 0x6ae   :  { %6005 = vmatpush.msrb.mxu2 %v8052_v47 }
 0x6b0   :  { %6006 = vmatpush.msrb.mxu2 %v8057_v60 }
 0x6b1   :  { %5908 = vmatmul.msk.f32.vlgmr.msra.gmra.mxu2 %vm3781_vm4, %v5905_v53 }
 0x6b2   :  { %6007 = vmatpush.msrb.mxu2 %v8062_v36 }
 0x6b4   :  { %6008 = vmatpush.msrb.mxu2 %v8068_v50 }
 0x6b6   :  { %6009 = vmatpush.msrb.mxu2 %v8073_v19 }
 0x6b8   :  { %6010 = vmatpush.msrb.mxu2 %v8078_v18 }
 0x6b9   :  { %5909 = vmatmul.msk.f32.gmra.mxu2 %vm3781_vm4, %v5906_v44 }
 0x6c1   :  { %5910 = vmatmul.msk.f32.gmra.mxu2 %vm3781_vm4, %v5907_v10 }
 0x6c9   :  { %5930 = vmatmul.msk.f32.vlgmr.msrb.gmra.mxu2 %vm3781_vm4, %v5927_v6 }
 0x715   :  { %v3848_v48 = vpop.f32.mrf.mxu1 }
 0x716   :  { %5869 = vmatmul.msk.f32.vlgmr.msra.gmra.mxu0 %vm351_vm2, %v3848_v48 }
 0x717   :  { %4108 = vmatpush.msra.mxu0 %v8043_v62  ;;  %v3808_v63 = vpop.f32.mrf.mxu0 }
 0x718   :  { %5872 = vmatmul.msk.f32.vlgmr.msra.gmra.mxu1 %vm351_vm2, %v3808_v63 }
 0x719   :  { %4109 = vmatpush.msra.mxu0 %v8046_v21  ;;  %4073 = vmatpush.msra.mxu1 %v5891_v25 }
 0x71b   :  { %4110 = vmatpush.msra.mxu0 %v8052_v47 }
 0x71c   :  { %v4038_v22 = vpop.f32.mrf.mxu2 }
 0x71d   :  { %4111 = vmatpush.msra.mxu0 %v8057_v60  ;;  %v3851_v26 = vpop.f32.mrf.mxu1 }
 0x71e   :  { %5870 = vmatmul.msk.f32.gmra.mxu0 %vm351_vm2, %v3851_v26 }
 0x71f   :  { %4112 = vmatpush.msra.mxu0 %v8062_v36  ;;  %v3811_v58 = vpop.f32.mrf.mxu0 }
 0x720   :  { %5873 = vmatmul.msk.f32.gmra.mxu1 %vm351_vm2, %v3811_v58 }
 0x721   :  { %4113 = vmatpush.msra.mxu0 %v8068_v50 }
 0x723   :  { %4114 = vmatpush.msra.mxu0 %v8073_v19 }
 0x724   :  { %v4041_v54 = vpop.f32.mrf.mxu2 }
 0x725   :  { %4115 = vmatpush.msra.mxu0 %v8078_v18  ;;  %v3854_v33 = vpop.f32.mrf.mxu1 }
 0x726   :  { %5871 = vmatmul.msk.f32.gmra.mxu0 %vm351_vm2, %v3854_v33 }
 0x727   :  { %v3814_v43 = vpop.f32.mrf.mxu0 }
 0x728   :  { %5874 = vmatmul.msk.f32.gmra.mxu1 %vm351_vm2, %v3814_v43 }
 0x72c   :  { %v4044_v49 = vpop.f32.mrf.mxu2 }
 0x72d   :  { %5894 = vmatmul.msk.f32.vlgmr.msrb.gmra.mxu3 %vm351_vm2, %v4044_v49 }
 0x72e   :  { %5878 = vmatmul.msk.f32.vlgmr.msrb.gmra.mxu0 %vm3781_vm4, %v5875_v56 }
 0x72f   :  { %4266 = vmatpush.msrb.mxu0 %v8043_v62 }
 0x731   :  { %4267 = vmatpush.msrb.mxu0 %v8046_v21 }
 0x733   :  { %4268 = vmatpush.msrb.mxu0 %v8052_v47 }
 0x735   :  { %4269 = vmatpush.msrb.mxu0 %v8057_v60 }
 0x736   :  { %5879 = vmatmul.msk.f32.gmra.mxu0 %vm3781_vm4, %v5876_v38 }
 0x737   :  { %4270 = vmatpush.msrb.mxu0 %v8062_v36 }
 0x739   :  { %4271 = vmatpush.msrb.mxu0 %v8068_v50 }
 0x73b   :  { %4272 = vmatpush.msrb.mxu0 %v8073_v19 }
 0x73d   :  { %4273 = vmatpush.msrb.mxu0 %v8078_v18 }
 0x73e   :  { %5880 = vmatmul.msk.f32.gmra.mxu0 %vm3781_vm4, %v5877_v11 }
 0x746   :  { %5898 = vmatmul.msk.f32.vlgmr.msra.gmra.mxu0 %vm3781_vm4, %v5895_v46 }
 0x747   :  { %4345 = vmatpush.msra.mxu0 %v8043_v62 }
 0x749   :  { %4346 = vmatpush.msra.mxu0 %v8046_v21 }
 0x74b   :  { %4347 = vmatpush.msra.mxu0 %v8052_v47 }
 0x74d   :  { %4348 = vmatpush.msra.mxu0 %v8057_v60 }
 0x74e   :  { %5899 = vmatmul.msk.f32.gmra.mxu0 %vm3781_vm4, %v5896_v51 }
 0x74f   :  { %4349 = vmatpush.msra.mxu0 %v8062_v36 }
 0x751   :  { %4350 = vmatpush.msra.mxu0 %v8068_v50 }
 0x753   :  { %4351 = vmatpush.msra.mxu0 %v8073_v19 }
 0x755   :  { %4352 = vmatpush.msra.mxu0 %v8078_v18 }
 0x756   :  { %5900 = vmatmul.msk.f32.gmra.mxu0 %vm3781_vm4, %v5897_v3 }
 0x75e   :  { %5918 = vmatmul.msk.f32.vlgmr.msrb.gmra.mxu0 %vm3781_vm4, %v5915_v12 }
 0x75f   :  { %4424 = vmatpush.msrb.mxu0 %v8043_v62  ;;  %v4196_v62 = vpop.f32.mrf.mxu2 }
 0x760   :  { %5912 = vmatmul.msk.f32.vlgmr.msra.gmra.mxu3 %vm351_vm2, %v4196_v62  ;;  %v6018_v62 = vld [vmem:[%s8601_s10] ss:$0 sm:$0xff] }
 0x761   :  { %4425 = vmatpush.msrb.mxu0 %v8046_v21 }
 0x763   :  { %4426 = vmatpush.msrb.mxu0 %v8052_v47 }
 0x765   :  { %4427 = vmatpush.msrb.mxu0 %v8057_v60  ;;  %v5921_v60 = vld [vmem:[%s8600_s9 + $0x30] sm:$0xff] }
 0x766   :  { %5919 = vmatmul.msk.f32.gmra.mxu0 %vm3781_vm4, %v5916_v27 }
 0x767   :  { %4428 = vmatpush.msrb.mxu0 %v8062_v36  ;;  %v4199_v21 = vpop.f32.mrf.mxu2  ;;  %v5931_v36 = vld [vmem:[%s8600_s9 + $0x38] sm:$0xff] }
 0x768   :  { %5913 = vmatmul.msk.f32.gmra.mxu3 %vm351_vm2, %v4199_v21 }
 0x769   :  { %4429 = vmatpush.msrb.mxu0 %v8068_v50  ;;  %4389 = vmatpush.msrb.mxu3 %v5931_v36  ;;  %v5957_v36 = vld [vmem:[%s8602_s11 + $0x6] sm:$0x3] }
 0x76b   :  { %4430 = vmatpush.msrb.mxu0 %v8073_v19  ;;  %v5941_v19 = vld [vmem:[%s8600_s9 + $0x40] sm:$0xff] }
 0x76d   :  { %4431 = vmatpush.msrb.mxu0 %v8078_v18 }
 0x76e   :  { %5920 = vmatmul.msk.f32.gmra.mxu0 %vm3781_vm4, %v5917_v0 }
 0x76f   :  { %v4202_v57 = vpop.f32.mrf.mxu2 }
 0x770   :  { %5914 = vmatmul.msk.f32.gmra.mxu3 %vm351_vm2, %v4202_v57 }
 0x776   :  { %5928 = vmatmul.msk.f32.vlgmr.msra.gmra.mxu0 %vm3781_vm4, %v5925_v30 }
 0x777   :  { %v4360_v24 = vpop.f32.mrf.mxu2 }
 0x77e   :  { %5929 = vmatmul.msk.f32.gmra.mxu0 %vm3781_vm4, %v5926_v9 }
 0x786   :  { %5938 = vmatmul.msk.f32.vlgmr.msrb.gmra.mxu0 %vm3781_vm4, %v5935_v23 }
 0x78e   :  { %5939 = vmatmul.msk.f32.gmra.mxu0 %vm3781_vm4, %v5936_v31 }
 0x793   :  { %v3885_v14 = vpop.f32.mrf.mxu0 }
 0x795   :  { %v3920_v32 = vpop.f32.mrf.mxu1 }
 0x796   :  { %5940 = vmatmul.msk.f32.gmra.mxu0 %vm3781_vm4, %v5937_v42  ;;  %v3921_v52 = vadd.f32 %v3920_v32, %v3885_v14 }
 0x79b   :  { %v3888_v15 = vpop.f32.mrf.mxu0 }
 0x79d   :  { %v3923_v16 = vpop.f32.mrf.mxu1 }
 0x79e   :  { %v3924_v29 = vadd.f32 %v3923_v16, %v3888_v15 }
 0x7a3   :  { %v3891_v20 = vpop.f32.mrf.mxu0 }
 0x7a5   :  { %v3926_v2 = vpop.f32.mrf.mxu1 }
 0x7a6   :  { %v3927_v48 = vadd.f32 %v3926_v2, %v3891_v20  ;;  %v5962_v2 = vld [vmem:[%s8602_s11 + $0x8] sm:$0x3] }
 0x7ab   :  { %v3959_v45 = vpop.f32.mrf.mxu0 }
 0x7ac   :  { %5882 = vmatmul.msk.f32.vlgmr.msrb.gmra.mxu1 %vm351_vm2, %v3959_v45 }
 0x7ad   :  { %4152 = vmatpush.msrb.mxu1 %v5901_v7 }
 0x7b0   :  { %v4081_v38 = vpop.f32.mrf.mxu3 }
 0x7b3   :  { %v3962_v34 = vpop.f32.mrf.mxu0 }
 0x7b4   :  { %5883 = vmatmul.msk.f32.gmra.mxu1 %vm351_vm2, %v3962_v34 }
 0x7bb   :  { %v3965_v13 = vpop.f32.mrf.mxu0 }
 0x7bc   :  { %5884 = vmatmul.msk.f32.gmra.mxu1 %vm351_vm2, %v3965_v13 }
 0x7c3   :  { %v4117_v47 = vpop.f32.mrf.mxu0 }
 0x7c4   :  { %5892 = vmatmul.msk.f32.vlgmr.msra.gmra.mxu1 %vm351_vm2, %v4038_v22 }
 0x7c5   :  { %4310 = vmatpush.msra.mxu1 %v5921_v60  ;;  %v5946_v60 = vld [vmem:[%s8602_s11 + $0x2] sm:$0x3] }
 0x7cb   :  { %v4120_v28 = vpop.f32.mrf.mxu0 }
 0x7cc   :  { %5893 = vmatmul.msk.f32.gmra.mxu1 %vm351_vm2, %v4041_v54 }
 0x7d3   :  { %v4123_v55 = vpop.f32.mrf.mxu0 }
 0x7d4   :  { %5902 = vmatmul.msk.f32.vlgmr.msrb.gmra.mxu1 %vm351_vm2, %v4117_v47 }
 0x7d5   :  { %4468 = vmatpush.msrb.mxu1 %v5941_v19  ;;  %v5967_v19 = vld [vmem:[%s8602_s11 + $0xa] sm:$0x3] }
 0x7db   :  { %v4275_v5 = vpop.f32.mrf.mxu0 }
 0x7dc   :  { %5903 = vmatmul.msk.f32.gmra.mxu1 %vm351_vm2, %v4120_v28 }
 0x7e3   :  { %v4278_v50 = vpop.f32.mrf.mxu0  ;;  %v4233_v10 = vpop.f32.mrf.mxu3 }
 0x7e4   :  { %5904 = vmatmul.msk.f32.gmra.mxu1 %vm351_vm2, %v4123_v55  ;;  %v5949_v55 = vld [vmem:[%s8603_s12 + $0x18] sm:$0xff] }
 0x7eb   :  { %v4281_v18 = vpop.f32.mrf.mxu0  ;;  %v4236_v46 = vpop.f32.mrf.mxu3 }
 0x7ec   :  { %5922 = vmatmul.msk.f32.vlgmr.msra.gmra.mxu1 %vm351_vm2, %v4275_v5  ;;  %v4492_v5 = vld [vmem:[%s8602_s11] sm:$0x3] }
 0x7f3   :  { %v4354_v41 = vpop.f32.mrf.mxu0  ;;  %v4239_v3 = vpop.f32.mrf.mxu3 }
 0x7f4   :  { %5923 = vmatmul.msk.f32.gmra.mxu1 %vm351_vm2, %v4278_v50  ;;  %5932 = vmatmul.msk.f32.vlgmr.msrb.gmra.mxu3 %vm351_vm2, %v4354_v41  ;;  %v5948_v50 = vld [vmem:[%s8603_s12 + $0x10] sm:$0xff]  ;;  %v4518_v41 = vld [vmem:[%s8603_s12 + $0x8] sm:$0xff] }
 0x7fb   :  { %v4357_v35 = vpop.f32.mrf.mxu0 }
 0x7fc   :  { %5924 = vmatmul.msk.f32.gmra.mxu1 %vm351_vm2, %v4281_v18  ;;  %5933 = vmatmul.msk.f32.gmra.mxu3 %vm351_vm2, %v4357_v35  ;;  %v5977_v18 = vld [vmem:[%s8602_s11 + $0xe] sm:$0x3]  ;;  %v4517_v35 = vld [vmem:[%s8603_s12] sm:$0xff] }
 0x803   :  { %v4433_v17 = vpop.f32.mrf.mxu0 }
 0x804   :  { %5934 = vmatmul.msk.f32.gmra.mxu3 %vm351_vm2, %v4360_v24  ;;  %5942 = vmatmul.msk.f32.vlgmr.msrb.gmra.mxu1 %vm351_vm2, %v4433_v17 }
 0x80b   :  { %v4436_v37 = vpop.f32.mrf.mxu0 }
 0x80c   :  { %5943 = vmatmul.msk.f32.gmra.mxu1 %vm351_vm2, %v4436_v37  ;;  %v5952_v37 = vld [vmem:[%s8602_s11 + $0x4] sm:$0x3] }
 0x813   :  { %v4439_v59 = vpop.f32.mrf.mxu0 }
 0x814   :  { %5944 = vmatmul.msk.f32.gmra.mxu1 %vm351_vm2, %v4439_v59  ;;  %v5987_v59 = vld [vmem:[%s8602_s11 + $0x12] sm:$0x3] }
 0x829   :  { %v3996_v61 = vpop.f32.mrf.mxu1 }
 0x82a   :  { %v4005_v39 = vadd.f32 %v3996_v61, %v3921_v52  ;;  %v5997_v61 = vld [vmem:[%s8602_s11 + $0x16] sm:$0x3] }
 0x831   :  { %v3999_v1 = vpop.f32.mrf.mxu1 }
 0x832   :  { %v4006_v8 = vadd.f32 %v3999_v1, %v3924_v29  ;;  %v5982_v1 = vld [vmem:[%s8602_s11 + $0x10] sm:$0x3] }
 0x839   :  { %v4002_v63 = vpop.f32.mrf.mxu1 }
 0x83a   :  { %v4007_v26 = vadd.f32 %v4002_v63, %v3927_v48  ;;  %v5955_v48 = vld [vmem:[%s8603_s12 + $0x28] sm:$0xff]  ;;  %v5954_v63 = vld [vmem:[%s8603_s12 + $0x20] sm:$0xff] }
 0x83c   :  { %v4086_v9 = vadd.f32 %v4081_v38, %v4007_v26  ;;  %v5960_v26 = vld [vmem:[%s8603_s12 + $0x38] sm:$0xff] }
 0x83d   :  { %4691 = vmatpush.msra.mxu1 %v5960_v26 }
 0x841   :  { %v4075_v58 = vpop.f32.mrf.mxu1 }
 0x842   :  { %v4084_v33 = vadd.f32 %v4075_v58, %v4005_v39  ;;  %v5972_v39 = vld [vmem:[%s8602_s11 + $0xc] sm:$0x3] }
 0x843   :  { %v5965_v58 = vld [vmem:[%s8603_s12 + $0x48] sm:$0xff] }
 0x849   :  { %v4078_v43 = vpop.f32.mrf.mxu1 }
 0x84a   :  { %v4085_v56 = vadd.f32 %v4078_v43, %v4006_v8  ;;  %v5992_v8 = vld [vmem:[%s8602_s11 + $0x14] sm:$0x3] }
 0x84b   :  { %v5959_v43 = vld [vmem:[%s8603_s12 + $0x30] sm:$0xff] }
 0x84c   :  { %4692 = vmatpush.msra.mxu1 %v5959_v43 }
 0x851   :  { %v4154_v53 = vpop.f32.mrf.mxu1 }
 0x852   :  { %v4163_v22 = vadd.f32 %v4154_v53, %v4084_v33  ;;  %v5970_v53 = vld [vmem:[%s8603_s12 + $0x58] sm:$0xff] }
 0x853   :  { %4795 = vmatpush.msrb.mxu1 %v5970_v53 }
 0x854   :  { %v4242_v14 = vadd.f32 %v4233_v10, %v4163_v22  ;;  %v5980_v10 = vld [vmem:[%s8603_s12 + $0x78] sm:$0xff] }
 0x859   :  { %v4157_v44 = vpop.f32.mrf.mxu1 }
 0x85a   :  { %v4164_v23 = vadd.f32 %v4157_v44, %v4085_v56  ;;  %v5964_v56 = vld [vmem:[%s8603_s12 + $0x40] sm:$0xff]  ;;  %v5969_v44 = vld [vmem:[%s8603_s12 + $0x50] sm:$0xff] }
 0x85b   :  { %4796 = vmatpush.msrb.mxu1 %v5969_v44 }
 0x85c   :  { %v4243_v54 = vadd.f32 %v4236_v46, %v4164_v23  ;;  %v5979_v46 = vld [vmem:[%s8603_s12 + $0x70] sm:$0xff] }
 0x85d   :  { %v5999_v23 = vld [vmem:[%s8603_s12 + $0xb0] sm:$0xff] }
 0x861   :  { %v4160_v11 = vpop.f32.mrf.mxu1 }
 0x862   :  { %v4165_v31 = vadd.f32 %v4160_v11, %v4086_v9  ;;  %v6000_v9 = vld [vmem:[%s8603_s12 + $0xb8] sm:$0xff] }
 0x864   :  { %v4244_v42 = vadd.f32 %v4239_v3, %v4165_v31  ;;  %v5990_v3 = vld [vmem:[%s8603_s12 + $0x98] sm:$0xff]  ;;  %v5985_v31 = vld [vmem:[%s8603_s12 + $0x88] sm:$0xff] }
 0x869   :  { %v4312_v51 = vpop.f32.mrf.mxu1 }
 0x86a   :  { %v4321_v52 = vadd.f32 %v4312_v51, %v4242_v14  ;;  %v5995_v14 = vld [vmem:[%s8603_s12 + $0xa8] sm:$0xff] }
 0x871   :  { %v4315_v12 = vpop.f32.mrf.mxu1 }
 0x872   :  { %v4322_v25 = vadd.f32 %v4315_v12, %v4243_v54  ;;  %v5989_v12 = vld [vmem:[%s8603_s12 + $0x90] sm:$0xff]  ;;  %v5984_v54 = vld [vmem:[%s8603_s12 + $0x80] sm:$0xff] }
 0x877   :  { %v4391_v6 = vpop.f32.mrf.mxu3 }
 0x878   :  { %v4400_v16 = vadd.f32 %v4391_v6, %v4321_v52 }
 0x879   :  { %v4318_v27 = vpop.f32.mrf.mxu1 }
 0x87a   :  { %v4323_v49 = vadd.f32 %v4318_v27, %v4244_v42  ;;  %v5975_v27 = vld [vmem:[%s8603_s12 + $0x68] sm:$0xff] }
 0x87f   :  { %v4394_v30 = vpop.f32.mrf.mxu3 }
 0x880   :  { %v4401_v15 = vadd.f32 %v4394_v30, %v4322_v25  ;;  %v5974_v30 = vld [vmem:[%s8603_s12 + $0x60] sm:$0xff] }
 0x881   :  { %v4470_v0 = vpop.f32.mrf.mxu1  ;;  %v5994_v25 = vld [vmem:[%s8603_s12 + $0xa0] sm:$0xff] }
 0x882   :  { %v4479_v40 = vadd.f32 %v4470_v0, %v4400_v16  ;;  %v5134_v16 = vld [vmem:[%s8605_s14 + $0x70] sm:$0xff] }
 0x884   :  { %v4486_v13 = vadd.f32 %v6018_v62, %v4479_v40  ;;  %v5132_v40 = vld [vmem:[%s8605_s14 + $0x60] sm:$0xff] }
 0x886   :  { %v8314_v28 = vmax.f32 %v4486_v13, 0.0  ;;  %v5170_v13 = vld [vmem:[%s8607_s16 + $0x50] sm:$0xff] }
 0x887   :  { %v4397_v32 = vpop.f32.mrf.mxu3 }
 0x888   :  { %v4402_v29 = vadd.f32 %v4397_v32, %v4323_v49  ;;  %v5135_v49 = vld [vmem:[%s8605_s14 + $0x78] sm:$0xff] }
 0x889   :  { %v4473_v4 = vpop.f32.mrf.mxu1 }
 0x88a   :  { %v4480_v20 = vadd.f32 %v4473_v4, %v4401_v15  ;;  %v5175_v15 = vld [vmem:[%s8607_s16 + $0x78] sm:$0xff] }
 0x88c   :  { %v4487_v7 = vadd.f32 %v6018_v62, %v4480_v20  ;;  %v5133_v20 = vld [vmem:[%s8605_s14 + $0x68] sm:$0xff] }
 0x88e   :  { %v8309_v47 = vmax.f32 %v4487_v7, 0.0  ;;  %v5171_v7 = vld [vmem:[%s8607_s16 + $0x58] sm:$0xff] }
 0x891   :  { %v4476_v45 = vpop.f32.mrf.mxu1 }
 0x892   :  { %v4481_v34 = vadd.f32 %v4476_v45, %v4402_v29  ;;  %v5174_v29 = vld [vmem:[%s8607_s16 + $0x70] sm:$0xff]  ;;  %v5173_v45 = vld [vmem:[%s8607_s16 + $0x68] sm:$0xff] }
 0x894   :  { %v4488_v21 = vadd.f32 %v6018_v62, %v4481_v34  ;;  %v5172_v62 = vld [vmem:[%s8607_s16 + $0x60] sm:$0xff]  ;;  %v5131_v34 = vld [vmem:[%s8605_s14 + $0x58] sm:$0xff] }
 0x896   :  { %v8307_v57 = vmax.f32 %v4488_v21, 0.0  ;;  %v5130_v21 = vld [vmem:[%s8605_s14 + $0x50] sm:$0xff] }
 0x898   :  { %4510 = vmatpush.msra.mxu2 %v8307_v57  ;;  %4537 = vmatpush.msra.mxu3 %v8307_v57 }
 0x899   :  { %4664 = vmatpush.msra.mxu0 %v8307_v57 }
 0x89a   :  { %4511 = vmatpush.msra.mxu2 %v8309_v47  ;;  %4538 = vmatpush.msra.mxu3 %v8309_v47 }
 0x89b   :  { %4665 = vmatpush.msra.mxu0 %v8309_v47 }
 0x89c   :  { %4512 = vmatpush.msra.mxu2 %v8314_v28  ;;  %4539 = vmatpush.msra.mxu3 %v8314_v28 }
 0x89d   :  { %4666 = vmatpush.msra.mxu0 %v8314_v28  ;;  %5947 = vmatmul.msk.f32.vlgmr.msra.gmra.mxu3 %vm4493_vm5, %v5946_v60 }
 0x89e   :  { %4565 = vmatpush.msrb.mxu2 %v5949_v55  ;;  %5958 = vmatmul.msk.f32.vlgmr.msra.gmra.mxu0 %vm4493_vm5, %v5957_v36  ;;  %v5128_v55 = vld [vmem:[%s8605_s14 + $0x40] sm:$0xff] }
 0x89f   :  { %4768 = vmatpush.msrb.mxu0 %v8307_v57  ;;  %5945 = vmatmul.msk.f32.vlgmr.msra.gmra.mxu2 %vm4493_vm5, %v4492_v5  ;;  %v5168_v36 = vld [vmem:[%s8607_s16 + $0x40] sm:$0xff]  ;;  %v5127_v5 = vld [vmem:[%s8605_s14 + $0x38] sm:$0xff] }
 0x8a0   :  { %4566 = vmatpush.msrb.mxu2 %v5948_v50  ;;  %4588 = vmatpush.msrb.mxu3 %v4518_v41  ;;  %v5167_v50 = vld [vmem:[%s8607_s16 + $0x38] sm:$0xff]  ;;  %v5125_v41 = vld [vmem:[%s8605_s14 + $0x28] sm:$0xff] }
 0x8a1   :  { %4769 = vmatpush.msrb.mxu0 %v8309_v47 }
 0x8a2   :  { %4612 = vmatpush.msra.mxu2 %v8307_v57  ;;  %4589 = vmatpush.msrb.mxu3 %v4517_v35  ;;  %v5165_v35 = vld [vmem:[%s8607_s16 + $0x28] sm:$0xff] }
 0x8a3   :  { %4770 = vmatpush.msrb.mxu0 %v8314_v28 }
 0x8a4   :  { %4613 = vmatpush.msra.mxu2 %v8309_v47  ;;  %4639 = vmatpush.msra.mxu3 %v5955_v48  ;;  %v5121_v48 = vld [vmem:[%s8605_s14 + $0x8] sm:$0xff] }
 0x8a5   :  { %4872 = vmatpush.msra.mxu0 %v8307_v57 }
 0x8a6   :  { %4614 = vmatpush.msra.mxu2 %v8314_v28  ;;  %5968 = vmatmul.msk.f32.vlgmr.msrb.gmra.mxu0 %vm4493_vm5, %v5967_v19  ;;  %v5126_v19 = vld [vmem:[%s8605_s14 + $0x30] sm:$0xff] }
 0x8a7   :  { %4873 = vmatpush.msra.mxu0 %v8309_v47  ;;  %4640 = vmatpush.msra.mxu3 %v5954_v63  ;;  %v5161_v63 = vld [vmem:[%s8607_s16 + $0x8] sm:$0xff] }
 0x8a9   :  { %4874 = vmatpush.msra.mxu0 %v8314_v28 }
 0x8ab   :  { %4976 = vmatpush.msrb.mxu0 %v8307_v57 }
 0x8ad   :  { %4977 = vmatpush.msrb.mxu0 %v8309_v47 }
 0x8ae   :  { %5978 = vmatmul.msk.f32.vlgmr.msra.gmra.mxu0 %vm4493_vm5, %v5977_v18  ;;  %v5166_v18 = vld [vmem:[%s8607_s16 + $0x30] sm:$0xff] }
 0x8af   :  { %4978 = vmatpush.msrb.mxu0 %v8314_v28 }
 0x8b1   :  { %5080 = vmatpush.msra.mxu0 %v8307_v57 }
 0x8b3   :  { %5081 = vmatpush.msra.mxu0 %v8309_v47 }
 0x8b5   :  { %5082 = vmatpush.msra.mxu0 %v8314_v28 }
 0x8b6   :  { %5988 = vmatmul.msk.f32.vlgmr.msrb.gmra.mxu0 %vm4493_vm5, %v5987_v59 }
 0x8be   :  { %5998 = vmatmul.msk.f32.vlgmr.msra.gmra.mxu0 %vm4493_vm5, %v5997_v61  ;;  %v5163_v61 = vld [vmem:[%s8607_s16 + $0x18] sm:$0xff] }
 0x91b   :  { %v4668_v33 = vpop.f32.mrf.mxu0 }
 0x91c   :  { %5961 = vmatmul.msk.f32.vlgmr.msra.gmra.mxu1 %vm4547_vm6, %v4668_v33  ;;  %v5160_v33 = vld [vmem:[%s8607_s16] sm:$0xff] }
 0x91d   :  { %4899 = vmatpush.msra.mxu1 %v5980_v10 }
 0x91f   :  { %4900 = vmatpush.msra.mxu1 %v5979_v46 }
 0x920   :  { %v4541_v24 = vpop.f32.mrf.mxu3 }
 0x921   :  { %5950 = vmatmul.msk.f32.vlgmr.msrb.gmra.mxu2 %vm4547_vm6, %v4541_v24 }
 0x922   :  { %4716 = vmatpush.msrb.mxu2 %v8307_v57  ;;  %v4514_v17 = vpop.f32.mrf.mxu2 }
 0x923   :  { %5951 = vmatmul.msk.f32.vlgmr.msrb.gmra.mxu3 %vm4547_vm6, %v4514_v17  ;;  %v4772_v38 = vpop.f32.mrf.mxu0  ;;  %v5124_v17 = vld [vmem:[%s8605_s14 + $0x20] sm:$0xff] }
 0x924   :  { %4717 = vmatpush.msrb.mxu2 %v8309_v47  ;;  %4743 = vmatpush.msrb.mxu3 %v5965_v58  ;;  %v5120_v58 = vld [vmem:[%s8605_s14] sm:$0xff] }
 0x925   :  { %5971 = vmatmul.msk.f32.vlgmr.msrb.gmra.mxu1 %vm4547_vm6, %v4772_v38 }
 0x926   :  { %4718 = vmatpush.msrb.mxu2 %v8314_v28  ;;  %4744 = vmatpush.msrb.mxu3 %v5964_v56 }
 0x927   :  { %5003 = vmatpush.msrb.mxu1 %v5990_v3 }
 0x929   :  { %5953 = vmatmul.msk.f32.vlgmr.msra.gmra.mxu2 %vm4493_vm5, %v5952_v37  ;;  %5004 = vmatpush.msrb.mxu1 %v5989_v12  ;;  %v5164_v37 = vld [vmem:[%s8607_s16 + $0x20] sm:$0xff] }
 0x92a   :  { %4820 = vmatpush.msra.mxu2 %v8307_v57 }
 0x92b   :  { %v4876_v11 = vpop.f32.mrf.mxu0 }
 0x92c   :  { %4821 = vmatpush.msra.mxu2 %v8309_v47 }
 0x92d   :  { %5981 = vmatmul.msk.f32.vlgmr.msra.gmra.mxu1 %vm4547_vm6, %v4876_v11 }
 0x92e   :  { %4822 = vmatpush.msra.mxu2 %v8314_v28  ;;  %5107 = vmatpush.msra.mxu1 %v6000_v9  ;;  %v6019_v9 = vld [vmem:[%s8604_s13] ss:$0 sm:$0xff]  ;;  %s6053_s13 = smov [#allocation3]  }
 0x930   :  { %5108 = vmatpush.msra.mxu1 %v5999_v23 }
 0x931   :  { %5963 = vmatmul.msk.f32.vlgmr.msrb.gmra.mxu2 %vm4493_vm5, %v5962_v2  ;;  %v5123_v2 = vld [vmem:[%s8605_s14 + $0x18] sm:$0xff] }
 0x932   :  { %4924 = vmatpush.msrb.mxu2 %v8307_v57 }
 0x933   :  { %v4980_v6 = vpop.f32.mrf.mxu0 }
 0x934   :  { %4925 = vmatpush.msrb.mxu2 %v8309_v47 }
 0x935   :  { %5991 = vmatmul.msk.f32.vlgmr.msrb.gmra.mxu1 %vm4547_vm6, %v4980_v6 }
 0x936   :  { %4926 = vmatpush.msrb.mxu2 %v8314_v28 }
 0x939   :  { %5973 = vmatmul.msk.f32.vlgmr.msra.gmra.mxu2 %vm4493_vm5, %v5972_v39  ;;  %v5122_v39 = vld [vmem:[%s8605_s14 + $0x10] sm:$0xff] }
 0x93a   :  { %5028 = vmatpush.msra.mxu2 %v8307_v57  ;;  %v5129_v57 = vld [vmem:[%s8605_s14 + $0x48] sm:$0xff] }
 0x93b   :  { %v5084_v22 = vpop.f32.mrf.mxu0 }
 0x93c   :  { %5029 = vmatpush.msra.mxu2 %v8309_v47  ;;  %v5169_v47 = vld [vmem:[%s8607_s16 + $0x48] sm:$0xff] }
 0x93d   :  { %6001 = vmatmul.msk.f32.vlgmr.msra.gmra.mxu1 %vm4547_vm6, %v5084_v22 }
 0x93e   :  { %5030 = vmatpush.msra.mxu2 %v8314_v28 }
 0x941   :  { %5983 = vmatmul.msk.f32.vlgmr.msrb.gmra.mxu2 %vm4493_vm5, %v5982_v1  ;;  %v5162_v1 = vld [vmem:[%s8607_s16 + $0x10] sm:$0xff] }
 0x942   :  { %5140 = vmatpush.msrb.mxu2 %v5135_v49 }
 0x944   :  { %5141 = vmatpush.msrb.mxu2 %v5134_v16 }
 0x946   :  { %5142 = vmatpush.msrb.mxu2 %v5133_v20 }
 0x948   :  { %5143 = vmatpush.msrb.mxu2 %v5132_v40 }
 0x949   :  { %5993 = vmatmul.msk.f32.vlgmr.msra.gmra.mxu2 %vm4493_vm5, %v5992_v8 }
 0x94a   :  { %5144 = vmatpush.msrb.mxu2 %v5131_v34 }
 0x94c   :  { %5145 = vmatpush.msrb.mxu2 %v5130_v21 }
 0x94e   :  { %5146 = vmatpush.msrb.mxu2 %v5129_v57 }
 0x950   :  { %5147 = vmatpush.msrb.mxu2 %v5128_v55 }
 0x952   :  { %5148 = vmatpush.msrb.mxu2 %v5127_v5 }
 0x954   :  { %5149 = vmatpush.msrb.mxu2 %v5126_v19 }
 0x956   :  { %5150 = vmatpush.msrb.mxu2 %v5125_v41 }
 0x958   :  { %5151 = vmatpush.msrb.mxu2 %v5124_v17 }
 0x95a   :  { %5152 = vmatpush.msrb.mxu2 %v5123_v2 }
 0x95c   :  { %5153 = vmatpush.msrb.mxu2 %v5122_v39 }
 0x95e   :  { %5154 = vmatpush.msrb.mxu2 %v5121_v48 }
 0x960   :  { %5155 = vmatpush.msrb.mxu2 %v5120_v58 }
 0x999   :  { %v4694_v60 = vpop.f32.mrf.mxu1 }
 0x9a2   :  { %v4798_v59 = vpop.f32.mrf.mxu1 }
 0x9a4   :  { %v8444_v51 = vpop.f32.mrf.mxu2 }
 0x9a6   :  { %v4591_v28 = vpop.f32.mrf.mxu3 }
 0x9a7   :  { %v4592_v8 = vadd.f32 %v4591_v28, %v8444_v51 }
 0x9aa   :  { %v4902_v56 = vpop.f32.mrf.mxu1 }
 0x9ac   :  { %v4616_v0 = vpop.f32.mrf.mxu2 }
 0x9ad   :  { %5956 = vmatmul.msk.f32.vlgmr.msra.gmra.mxu3 %vm4547_vm6, %v4616_v0 }
 0x9ae   :  { %4847 = vmatpush.msra.mxu3 %v5975_v27 }
 0x9b0   :  { %4848 = vmatpush.msra.mxu3 %v5974_v30 }
 0x9b2   :  { %v5006_v46 = vpop.f32.mrf.mxu1 }
 0x9b4   :  { %v4720_v4 = vpop.f32.mrf.mxu2 }
 0x9b5   :  { %5966 = vmatmul.msk.f32.vlgmr.msrb.gmra.mxu3 %vm4547_vm6, %v4720_v4  ;;  %v6051_v4 = vmov 0  }
 0x9b6   :  { %4951 = vmatpush.msrb.mxu3 %v5985_v31  ;;  %6014 = vset.pattern.permute.xlu0 %v6051_v4 }
 0x9b8   :  { %4952 = vmatpush.msrb.mxu3 %v5984_v54  ;;  %v6021_v54 = vld [vmem:[%s8608_s17] ss:$0 sm:$0xff]  ;;  %s5225_s17 = sshll.u32 %s6053_s13, 4  ;;  %s5226_s17 = int_to_ptr.vmem [resolvable:$true] %s5225_s17 }
 0x9ba   :  { %v5110_v0 = vpop.f32.mrf.mxu1 }
 0x9bc   :  { %v4824_v42 = vpop.f32.mrf.mxu2 }
 0x9bd   :  { %5976 = vmatmul.msk.f32.vlgmr.msra.gmra.mxu3 %vm4547_vm6, %v4824_v42 }
 0x9be   :  { %5055 = vmatpush.msra.mxu3 %v5995_v14 }
 0x9c0   :  { %5056 = vmatpush.msra.mxu3 %v5994_v25 }
 0x9c4   :  { %v4928_v32 = vpop.f32.mrf.mxu2 }
 0x9c5   :  { %5986 = vmatmul.msk.f32.vlgmr.msrb.gmra.mxu3 %vm4547_vm6, %v4928_v32  ;;  %v6020_v32 = vld [vmem:[#allocation2] ss:$0 sm:$0xff] }
 0x9c6   :  { %5180 = vmatpush.msrb.mxu3 %v5175_v15  ;;  %v6052_v15 = vmov 8.0  }
 0x9c7   :  { %6022 = vrcp.f32 %v6052_v15 }
 0x9c8   :  { %5181 = vmatpush.msrb.mxu3 %v5174_v29 }
 0x9ca   :  { %5182 = vmatpush.msrb.mxu3 %v5173_v45 }
 0x9cc   :  { %v5032_v52 = vpop.f32.mrf.mxu2  ;;  %5183 = vmatpush.msrb.mxu3 %v5172_v62 }
 0x9cd   :  { %5996 = vmatmul.msk.f32.vlgmr.msra.gmra.mxu3 %vm4547_vm6, %v5032_v52  ;;  %v6023_v16 = vpop.eup %6022 }
 0x9ce   :  { %5184 = vmatpush.msrb.mxu3 %v5171_v7  ;;  %v5205_v29 = vmul.f32 8.0, %v6023_v16  ;;  %vm5209_vm8 = vweird.f32 %v6023_v16 }
 0x9d0   :  { %5185 = vmatpush.msrb.mxu3 %v5170_v13  ;;  %v5206_v20 = vsub.f32 1.0, %v5205_v29 }
 0x9d2   :  { %5186 = vmatpush.msrb.mxu3 %v5169_v47  ;;  %v5207_v45 = vmul.f32 %v6023_v16, %v5206_v20 }
 0x9d4   :  { %5187 = vmatpush.msrb.mxu3 %v5168_v36  ;;  %v5208_v40 = vadd.f32 %v6023_v16, %v5207_v45 }
 0x9d6   :  { %5188 = vmatpush.msrb.mxu3 %v5167_v50  ;;  %v5210_v62 = vsel %vm5209_vm8, %v6023_v16, %v5208_v40 }
 0x9d8   :  { %5189 = vmatpush.msrb.mxu3 %v5166_v18 }
 0x9da   :  { %5190 = vmatpush.msrb.mxu3 %v5165_v35 }
 0x9dc   :  { %5191 = vmatpush.msrb.mxu3 %v5164_v37 }
 0x9de   :  { %5192 = vmatpush.msrb.mxu3 %v5163_v61 }
 0x9e0   :  { %5193 = vmatpush.msrb.mxu3 %v5162_v1 }
 0x9e2   :  { %5194 = vmatpush.msrb.mxu3 %v5161_v63 }
 0x9e4   :  { %5195 = vmatpush.msrb.mxu3 %v5160_v33 }
 0xa30   :  { %v4642_v24 = vpop.f32.mrf.mxu3 }
 0xa31   :  { %v4645_v43 = vadd.f32 %v4642_v24, %v4592_v8 }
 0xa33   :  { %v4697_v53 = vadd.f32 %v4694_v60, %v4645_v43 }
 0xa38   :  { %v4746_v26 = vpop.f32.mrf.mxu3 }
 0xa39   :  { %v4749_v38 = vadd.f32 %v4746_v26, %v4697_v53 }
 0xa3b   :  { %v4801_v10 = vadd.f32 %v4798_v59, %v4749_v38 }
 0xa40   :  { %v4850_v44 = vpop.f32.mrf.mxu3 }
 0xa41   :  { %v4853_v11 = vadd.f32 %v4850_v44, %v4801_v10 }
 0xa43   :  { %v4905_v3 = vadd.f32 %v4902_v56, %v4853_v11 }
 0xa48   :  { %v4954_v51 = vpop.f32.mrf.mxu3 }
 0xa49   :  { %v4957_v12 = vadd.f32 %v4954_v51, %v4905_v3 }
 0xa4b   :  { %v5009_v6 = vadd.f32 %v5006_v46, %v4957_v12 }
 0xa50   :  { %v5058_v27 = vpop.f32.mrf.mxu3 }
 0xa51   :  { %v5061_v30 = vadd.f32 %v5058_v27, %v5009_v6 }
 0xa53   :  { %v5113_v23 = vadd.f32 %v5110_v0, %v5061_v30 }
 0xa55   :  { %v5118_v22 = vadd.f32 %v6019_v9, %v5113_v23 }
 0xa57   :  { %v5119_v31 = vmax.f32 %v5118_v22, 0.0 }
 0xa59   :  { %5156 = vmatmul.f32.vlgmr.msrb.gmra.mxu2 %v5119_v31  ;;  %5196 = vmatmul.f32.vlgmr.msrb.gmra.mxu3 %v5119_v31 }
 0xadc   :  { %v5197_v14 = vpop.f32.mrf.mxu3  ;;  %v5157_v52 = vpop.f32.mrf.mxu2 }
 0xadd   :  { %v5198_v42 = vadd.f32 %v6021_v54, %v5197_v14  ;;  %v5158_v49 = vadd.f32 %v6020_v32, %v5157_v52 }
 0xadf   :  { %v5201_v25 = vsel %vm5200_vm7, %v5198_v42, 0.0 }
 0xae0   :  { %5202 = vadd.xlane.f32.xlu0 %v5201_v25 }
 0xaf4   :  { %5215 = vperm.xlu0 %6014, %v5158_v49  }
 0xb53   :  { %v5203_v34 = vpop.xlane.xlu0 %5202 }
 0xb54   :  { %v5211_v7 = vmul.f32 %v5210_v62, %v5203_v34 }
 0xb56   :  { %v5212_v21 = vsub.f32 %v5198_v42, %v5211_v7 }
 0xb66   :  { %v5216_v13 = vpop.permute.xlu0 %5215 }
 0xb67   :  { %v5218_v57 = vadd.f32 %v5216_v13, %v5212_v21 }
 0xb69   :  { %5219 = vst.msk [vmem:[#allocation3] sm:$0x3] %vm5200_vm7, %v5218_v57 }
 0xb6a   :  { %5230 = dma.vmem_to_hbm [thread:$0]  %s5226_s17, 32, %s5228_s2, [#allocation4]  }
 0xb6b   :  { %6049 = dma.done.wait [#allocation4], 32  }
 0xb6c   :  { %6050 = vsyncadd [#allocation4], 4294967264 }
 0xb6d   :  { %5235 = vsyncpa [#allocation4], 1 }

</bundles_post_ra>
